<compile_context>
chip_gen: v5e
topology: v5e:2x2
jax: 0.10.0
libtpu: 0.0.40
codegen_flags: <defaults>
</compile_context>

<pallas_src>
import functools
import math

import jax
import jax.numpy as jnp
from jax.experimental import pallas as pl
from jax.experimental.pallas import tpu as pltpu

_NEG_INF = -1e9
_LN_EPS = 1e-5
_VMEM_LIMIT = 32 * 1024 * 1024  # safe on v5e/v6e/v7x, leaves headroom on v7x (64 MiB phys)


def _cparams(n_parallel_axes):
    return pltpu.CompilerParams(
        dimension_semantics=("parallel",) * n_parallel_axes,
        vmem_limit_bytes=_VMEM_LIMIT)


def _pick_tm(M):
    """Row-tile for M-parallel kernels: divides M, prefers >=2 grid steps, <=256."""
    for tm in (256, 128, 64, 32, 16, 8):
        if M % tm == 0 and M // tm >= 2:
            return tm
    return M


# ----------------------------- Pallas kernels -----------------------------

def _kvq_proj_kernel(x_ref, w_ref, b_ref, kv_ref, q_ref, *, F):
    # fused K|V|Q projection: one x read, one (F, 3F) matmul, two lane-dense stores
    x = x_ref[...].astype(jnp.bfloat16)
    y = jnp.dot(x, w_ref[...], preferred_element_type=jnp.float32) + b_ref[...]
    kv_ref[...] = y[:, : 2 * F]
    q_ref[...] = y[:, 2 * F:]


def pallas_kvq_proj(x2d, w_kvq, b_kvq, F):
    M = x2d.shape[0]
    tm = _pick_tm(M)
    kern = functools.partial(_kvq_proj_kernel, F=F)
    return pl.pallas_call(
        kern,
        grid=(M // tm,),
        in_specs=[pl.BlockSpec((tm, F), lambda i: (i, 0)),
                  pl.BlockSpec((F, 3 * F), lambda i: (0, 0)),
                  pl.BlockSpec((1, 3 * F), lambda i: (0, 0))],
        out_specs=[pl.BlockSpec((tm, 2 * F), lambda i: (i, 0)),
                   pl.BlockSpec((tm, F), lambda i: (i, 0))],
        out_shape=(jax.ShapeDtypeStruct((M, 2 * F), jnp.float32),
                   jax.ShapeDtypeStruct((M, F), jnp.float32)),
        compiler_params=_cparams(1),
    )(x2d, w_kvq, b_kvq)


def _linear_kernel(x_ref, w_ref, b_ref, o_ref):
    x = x_ref[...].astype(jnp.bfloat16)
    o_ref[...] = jnp.dot(x, w_ref[...], preferred_element_type=jnp.float32) + b_ref[...]


def pallas_linear(x2d, w_bf16, b_f32):
    M, K = x2d.shape
    N = w_bf16.shape[1]
    tm = _pick_tm(M)
    return pl.pallas_call(
        _linear_kernel,
        grid=(M // tm,),
        in_specs=[pl.BlockSpec((tm, K), lambda i: (i, 0)),
                  pl.BlockSpec((K, N), lambda i: (0, 0)),
                  pl.BlockSpec((1, N), lambda i: (0, 0))],
        out_specs=pl.BlockSpec((tm, N), lambda i: (i, 0)),
        out_shape=jax.ShapeDtypeStruct((M, N), jnp.float32),
        compiler_params=_cparams(1),
    )(x2d, w_bf16, b_f32)


def _proj_res_ln_kernel(ctx_ref, res_ref, wo_ref, bo_ref, g_ref, beta_ref, o_ref, *, eps):
    # out-projection + residual add + LayerNorm, all on one VMEM-resident tile
    ctx = ctx_ref[...].astype(jnp.bfloat16)
    y = jnp.dot(ctx, wo_ref[...], preferred_element_type=jnp.float32)
    y = y + bo_ref[...] + res_ref[...]
    mu = jnp.mean(y, axis=-1, keepdims=True)
    yc = y - mu
    var = jnp.mean(yc * yc, axis=-1, keepdims=True)
    o_ref[...] = yc * jax.lax.rsqrt(var + eps) * g_ref[...] + beta_ref[...]


def pallas_proj_res_ln(ctx2d, res2d, wo, bo, g, beta):
    M, F = ctx2d.shape
    tm = _pick_tm(M)
    kern = functools.partial(_proj_res_ln_kernel, eps=_LN_EPS)
    return pl.pallas_call(
        kern,
        grid=(M // tm,),
        in_specs=[pl.BlockSpec((tm, F), lambda i: (i, 0)),
                  pl.BlockSpec((tm, F), lambda i: (i, 0)),
                  pl.BlockSpec((F, F), lambda i: (0, 0)),
                  pl.BlockSpec((1, F), lambda i: (0, 0)),
                  pl.BlockSpec((1, F), lambda i: (0, 0)),
                  pl.BlockSpec((1, F), lambda i: (0, 0))],
        out_specs=pl.BlockSpec((tm, F), lambda i: (i, 0)),
        out_shape=jax.ShapeDtypeStruct((M, F), jnp.float32),
        compiler_params=_cparams(1),
    )(ctx2d, res2d, wo, bo, g, beta)


def _ffn_res_ln_kernel(x_ref, w1_ref, b1_ref, w2_ref, b2_ref, g_ref, beta_ref, o_ref, *, eps):
    # FFN (two matmuls + ReLU) + residual + LayerNorm fused; h stays a (tm, Hd) tile
    x = x_ref[...]
    h = jnp.dot(x.astype(jnp.bfloat16), w1_ref[...],
                preferred_element_type=jnp.float32) + b1_ref[...]
    h = jnp.maximum(h, 0.0)
    y = jnp.dot(h.astype(jnp.bfloat16), w2_ref[...],
                preferred_element_type=jnp.float32) + b2_ref[...] + x
    mu = jnp.mean(y, axis=-1, keepdims=True)
    yc = y - mu
    var = jnp.mean(yc * yc, axis=-1, keepdims=True)
    o_ref[...] = yc * jax.lax.rsqrt(var + eps) * g_ref[...] + beta_ref[...]


def pallas_ffn_res_ln(x2d, w1, b1, w2, b2, g, beta):
    M, F = x2d.shape
    Hd = w1.shape[1]
    tm = _pick_tm(M)
    kern = functools.partial(_ffn_res_ln_kernel, eps=_LN_EPS)
    return pl.pallas_call(
        kern,
        grid=(M // tm,),
        in_specs=[pl.BlockSpec((tm, F), lambda i: (i, 0)),
                  pl.BlockSpec((F, Hd), lambda i: (0, 0)),
                  pl.BlockSpec((1, Hd), lambda i: (0, 0)),
                  pl.BlockSpec((Hd, F), lambda i: (0, 0)),
                  pl.BlockSpec((1, F), lambda i: (0, 0)),
                  pl.BlockSpec((1, F), lambda i: (0, 0)),
                  pl.BlockSpec((1, F), lambda i: (0, 0))],
        out_specs=pl.BlockSpec((tm, F), lambda i: (i, 0)),
        out_shape=jax.ShapeDtypeStruct((M, F), jnp.float32),
        compiler_params=_cparams(1),
    )(x2d, w1, b1, w2, b2, g, beta)


def _attn_kernel(q_ref, kv_ref, o_ref, *, heads, causal, scale):
    # one batch per grid step; all heads processed here -> lane-dense (Lq, F) store.
    q = q_ref[...]                       # (Lq, F)  f32
    kv = kv_ref[...]                     # (Lk, 2F) f32, layout [K | V]
    Lq, F = q.shape
    Lk = kv.shape[0]
    dh = F // heads
    k = kv[:, :F]
    v = kv[:, F:]
    if causal:
        row = jax.lax.broadcasted_iota(jnp.int32, (Lq, Lk), 0)
        col = jax.lax.broadcasted_iota(jnp.int32, (Lq, Lk), 1)
        neg = jnp.where(col <= row, 0.0, _NEG_INF).astype(jnp.float32)
    outs = []
    for h in range(heads):               # static unrolled loop over heads
        qh = q[:, h * dh:(h + 1) * dh].astype(jnp.bfloat16)
        kh = k[:, h * dh:(h + 1) * dh].astype(jnp.bfloat16)
        vh = v[:, h * dh:(h + 1) * dh].astype(jnp.bfloat16)
        s = jax.lax.dot_general(qh, kh, (((1,), (1,)), ((), ())),
                                preferred_element_type=jnp.float32) * scale
        if causal:
            s = s + neg
        m = jnp.max(s, axis=-1, keepdims=True)
        p = jnp.exp(s - m)
        l = jnp.sum(p, axis=-1, keepdims=True)
        ctx = jnp.dot(p.astype(jnp.bfloat16), vh, preferred_element_type=jnp.float32)
        outs.append(ctx * pl.reciprocal(l, approx=True))
    o_ref[...] = jnp.concatenate(outs, axis=-1)


def pallas_attention(q, kv, heads, causal):
    # q: (B, Lq, F) with heads contiguous along F; kv: (B, Lk, 2F) = [K | V]
    B, Lq, F = q.shape
    Lk = kv.shape[1]
    kern = functools.partial(_attn_kernel, heads=heads, causal=causal,
                             scale=1.0 / math.sqrt(F // heads))
    return pl.pallas_call(
        kern,
        grid=(B,),
        in_specs=[pl.BlockSpec((pl.Squeezed(), Lq, F), lambda b: (b, 0, 0)),
                  pl.BlockSpec((pl.Squeezed(), Lk, 2 * F), lambda b: (b, 0, 0))],
        out_specs=pl.BlockSpec((pl.Squeezed(), Lq, F), lambda b: (b, 0, 0)),
        out_shape=jax.ShapeDtypeStruct((B, Lq, F), jnp.float32),
        compiler_params=_cparams(1),
    )(q, kv)


# ----------------------------- model glue (plain JAX, no transposes) -----------------------------

def self_attention(p, x, heads, causal):
    B, L, F = x.shape
    kv, q = pallas_kvq_proj(x.reshape(B * L, F), p['w_kvq'], p['b_kvq'], F)
    return pallas_attention(q.reshape(B, L, F), kv.reshape(B, L, 2 * F), heads, causal)


def cross_attention(p, query, memory, heads):
    B, Lq, F = query.shape
    Lk = memory.shape[1]
    q = pallas_linear(query.reshape(B * Lq, F), p['wq'], p['bq']).reshape(B, Lq, F)
    kv = pallas_linear(memory.reshape(B * Lk, F), p['w_kv'], p['b_kv']).reshape(B, Lk, 2 * F)
    return pallas_attention(q, kv, heads, causal=False)


def proj_res_ln(ctx, residual, wo, bo, g, beta):
    B, L, F = ctx.shape
    y = pallas_proj_res_ln(ctx.reshape(B * L, F), residual.reshape(B * L, F),
                           wo, bo, g, beta)
    return y.reshape(B, L, F)


def ffn_res_ln(x, w1, b1, w2, b2, g, beta):
    B, L, F = x.shape
    y = pallas_ffn_res_ln(x.reshape(B * L, F), w1, b1, w2, b2, g, beta)
    return y.reshape(B, L, F)


def encoder_block_forward(p, x, heads):
    ctx = self_attention(p['attn'], x, heads, causal=False)
    h = proj_res_ln(ctx, x, p['attn']['wo'], p['attn']['bo'],
                    p['norm1_g'], p['norm1_b'])
    return ffn_res_ln(h, p['ff_w1'], p['ff_b1'], p['ff_w2'], p['ff_b2'],
                      p['norm2_g'], p['norm2_b'])


def decoder_block_forward(p, x, enc_out, heads):
    # causal self-attention + norm
    ctx = self_attention(p['self_attn'], x, heads, causal=True)
    query = proj_res_ln(ctx, x, p['self_attn']['wo'], p['self_attn']['bo'],
                        p['norm_g'], p['norm_b'])
    # cross-attention TransformerBlock (q = decoder query, k/v = enc_out, no mask)
    tb = p['tblock']
    ctx2 = cross_attention(tb['attn'], query, enc_out, heads)
    h = proj_res_ln(ctx2, query, tb['attn']['wo'], tb['attn']['bo'],
                    tb['norm1_g'], tb['norm1_b'])
    return ffn_res_ln(h, tb['ff_w1'], tb['ff_b1'], tb['ff_w2'], tb['ff_b2'],
                      tb['norm2_g'], tb['norm2_b'])


def encoder_forward(p, src, heads):
    N, S, F = src.shape
    out = src + p['pos_emb'][:S][None, :, :]
    for lp in p['layers']:
        out = encoder_block_forward(lp, out, heads)
    return out


def decoder_forward(p, trg_padded, enc_out, heads, output_dim):
    N, S, F = trg_padded.shape
    x = trg_padded + p['pos_emb'][:S][None, :, :]
    for lp in p['layers']:
        x = decoder_block_forward(lp, x, enc_out, heads)
    # lane-dense fc_out (weight padded to 128 cols); slice real output_dim outside
    logits = pallas_linear(x.reshape(N * S, F), p['fc_w_pad'], p['fc_b_pad'])
    return logits[:, :output_dim].reshape(N, S, output_dim)


def transformer_forward(params, src, trg, heads, output_dim):
    N, trg_len, trg_f = trg.shape
    F = src.shape[2]
    padded_trg = jnp.concatenate(
        [trg, jnp.zeros((N, trg_len, F - trg_f), jnp.float32)], axis=2)
    enc = encoder_forward(params['encoder'], src, heads)
    return decoder_forward(params['decoder'], padded_trg, enc, heads, output_dim)


# ----------------------------- deterministic parameter init -----------------------------

def _dense(key, d_in, d_out):
    w = (0.05 * jax.random.normal(key, (d_in, d_out), jnp.float32)).astype(jnp.bfloat16)
    b = jnp.zeros((1, d_out), jnp.float32)
    return w, b


def init_self_mha(key, F):
    kk, kv_, kq, ko = jax.random.split(key, 4)
    wk, _ = _dense(kk, F, F)
    wv, _ = _dense(kv_, F, F)
    wq, _ = _dense(kq, F, F)
    wo, bo = _dense(ko, F, F)
    return dict(w_kvq=jnp.concatenate([wk, wv, wq], axis=1),   # (F, 3F) bf16, [K|V|Q]
                b_kvq=jnp.zeros((1, 3 * F), jnp.float32),
                wo=wo, bo=bo)


def init_cross_mha(key, F):
    kk, kv_, kq, ko = jax.random.split(key, 4)
    wk, _ = _dense(kk, F, F)
    wv, _ = _dense(kv_, F, F)
    wq, bq = _dense(kq, F, F)
    wo, bo = _dense(ko, F, F)
    return dict(wq=wq, bq=bq,
                w_kv=jnp.concatenate([wk, wv], axis=1),        # (F, 2F) bf16, [K|V]
                b_kv=jnp.zeros((1, 2 * F), jnp.float32),
                wo=wo, bo=bo)


def _ln_params(F):
    return jnp.ones((1, F), jnp.float32), jnp.zeros((1, F), jnp.float32)


def init_encoder_block(key, F, exp):
    ka, k1, k2 = jax.random.split(key, 3)
    w1, b1 = _dense(k1, F, exp * F)
    w2, b2 = _dense(k2, exp * F, F)
    n1g, n1b = _ln_params(F)
    n2g, n2b = _ln_params(F)
    return dict(attn=init_self_mha(ka, F),
                norm1_g=n1g, norm1_b=n1b, norm2_g=n2g, norm2_b=n2b,
                ff_w1=w1, ff_b1=b1, ff_w2=w2, ff_b2=b2)


def init_decoder_block(key, F, exp):
    ka, kc, k1, k2 = jax.random.split(key, 4)
    w1, b1 = _dense(k1, F, exp * F)
    w2, b2 = _dense(k2, exp * F, F)
    ng, nb = _ln_params(F)
    n1g, n1b = _ln_params(F)
    n2g, n2b = _ln_params(F)
    return dict(self_attn=init_self_mha(ka, F),
                norm_g=ng, norm_b=nb,
                tblock=dict(attn=init_cross_mha(kc, F),
                            norm1_g=n1g, norm1_b=n1b, norm2_g=n2g, norm2_b=n2b,
                            ff_w1=w1, ff_b1=b1, ff_w2=w2, ff_b2=b2))


def init_transformer(key, F, output_dim, num_layers, exp, max_length):
    ke, kd = jax.random.split(key)
    keys_e = jax.random.split(ke, num_layers + 1)
    keys_d = jax.random.split(kd, num_layers + 2)

    # fc_out padded to a lane-dense (>=128) output width; sliced back in JAX
    n_pad = max(128, ((output_dim + 127) // 128) * 128)
    fc_w = 0.05 * jax.random.normal(keys_d[1], (F, output_dim), jnp.float32)
    fc_w_pad = jnp.zeros((F, n_pad), jnp.float32).at[:, :output_dim].set(fc_w)
    fc_w_pad = fc_w_pad.astype(jnp.bfloat16)
    fc_b_pad = jnp.zeros((1, n_pad), jnp.float32)

    encoder = dict(
        pos_emb=0.05 * jax.random.normal(keys_e[0], (max_length, F), jnp.float32),
        layers=[init_encoder_block(k, F, exp) for k in keys_e[1:]])
    decoder = dict(
        pos_emb=0.05 * jax.random.normal(keys_d[0], (max_length, F), jnp.float32),
        layers=[init_decoder_block(k, F, exp) for k in keys_d[2:]],
        fc_w_pad=fc_w_pad, fc_b_pad=fc_b_pad)
    return dict(encoder=encoder, decoder=decoder)


# ----------------------------- demo -----------------------------

if __name__ == "__main__":
    N, seq, feature_num, heads, output_dim = 2, 8, 32, 2, 1
    num_layers, forward_expansion, max_length = 2, 1, 100  # small config

    key = jax.random.PRNGKey(0)
    kp, ksrc, ktrg = jax.random.split(key, 3)
    params = init_transformer(kp, feature_num, output_dim, num_layers,
                              forward_expansion, max_length)
    src = jax.random.normal(ksrc, (N, seq, feature_num), jnp.float32)
    trg = jax.random.normal(ktrg, (N, seq, 1), jnp.float32)

    fwd = jax.jit(functools.partial(transformer_forward, heads=heads,
                                    output_dim=output_dim))
    out = fwd(params, src, trg)
    jax.block_until_ready(out)
    assert out.shape == (N, seq, output_dim)
    assert bool(jnp.all(jnp.isfinite(out)))
    print("KERNEL_OK")
</pallas_src>

<mosaic_0001>
module attributes {stable_mosaic.version = 11 : i64} {
  func.func @_kvq_proj_kernel(%arg0: i32, %arg1: memref<8x32xf32, #tpu.memory_space<vmem>>, %arg2: memref<32x96xbf16, #tpu.memory_space<vmem>>, %arg3: memref<1x96xf32, #tpu.memory_space<vmem>>, %arg4: memref<8x64xf32, #tpu.memory_space<vmem>>, %arg5: memref<8x32xf32, #tpu.memory_space<vmem>>) attributes {dimension_semantics = [#tpu.dimension_semantics<parallel>], iteration_bounds = array<i64: 2>, scalar_prefetch = 0 : i64, scratch_operands = 0 : i64, tpu.core_type = #tpu.core_type<tc>, window_params = [{transform_indices = @transform_0, window_bounds = array<i64: 8, 32>}, {pipeline_mode = #tpu.pipeline_mode<synchronous>, transform_indices = @transform_1, window_bounds = array<i64: 32, 96>}, {pipeline_mode = #tpu.pipeline_mode<synchronous>, transform_indices = @transform_2, window_bounds = array<i64: 1, 96>}, {transform_indices = @transform_3, window_bounds = array<i64: 8, 64>}, {transform_indices = @transform_4, window_bounds = array<i64: 8, 32>}]} {
    %c0 = arith.constant 0 : index
    %c0_0 = arith.constant 0 : index
    %0 = vector.load %arg1[%c0, %c0_0] : memref<8x32xf32, #tpu.memory_space<vmem>>, vector<8x32xf32>
    %1 = arith.truncf %0 : vector<8x32xf32> to vector<8x32xbf16>
    %c0_1 = arith.constant 0 : index
    %c0_2 = arith.constant 0 : index
    %2 = vector.load %arg2[%c0_1, %c0_2] : memref<32x96xbf16, #tpu.memory_space<vmem>>, vector<32x96xbf16>
    %cst = arith.constant dense<0.000000e+00> : vector<8x96xf32>
    %3 = tpu.matmul %1, %2, %cst {dimension_numbers = #tpu.dot_dimension_numbers<[1], [0], [0], [1], [0, 0, 1, 1], [], []>} : vector<8x32xbf16>, vector<32x96xbf16>, vector<8x96xf32> -> vector<8x96xf32>
    %c0_3 = arith.constant 0 : index
    %c0_4 = arith.constant 0 : index
    %4 = vector.load %arg3[%c0_3, %c0_4] : memref<1x96xf32, #tpu.memory_space<vmem>>, vector<1x96xf32>
    %5 = vector.broadcast %4 : vector<1x96xf32> to vector<8x96xf32>
    %6 = arith.addf %3, %5 : vector<8x96xf32>
    %7 = vector.extract_strided_slice %6 {offsets = [0, 0], sizes = [8, 64], strides = [1, 1]} : vector<8x96xf32> to vector<8x64xf32>
    %c0_5 = arith.constant 0 : index
    %c0_6 = arith.constant 0 : index
    %8 = vector.load %arg4[%c0_5, %c0_6] : memref<8x64xf32, #tpu.memory_space<vmem>>, vector<8x64xf32>
    tpu.vector_store %arg4[%c0_5, %c0_6], %7 {strides = array<i32>} : memref<8x64xf32, #tpu.memory_space<vmem>>, vector<8x64xf32>,
    %9 = vector.extract_strided_slice %6 {offsets = [0, 64], sizes = [8, 32], strides = [1, 1]} : vector<8x96xf32> to vector<8x32xf32>
    %c0_7 = arith.constant 0 : index
    %c0_8 = arith.constant 0 : index
    %10 = vector.load %arg5[%c0_7, %c0_8] : memref<8x32xf32, #tpu.memory_space<vmem>>, vector<8x32xf32>
    tpu.vector_store %arg5[%c0_7, %c0_8], %9 {strides = array<i32>} : memref<8x32xf32, #tpu.memory_space<vmem>>, vector<8x32xf32>,
    return
  }
  func.func @transform_0(%arg0: i32) -> (i32, i32) {
    %c0_i32 = arith.constant 0 : i32
    %c0_i32_0 = arith.constant 0 : i32
    return %arg0, %c0_i32 : i32, i32
  }
  func.func @transform_1(%arg0: i32) -> (i32, i32) {
    %c0_i32 = arith.constant 0 : i32
    %c0_i32_0 = arith.constant 0 : i32
    %c0_i32_1 = arith.constant 0 : i32
    return %c0_i32, %c0_i32_0 : i32, i32
  }
  func.func @transform_2(%arg0: i32) -> (i32, i32) {
    %c0_i32 = arith.constant 0 : i32
    %c0_i32_0 = arith.constant 0 : i32
    %c0_i32_1 = arith.constant 0 : i32
    return %c0_i32, %c0_i32_0 : i32, i32
  }
  func.func @transform_3(%arg0: i32) -> (i32, i32) {
    %c0_i32 = arith.constant 0 : i32
    %c0_i32_0 = arith.constant 0 : i32
    return %arg0, %c0_i32 : i32, i32
  }
  func.func @transform_4(%arg0: i32) -> (i32, i32) {
    %c0_i32 = arith.constant 0 : i32
    %c0_i32_0 = arith.constant 0 : i32
    return %arg0, %c0_i32 : i32, i32
  }
}

module attributes {stable_mosaic.version = 11 : i64} {
  func.func @_attn_kernel(%arg0: i32, %arg1: memref<1x8x32xf32, #tpu.memory_space<vmem>>, %arg2: memref<1x8x64xf32, #tpu.memory_space<vmem>>, %arg3: memref<1x8x32xf32, #tpu.memory_space<vmem>>) attributes {dimension_semantics = [#tpu.dimension_semantics<parallel>], iteration_bounds = array<i64: 2>, scalar_prefetch = 0 : i64, scratch_operands = 0 : i64, tpu.core_type = #tpu.core_type<tc>, window_params = [{transform_indices = @transform_0, window_bounds = array<i64: 1, 8, 32>}, {transform_indices = @transform_1, window_bounds = array<i64: 1, 8, 64>}, {transform_indices = @transform_2, window_bounds = array<i64: 1, 8, 32>}]} {
    %c0 = arith.constant 0 : index
    %c0_0 = arith.constant 0 : index
    %c0_1 = arith.constant 0 : index
    %0 = vector.load %arg1[%c0, %c0_0, %c0_1] : memref<1x8x32xf32, #tpu.memory_space<vmem>>, vector<1x8x32xf32>
    %1 = vector.shape_cast %0 : vector<1x8x32xf32> to vector<8x32xf32>
    %c0_2 = arith.constant 0 : index
    %c0_3 = arith.constant 0 : index
    %c0_4 = arith.constant 0 : index
    %2 = vector.load %arg2[%c0_2, %c0_3, %c0_4] : memref<1x8x64xf32, #tpu.memory_space<vmem>>, vector<1x8x64xf32>
    %3 = vector.shape_cast %2 : vector<1x8x64xf32> to vector<8x64xf32>
    %4 = vector.extract_strided_slice %3 {offsets = [0, 0], sizes = [8, 32], strides = [1, 1]} : vector<8x64xf32> to vector<8x32xf32>
    %5 = vector.extract_strided_slice %3 {offsets = [0, 32], sizes = [8, 32], strides = [1, 1]} : vector<8x64xf32> to vector<8x32xf32>
    %6 = tpu.iota {dimensions = array<i32: 0>} : vector<8x8xi32>
    %7 = tpu.iota {dimensions = array<i32: 1>} : vector<8x8xi32>
    %8 = arith.cmpi sle, %7, %6 : vector<8x8xi32>
    %cst = arith.constant 0.000000e+00 : f32
    %cst_5 = arith.constant -1.000000e+09 : f32
    %9 = vector.broadcast %cst : f32 to vector<8x8xf32>
    %10 = vector.broadcast %cst_5 : f32 to vector<8x8xf32>
    %11 = arith.select %8, %9, %10 : vector<8x8xi1>, vector<8x8xf32>
    %12 = vector.extract_strided_slice %1 {offsets = [0, 0], sizes = [8, 16], strides = [1, 1]} : vector<8x32xf32> to vector<8x16xf32>
    %13 = arith.truncf %12 : vector<8x16xf32> to vector<8x16xbf16>
    %14 = vector.extract_strided_slice %4 {offsets = [0, 0], sizes = [8, 16], strides = [1, 1]} : vector<8x32xf32> to vector<8x16xf32>
    %15 = arith.truncf %14 : vector<8x16xf32> to vector<8x16xbf16>
    %16 = vector.extract_strided_slice %5 {offsets = [0, 0], sizes = [8, 16], strides = [1, 1]} : vector<8x32xf32> to vector<8x16xf32>
    %17 = arith.truncf %16 : vector<8x16xf32> to vector<8x16xbf16>
    %cst_6 = arith.constant dense<0.000000e+00> : vector<8x8xf32>
    %18 = tpu.matmul %13, %15, %cst_6 {dimension_numbers = #tpu.dot_dimension_numbers<[1], [1], [0], [0], [0, 0, 1, 0], [], []>} : vector<8x16xbf16>, vector<8x16xbf16>, vector<8x8xf32> -> vector<8x8xf32>
    %cst_7 = arith.constant 2.500000e-01 : f32
    %19 = vector.broadcast %cst_7 : f32 to vector<8x8xf32>
    %20 = arith.mulf %18, %19 : vector<8x8xf32>
    %21 = arith.addf %20, %11 : vector<8x8xf32>
    %cst_8 = arith.constant dense<0xFF800000> : vector<8xf32>
    %22 = vector.multi_reduction <maximumf>, %21, %cst_8 [1] : vector<8x8xf32> to vector<8xf32>
    %23 = vector.shape_cast %22 : vector<8xf32> to vector<8x1xf32>
    %24 = vector.broadcast %23 : vector<8x1xf32> to vector<8x8xf32>
    %25 = arith.subf %21, %24 : vector<8x8xf32>
    %26 = math.exp %25 : vector<8x8xf32>
    %cst_9 = arith.constant dense<0.000000e+00> : vector<8xf32>
    %27 = vector.multi_reduction <add>, %26, %cst_9 [1] : vector<8x8xf32> to vector<8xf32>
    %28 = vector.shape_cast %27 : vector<8xf32> to vector<8x1xf32>
    %29 = arith.truncf %26 : vector<8x8xf32> to vector<8x8xbf16>
    %cst_10 = arith.constant dense<0.000000e+00> : vector<8x16xf32>
    %30 = tpu.matmul %29, %17, %cst_10 {dimension_numbers = #tpu.dot_dimension_numbers<[1], [0], [0], [1], [0, 0, 1, 1], [], []>} : vector<8x8xbf16>, vector<8x16xbf16>, vector<8x16xf32> -> vector<8x16xf32>
    %31 = tpu.reciprocal %28 {approx = true} : vector<8x1xf32> -> vector<8x1xf32>
    %32 = vector.broadcast %31 : vector<8x1xf32> to vector<8x16xf32>
    %33 = arith.mulf %30, %32 : vector<8x16xf32>
    %34 = vector.extract_strided_slice %1 {offsets = [0, 16], sizes = [8, 16], strides = [1, 1]} : vector<8x32xf32> to vector<8x16xf32>
    %35 = arith.truncf %34 : vector<8x16xf32> to vector<8x16xbf16>
    %36 = vector.extract_strided_slice %4 {offsets = [0, 16], sizes = [8, 16], strides = [1, 1]} : vector<8x32xf32> to vector<8x16xf32>
    %37 = arith.truncf %36 : vector<8x16xf32> to vector<8x16xbf16>
    %38 = vector.extract_strided_slice %5 {offsets = [0, 16], sizes = [8, 16], strides = [1, 1]} : vector<8x32xf32> to vector<8x16xf32>
    %39 = arith.truncf %38 : vector<8x16xf32> to vector<8x16xbf16>
    %cst_11 = arith.constant dense<0.000000e+00> : vector<8x8xf32>
    %40 = tpu.matmul %35, %37, %cst_11 {dimension_numbers = #tpu.dot_dimension_numbers<[1], [1], [0], [0], [0, 0, 1, 0], [], []>} : vector<8x16xbf16>, vector<8x16xbf16>, vector<8x8xf32> -> vector<8x8xf32>
    %cst_12 = arith.constant 2.500000e-01 : f32
    %41 = vector.broadcast %cst_12 : f32 to vector<8x8xf32>
    %42 = arith.mulf %40, %41 : vector<8x8xf32>
    %43 = arith.addf %42, %11 : vector<8x8xf32>
    %cst_13 = arith.constant dense<0xFF800000> : vector<8xf32>
    %44 = vector.multi_reduction <maximumf>, %43, %cst_13 [1] : vector<8x8xf32> to vector<8xf32>
    %45 = vector.shape_cast %44 : vector<8xf32> to vector<8x1xf32>
    %46 = vector.broadcast %45 : vector<8x1xf32> to vector<8x8xf32>
    %47 = arith.subf %43, %46 : vector<8x8xf32>
    %48 = math.exp %47 : vector<8x8xf32>
    %cst_14 = arith.constant dense<0.000000e+00> : vector<8xf32>
    %49 = vector.multi_reduction <add>, %48, %cst_14 [1] : vector<8x8xf32> to vector<8xf32>
    %50 = vector.shape_cast %49 : vector<8xf32> to vector<8x1xf32>
    %51 = arith.truncf %48 : vector<8x8xf32> to vector<8x8xbf16>
    %cst_15 = arith.constant dense<0.000000e+00> : vector<8x16xf32>
    %52 = tpu.matmul %51, %39, %cst_15 {dimension_numbers = #tpu.dot_dimension_numbers<[1], [0], [0], [1], [0, 0, 1, 1], [], []>} : vector<8x8xbf16>, vector<8x16xbf16>, vector<8x16xf32> -> vector<8x16xf32>
    %53 = tpu.reciprocal %50 {approx = true} : vector<8x1xf32> -> vector<8x1xf32>
    %54 = vector.broadcast %53 : vector<8x1xf32> to vector<8x16xf32>
    %55 = arith.mulf %52, %54 : vector<8x16xf32>
    %56 = tpu.concatenate %33, %55 in 1 : vector<8x16xf32>, vector<8x16xf32> -> vector<8x32xf32>
    %c0_16 = arith.constant 0 : index
    %c0_17 = arith.constant 0 : index
    %c0_18 = arith.constant 0 : index
    %57 = vector.load %arg3[%c0_16, %c0_17, %c0_18] : memref<1x8x32xf32, #tpu.memory_space<vmem>>, vector<1x8x32xf32>
    %58 = vector.shape_cast %57 : vector<1x8x32xf32> to vector<8x32xf32>
    %59 = vector.shape_cast %56 : vector<8x32xf32> to vector<1x8x32xf32>
    tpu.vector_store %arg3[%c0_16, %c0_17, %c0_18], %59 {strides = array<i32>} : memref<1x8x32xf32, #tpu.memory_space<vmem>>, vector<1x8x32xf32>,
    return
  }
  func.func @transform_0(%arg0: i32) -> (i32, i32, i32) {
    %c0_i32 = arith.constant 0 : i32
    %c0_i32_0 = arith.constant 0 : i32
    %c0_i32_1 = arith.constant 0 : i32
    return %arg0, %c0_i32, %c0_i32_0 : i32, i32, i32
  }
  func.func @transform_1(%arg0: i32) -> (i32, i32, i32) {
    %c0_i32 = arith.constant 0 : i32
    %c0_i32_0 = arith.constant 0 : i32
    %c0_i32_1 = arith.constant 0 : i32
    return %arg0, %c0_i32, %c0_i32_0 : i32, i32, i32
  }
  func.func @transform_2(%arg0: i32) -> (i32, i32, i32) {
    %c0_i32 = arith.constant 0 : i32
    %c0_i32_0 = arith.constant 0 : i32
    %c0_i32_1 = arith.constant 0 : i32
    return %arg0, %c0_i32, %c0_i32_0 : i32, i32, i32
  }
}

module attributes {stable_mosaic.version = 11 : i64} {
  func.func @_proj_res_ln_kernel(%arg0: i32, %arg1: memref<8x32xf32, #tpu.memory_space<vmem>>, %arg2: memref<8x32xf32, #tpu.memory_space<vmem>>, %arg3: memref<32x32xbf16, #tpu.memory_space<vmem>>, %arg4: memref<1x32xf32, #tpu.memory_space<vmem>>, %arg5: memref<1x32xf32, #tpu.memory_space<vmem>>, %arg6: memref<1x32xf32, #tpu.memory_space<vmem>>, %arg7: memref<8x32xf32, #tpu.memory_space<vmem>>) attributes {dimension_semantics = [#tpu.dimension_semantics<parallel>], iteration_bounds = array<i64: 2>, scalar_prefetch = 0 : i64, scratch_operands = 0 : i64, tpu.core_type = #tpu.core_type<tc>, window_params = [{transform_indices = @transform_0, window_bounds = array<i64: 8, 32>}, {transform_indices = @transform_1, window_bounds = array<i64: 8, 32>}, {pipeline_mode = #tpu.pipeline_mode<synchronous>, transform_indices = @transform_2, window_bounds = array<i64: 32, 32>}, {pipeline_mode = #tpu.pipeline_mode<synchronous>, transform_indices = @transform_3, window_bounds = array<i64: 1, 32>}, {pipeline_mode = #tpu.pipeline_mode<synchronous>, transform_indices = @transform_4, window_bounds = array<i64: 1, 32>}, {pipeline_mode = #tpu.pipeline_mode<synchronous>, transform_indices = @transform_5, window_bounds = array<i64: 1, 32>}, {transform_indices = @transform_6, window_bounds = array<i64: 8, 32>}]} {
    %c0 = arith.constant 0 : index
    %c0_0 = arith.constant 0 : index
    %0 = vector.load %arg1[%c0, %c0_0] : memref<8x32xf32, #tpu.memory_space<vmem>>, vector<8x32xf32>
    %1 = arith.truncf %0 : vector<8x32xf32> to vector<8x32xbf16>
    %c0_1 = arith.constant 0 : index
    %c0_2 = arith.constant 0 : index
    %2 = vector.load %arg3[%c0_1, %c0_2] : memref<32x32xbf16, #tpu.memory_space<vmem>>, vector<32x32xbf16>
    %cst = arith.constant dense<0.000000e+00> : vector<8x32xf32>
    %3 = tpu.matmul %1, %2, %cst {dimension_numbers = #tpu.dot_dimension_numbers<[1], [0], [0], [1], [0, 0, 1, 1], [], []>} : vector<8x32xbf16>, vector<32x32xbf16>, vector<8x32xf32> -> vector<8x32xf32>
    %c0_3 = arith.constant 0 : index
    %c0_4 = arith.constant 0 : index
    %4 = vector.load %arg4[%c0_3, %c0_4] : memref<1x32xf32, #tpu.memory_space<vmem>>, vector<1x32xf32>
    %5 = vector.broadcast %4 : vector<1x32xf32> to vector<8x32xf32>
    %6 = arith.addf %3, %5 : vector<8x32xf32>
    %c0_5 = arith.constant 0 : index
    %c0_6 = arith.constant 0 : index
    %7 = vector.load %arg2[%c0_5, %c0_6] : memref<8x32xf32, #tpu.memory_space<vmem>>, vector<8x32xf32>
    %8 = arith.addf %6, %7 : vector<8x32xf32>
    %cst_7 = arith.constant dense<0.000000e+00> : vector<8xf32>
    %9 = vector.multi_reduction <add>, %8, %cst_7 [1] : vector<8x32xf32> to vector<8xf32>
    %10 = vector.shape_cast %9 : vector<8xf32> to vector<8x1xf32>
    %cst_8 = arith.constant 3.200000e+01 : f32
    %11 = vector.broadcast %cst_8 : f32 to vector<8x1xf32>
    %12 = arith.divf %10, %11 : vector<8x1xf32>
    %13 = vector.broadcast %12 : vector<8x1xf32> to vector<8x32xf32>
    %14 = arith.subf %8, %13 : vector<8x32xf32>
    %15 = arith.mulf %14, %14 : vector<8x32xf32>
    %cst_9 = arith.constant dense<0.000000e+00> : vector<8xf32>
    %16 = vector.multi_reduction <add>, %15, %cst_9 [1] : vector<8x32xf32> to vector<8xf32>
    %17 = vector.shape_cast %16 : vector<8xf32> to vector<8x1xf32>
    %cst_10 = arith.constant 3.200000e+01 : f32
    %18 = vector.broadcast %cst_10 : f32 to vector<8x1xf32>
    %19 = arith.divf %17, %18 : vector<8x1xf32>
    %cst_11 = arith.constant 9.99999974E-6 : f32
    %20 = vector.broadcast %cst_11 : f32 to vector<8x1xf32>
    %21 = arith.addf %19, %20 : vector<8x1xf32>
    %22 = math.rsqrt %21 : vector<8x1xf32>
    %23 = vector.broadcast %22 : vector<8x1xf32> to vector<8x32xf32>
    %24 = arith.mulf %14, %23 : vector<8x32xf32>
    %c0_12 = arith.constant 0 : index
    %c0_13 = arith.constant 0 : index
    %25 = vector.load %arg5[%c0_12, %c0_13] : memref<1x32xf32, #tpu.memory_space<vmem>>, vector<1x32xf32>
    %26 = vector.broadcast %25 : vector<1x32xf32> to vector<8x32xf32>
    %27 = arith.mulf %24, %26 : vector<8x32xf32>
    %c0_14 = arith.constant 0 : index
    %c0_15 = arith.constant 0 : index
    %28 = vector.load %arg6[%c0_14, %c0_15] : memref<1x32xf32, #tpu.memory_space<vmem>>, vector<1x32xf32>
    %29 = vector.broadcast %28 : vector<1x32xf32> to vector<8x32xf32>
    %30 = arith.addf %27, %29 : vector<8x32xf32>
    %c0_16 = arith.constant 0 : index
    %c0_17 = arith.constant 0 : index
    %31 = vector.load %arg7[%c0_16, %c0_17] : memref<8x32xf32, #tpu.memory_space<vmem>>, vector<8x32xf32>
    tpu.vector_store %arg7[%c0_16, %c0_17], %30 {strides = array<i32>} : memref<8x32xf32, #tpu.memory_space<vmem>>, vector<8x32xf32>,
    return
  }
  func.func @transform_0(%arg0: i32) -> (i32, i32) {
    %c0_i32 = arith.constant 0 : i32
    %c0_i32_0 = arith.constant 0 : i32
    return %arg0, %c0_i32 : i32, i32
  }
  func.func @transform_1(%arg0: i32) -> (i32, i32) {
    %c0_i32 = arith.constant 0 : i32
    %c0_i32_0 = arith.constant 0 : i32
    return %arg0, %c0_i32 : i32, i32
  }
  func.func @transform_2(%arg0: i32) -> (i32, i32) {
    %c0_i32 = arith.constant 0 : i32
    %c0_i32_0 = arith.constant 0 : i32
    %c0_i32_1 = arith.constant 0 : i32
    return %c0_i32, %c0_i32_0 : i32, i32
  }
  func.func @transform_3(%arg0: i32) -> (i32, i32) {
    %c0_i32 = arith.constant 0 : i32
    %c0_i32_0 = arith.constant 0 : i32
    %c0_i32_1 = arith.constant 0 : i32
    return %c0_i32, %c0_i32_0 : i32, i32
  }
  func.func @transform_4(%arg0: i32) -> (i32, i32) {
    %c0_i32 = arith.constant 0 : i32
    %c0_i32_0 = arith.constant 0 : i32
    %c0_i32_1 = arith.constant 0 : i32
    return %c0_i32, %c0_i32_0 : i32, i32
  }
  func.func @transform_5(%arg0: i32) -> (i32, i32) {
    %c0_i32 = arith.constant 0 : i32
    %c0_i32_0 = arith.constant 0 : i32
    %c0_i32_1 = arith.constant 0 : i32
    return %c0_i32, %c0_i32_0 : i32, i32
  }
  func.func @transform_6(%arg0: i32) -> (i32, i32) {
    %c0_i32 = arith.constant 0 : i32
    %c0_i32_0 = arith.constant 0 : i32
    return %arg0, %c0_i32 : i32, i32
  }
}

module attributes {stable_mosaic.version = 11 : i64} {
  func.func @_linear_kernel(%arg0: i32, %arg1: memref<8x32xf32, #tpu.memory_space<vmem>>, %arg2: memref<32x32xbf16, #tpu.memory_space<vmem>>, %arg3: memref<1x32xf32, #tpu.memory_space<vmem>>, %arg4: memref<8x32xf32, #tpu.memory_space<vmem>>) attributes {dimension_semantics = [#tpu.dimension_semantics<parallel>], iteration_bounds = array<i64: 2>, scalar_prefetch = 0 : i64, scratch_operands = 0 : i64, tpu.core_type = #tpu.core_type<tc>, window_params = [{transform_indices = @transform_0, window_bounds = array<i64: 8, 32>}, {pipeline_mode = #tpu.pipeline_mode<synchronous>, transform_indices = @transform_1, window_bounds = array<i64: 32, 32>}, {pipeline_mode = #tpu.pipeline_mode<synchronous>, transform_indices = @transform_2, window_bounds = array<i64: 1, 32>}, {transform_indices = @transform_3, window_bounds = array<i64: 8, 32>}]} {
    %c0 = arith.constant 0 : index
    %c0_0 = arith.constant 0 : index
    %0 = vector.load %arg1[%c0, %c0_0] : memref<8x32xf32, #tpu.memory_space<vmem>>, vector<8x32xf32>
    %1 = arith.truncf %0 : vector<8x32xf32> to vector<8x32xbf16>
    %c0_1 = arith.constant 0 : index
    %c0_2 = arith.constant 0 : index
    %2 = vector.load %arg2[%c0_1, %c0_2] : memref<32x32xbf16, #tpu.memory_space<vmem>>, vector<32x32xbf16>
    %cst = arith.constant dense<0.000000e+00> : vector<8x32xf32>
    %3 = tpu.matmul %1, %2, %cst {dimension_numbers = #tpu.dot_dimension_numbers<[1], [0], [0], [1], [0, 0, 1, 1], [], []>} : vector<8x32xbf16>, vector<32x32xbf16>, vector<8x32xf32> -> vector<8x32xf32>
    %c0_3 = arith.constant 0 : index
    %c0_4 = arith.constant 0 : index
    %4 = vector.load %arg3[%c0_3, %c0_4] : memref<1x32xf32, #tpu.memory_space<vmem>>, vector<1x32xf32>
    %5 = vector.broadcast %4 : vector<1x32xf32> to vector<8x32xf32>
    %6 = arith.addf %3, %5 : vector<8x32xf32>
    %c0_5 = arith.constant 0 : index
    %c0_6 = arith.constant 0 : index
    %7 = vector.load %arg4[%c0_5, %c0_6] : memref<8x32xf32, #tpu.memory_space<vmem>>, vector<8x32xf32>
    tpu.vector_store %arg4[%c0_5, %c0_6], %6 {strides = array<i32>} : memref<8x32xf32, #tpu.memory_space<vmem>>, vector<8x32xf32>,
    return
  }
  func.func @transform_0(%arg0: i32) -> (i32, i32) {
    %c0_i32 = arith.constant 0 : i32
    %c0_i32_0 = arith.constant 0 : i32
    return %arg0, %c0_i32 : i32, i32
  }
  func.func @transform_1(%arg0: i32) -> (i32, i32) {
    %c0_i32 = arith.constant 0 : i32
    %c0_i32_0 = arith.constant 0 : i32
    %c0_i32_1 = arith.constant 0 : i32
    return %c0_i32, %c0_i32_0 : i32, i32
  }
  func.func @transform_2(%arg0: i32) -> (i32, i32) {
    %c0_i32 = arith.constant 0 : i32
    %c0_i32_0 = arith.constant 0 : i32
    %c0_i32_1 = arith.constant 0 : i32
    return %c0_i32, %c0_i32_0 : i32, i32
  }
  func.func @transform_3(%arg0: i32) -> (i32, i32) {
    %c0_i32 = arith.constant 0 : i32
    %c0_i32_0 = arith.constant 0 : i32
    return %arg0, %c0_i32 : i32, i32
  }
}

module attributes {stable_mosaic.version = 11 : i64} {
  func.func @_ffn_res_ln_kernel(%arg0: i32, %arg1: memref<8x32xf32, #tpu.memory_space<vmem>>, %arg2: memref<32x32xbf16, #tpu.memory_space<vmem>>, %arg3: memref<1x32xf32, #tpu.memory_space<vmem>>, %arg4: memref<32x32xbf16, #tpu.memory_space<vmem>>, %arg5: memref<1x32xf32, #tpu.memory_space<vmem>>, %arg6: memref<1x32xf32, #tpu.memory_space<vmem>>, %arg7: memref<1x32xf32, #tpu.memory_space<vmem>>, %arg8: memref<8x32xf32, #tpu.memory_space<vmem>>) attributes {dimension_semantics = [#tpu.dimension_semantics<parallel>], iteration_bounds = array<i64: 2>, scalar_prefetch = 0 : i64, scratch_operands = 0 : i64, tpu.core_type = #tpu.core_type<tc>, window_params = [{transform_indices = @transform_0, window_bounds = array<i64: 8, 32>}, {pipeline_mode = #tpu.pipeline_mode<synchronous>, transform_indices = @transform_1, window_bounds = array<i64: 32, 32>}, {pipeline_mode = #tpu.pipeline_mode<synchronous>, transform_indices = @transform_2, window_bounds = array<i64: 1, 32>}, {pipeline_mode = #tpu.pipeline_mode<synchronous>, transform_indices = @transform_3, window_bounds = array<i64: 32, 32>}, {pipeline_mode = #tpu.pipeline_mode<synchronous>, transform_indices = @transform_4, window_bounds = array<i64: 1, 32>}, {pipeline_mode = #tpu.pipeline_mode<synchronous>, transform_indices = @transform_5, window_bounds = array<i64: 1, 32>}, {pipeline_mode = #tpu.pipeline_mode<synchronous>, transform_indices = @transform_6, window_bounds = array<i64: 1, 32>}, {transform_indices = @transform_7, window_bounds = array<i64: 8, 32>}]} {
    %c0 = arith.constant 0 : index
    %c0_0 = arith.constant 0 : index
    %0 = vector.load %arg1[%c0, %c0_0] : memref<8x32xf32, #tpu.memory_space<vmem>>, vector<8x32xf32>
    %1 = arith.truncf %0 : vector<8x32xf32> to vector<8x32xbf16>
    %c0_1 = arith.constant 0 : index
    %c0_2 = arith.constant 0 : index
    %2 = vector.load %arg2[%c0_1, %c0_2] : memref<32x32xbf16, #tpu.memory_space<vmem>>, vector<32x32xbf16>
    %cst = arith.constant dense<0.000000e+00> : vector<8x32xf32>
    %3 = tpu.matmul %1, %2, %cst {dimension_numbers = #tpu.dot_dimension_numbers<[1], [0], [0], [1], [0, 0, 1, 1], [], []>} : vector<8x32xbf16>, vector<32x32xbf16>, vector<8x32xf32> -> vector<8x32xf32>
    %c0_3 = arith.constant 0 : index
    %c0_4 = arith.constant 0 : index
    %4 = vector.load %arg3[%c0_3, %c0_4] : memref<1x32xf32, #tpu.memory_space<vmem>>, vector<1x32xf32>
    %5 = vector.broadcast %4 : vector<1x32xf32> to vector<8x32xf32>
    %6 = arith.addf %3, %5 : vector<8x32xf32>
    %cst_5 = arith.constant 0.000000e+00 : f32
    %7 = vector.broadcast %cst_5 : f32 to vector<8x32xf32>
    %8 = arith.maximumf %6, %7 : vector<8x32xf32>
    %9 = arith.truncf %8 : vector<8x32xf32> to vector<8x32xbf16>
    %c0_6 = arith.constant 0 : index
    %c0_7 = arith.constant 0 : index
    %10 = vector.load %arg4[%c0_6, %c0_7] : memref<32x32xbf16, #tpu.memory_space<vmem>>, vector<32x32xbf16>
    %cst_8 = arith.constant dense<0.000000e+00> : vector<8x32xf32>
    %11 = tpu.matmul %9, %10, %cst_8 {dimension_numbers = #tpu.dot_dimension_numbers<[1], [0], [0], [1], [0, 0, 1, 1], [], []>} : vector<8x32xbf16>, vector<32x32xbf16>, vector<8x32xf32> -> vector<8x32xf32>
    %c0_9 = arith.constant 0 : index
    %c0_10 = arith.constant 0 : index
    %12 = vector.load %arg5[%c0_9, %c0_10] : memref<1x32xf32, #tpu.memory_space<vmem>>, vector<1x32xf32>
    %13 = vector.broadcast %12 : vector<1x32xf32> to vector<8x32xf32>
    %14 = arith.addf %11, %13 : vector<8x32xf32>
    %15 = arith.addf %14, %0 : vector<8x32xf32>
    %cst_11 = arith.constant dense<0.000000e+00> : vector<8xf32>
    %16 = vector.multi_reduction <add>, %15, %cst_11 [1] : vector<8x32xf32> to vector<8xf32>
    %17 = vector.shape_cast %16 : vector<8xf32> to vector<8x1xf32>
    %cst_12 = arith.constant 3.200000e+01 : f32
    %18 = vector.broadcast %cst_12 : f32 to vector<8x1xf32>
    %19 = arith.divf %17, %18 : vector<8x1xf32>
    %20 = vector.broadcast %19 : vector<8x1xf32> to vector<8x32xf32>
    %21 = arith.subf %15, %20 : vector<8x32xf32>
    %22 = arith.mulf %21, %21 : vector<8x32xf32>
    %cst_13 = arith.constant dense<0.000000e+00> : vector<8xf32>
    %23 = vector.multi_reduction <add>, %22, %cst_13 [1] : vector<8x32xf32> to vector<8xf32>
    %24 = vector.shape_cast %23 : vector<8xf32> to vector<8x1xf32>
    %cst_14 = arith.constant 3.200000e+01 : f32
    %25 = vector.broadcast %cst_14 : f32 to vector<8x1xf32>
    %26 = arith.divf %24, %25 : vector<8x1xf32>
    %cst_15 = arith.constant 9.99999974E-6 : f32
    %27 = vector.broadcast %cst_15 : f32 to vector<8x1xf32>
    %28 = arith.addf %26, %27 : vector<8x1xf32>
    %29 = math.rsqrt %28 : vector<8x1xf32>
    %30 = vector.broadcast %29 : vector<8x1xf32> to vector<8x32xf32>
    %31 = arith.mulf %21, %30 : vector<8x32xf32>
    %c0_16 = arith.constant 0 : index
    %c0_17 = arith.constant 0 : index
    %32 = vector.load %arg6[%c0_16, %c0_17] : memref<1x32xf32, #tpu.memory_space<vmem>>, vector<1x32xf32>
    %33 = vector.broadcast %32 : vector<1x32xf32> to vector<8x32xf32>
    %34 = arith.mulf %31, %33 : vector<8x32xf32>
    %c0_18 = arith.constant 0 : index
    %c0_19 = arith.constant 0 : index
    %35 = vector.load %arg7[%c0_18, %c0_19] : memref<1x32xf32, #tpu.memory_space<vmem>>, vector<1x32xf32>
    %36 = vector.broadcast %35 : vector<1x32xf32> to vector<8x32xf32>
    %37 = arith.addf %34, %36 : vector<8x32xf32>
    %c0_20 = arith.constant 0 : index
    %c0_21 = arith.constant 0 : index
    %38 = vector.load %arg8[%c0_20, %c0_21] : memref<8x32xf32, #tpu.memory_space<vmem>>, vector<8x32xf32>
    tpu.vector_store %arg8[%c0_20, %c0_21], %37 {strides = array<i32>} : memref<8x32xf32, #tpu.memory_space<vmem>>, vector<8x32xf32>,
    return
  }
  func.func @transform_0(%arg0: i32) -> (i32, i32) {
    %c0_i32 = arith.constant 0 : i32
    %c0_i32_0 = arith.constant 0 : i32
    return %arg0, %c0_i32 : i32, i32
  }
  func.func @transform_1(%arg0: i32) -> (i32, i32) {
    %c0_i32 = arith.constant 0 : i32
    %c0_i32_0 = arith.constant 0 : i32
    %c0_i32_1 = arith.constant 0 : i32
    return %c0_i32, %c0_i32_0 : i32, i32
  }
  func.func @transform_2(%arg0: i32) -> (i32, i32) {
    %c0_i32 = arith.constant 0 : i32
    %c0_i32_0 = arith.constant 0 : i32
    %c0_i32_1 = arith.constant 0 : i32
    return %c0_i32, %c0_i32_0 : i32, i32
  }
  func.func @transform_3(%arg0: i32) -> (i32, i32) {
    %c0_i32 = arith.constant 0 : i32
    %c0_i32_0 = arith.constant 0 : i32
    %c0_i32_1 = arith.constant 0 : i32
    return %c0_i32, %c0_i32_0 : i32, i32
  }
  func.func @transform_4(%arg0: i32) -> (i32, i32) {
    %c0_i32 = arith.constant 0 : i32
    %c0_i32_0 = arith.constant 0 : i32
    %c0_i32_1 = arith.constant 0 : i32
    return %c0_i32, %c0_i32_0 : i32, i32
  }
  func.func @transform_5(%arg0: i32) -> (i32, i32) {
    %c0_i32 = arith.constant 0 : i32
    %c0_i32_0 = arith.constant 0 : i32
    %c0_i32_1 = arith.constant 0 : i32
    return %c0_i32, %c0_i32_0 : i32, i32
  }
  func.func @transform_6(%arg0: i32) -> (i32, i32) {
    %c0_i32 = arith.constant 0 : i32
    %c0_i32_0 = arith.constant 0 : i32
    %c0_i32_1 = arith.constant 0 : i32
    return %c0_i32, %c0_i32_0 : i32, i32
  }
  func.func @transform_7(%arg0: i32) -> (i32, i32) {
    %c0_i32 = arith.constant 0 : i32
    %c0_i32_0 = arith.constant 0 : i32
    return %arg0, %c0_i32 : i32, i32
  }
}

module attributes {stable_mosaic.version = 11 : i64} {
  func.func @_attn_kernel(%arg0: i32, %arg1: memref<1x8x32xf32, #tpu.memory_space<vmem>>, %arg2: memref<1x8x64xf32, #tpu.memory_space<vmem>>, %arg3: memref<1x8x32xf32, #tpu.memory_space<vmem>>) attributes {dimension_semantics = [#tpu.dimension_semantics<parallel>], iteration_bounds = array<i64: 2>, scalar_prefetch = 0 : i64, scratch_operands = 0 : i64, tpu.core_type = #tpu.core_type<tc>, window_params = [{transform_indices = @transform_0, window_bounds = array<i64: 1, 8, 32>}, {transform_indices = @transform_1, window_bounds = array<i64: 1, 8, 64>}, {transform_indices = @transform_2, window_bounds = array<i64: 1, 8, 32>}]} {
    %c0 = arith.constant 0 : index
    %c0_0 = arith.constant 0 : index
    %c0_1 = arith.constant 0 : index
    %0 = vector.load %arg1[%c0, %c0_0, %c0_1] : memref<1x8x32xf32, #tpu.memory_space<vmem>>, vector<1x8x32xf32>
    %1 = vector.shape_cast %0 : vector<1x8x32xf32> to vector<8x32xf32>
    %c0_2 = arith.constant 0 : index
    %c0_3 = arith.constant 0 : index
    %c0_4 = arith.constant 0 : index
    %2 = vector.load %arg2[%c0_2, %c0_3, %c0_4] : memref<1x8x64xf32, #tpu.memory_space<vmem>>, vector<1x8x64xf32>
    %3 = vector.shape_cast %2 : vector<1x8x64xf32> to vector<8x64xf32>
    %4 = vector.extract_strided_slice %3 {offsets = [0, 0], sizes = [8, 32], strides = [1, 1]} : vector<8x64xf32> to vector<8x32xf32>
    %5 = vector.extract_strided_slice %3 {offsets = [0, 32], sizes = [8, 32], strides = [1, 1]} : vector<8x64xf32> to vector<8x32xf32>
    %6 = vector.extract_strided_slice %1 {offsets = [0, 0], sizes = [8, 16], strides = [1, 1]} : vector<8x32xf32> to vector<8x16xf32>
    %7 = arith.truncf %6 : vector<8x16xf32> to vector<8x16xbf16>
    %8 = vector.extract_strided_slice %4 {offsets = [0, 0], sizes = [8, 16], strides = [1, 1]} : vector<8x32xf32> to vector<8x16xf32>
    %9 = arith.truncf %8 : vector<8x16xf32> to vector<8x16xbf16>
    %10 = vector.extract_strided_slice %5 {offsets = [0, 0], sizes = [8, 16], strides = [1, 1]} : vector<8x32xf32> to vector<8x16xf32>
    %11 = arith.truncf %10 : vector<8x16xf32> to vector<8x16xbf16>
    %cst = arith.constant dense<0.000000e+00> : vector<8x8xf32>
    %12 = tpu.matmul %7, %9, %cst {dimension_numbers = #tpu.dot_dimension_numbers<[1], [1], [0], [0], [0, 0, 1, 0], [], []>} : vector<8x16xbf16>, vector<8x16xbf16>, vector<8x8xf32> -> vector<8x8xf32>
    %cst_5 = arith.constant 2.500000e-01 : f32
    %13 = vector.broadcast %cst_5 : f32 to vector<8x8xf32>
    %14 = arith.mulf %12, %13 : vector<8x8xf32>
    %cst_6 = arith.constant dense<0xFF800000> : vector<8xf32>
    %15 = vector.multi_reduction <maximumf>, %14, %cst_6 [1] : vector<8x8xf32> to vector<8xf32>
    %16 = vector.shape_cast %15 : vector<8xf32> to vector<8x1xf32>
    %17 = vector.broadcast %16 : vector<8x1xf32> to vector<8x8xf32>
    %18 = arith.subf %14, %17 : vector<8x8xf32>
    %19 = math.exp %18 : vector<8x8xf32>
    %cst_7 = arith.constant dense<0.000000e+00> : vector<8xf32>
    %20 = vector.multi_reduction <add>, %19, %cst_7 [1] : vector<8x8xf32> to vector<8xf32>
    %21 = vector.shape_cast %20 : vector<8xf32> to vector<8x1xf32>
    %22 = arith.truncf %19 : vector<8x8xf32> to vector<8x8xbf16>
    %cst_8 = arith.constant dense<0.000000e+00> : vector<8x16xf32>
    %23 = tpu.matmul %22, %11, %cst_8 {dimension_numbers = #tpu.dot_dimension_numbers<[1], [0], [0], [1], [0, 0, 1, 1], [], []>} : vector<8x8xbf16>, vector<8x16xbf16>, vector<8x16xf32> -> vector<8x16xf32>
    %24 = tpu.reciprocal %21 {approx = true} : vector<8x1xf32> -> vector<8x1xf32>
    %25 = vector.broadcast %24 : vector<8x1xf32> to vector<8x16xf32>
    %26 = arith.mulf %23, %25 : vector<8x16xf32>
    %27 = vector.extract_strided_slice %1 {offsets = [0, 16], sizes = [8, 16], strides = [1, 1]} : vector<8x32xf32> to vector<8x16xf32>
    %28 = arith.truncf %27 : vector<8x16xf32> to vector<8x16xbf16>
    %29 = vector.extract_strided_slice %4 {offsets = [0, 16], sizes = [8, 16], strides = [1, 1]} : vector<8x32xf32> to vector<8x16xf32>
    %30 = arith.truncf %29 : vector<8x16xf32> to vector<8x16xbf16>
    %31 = vector.extract_strided_slice %5 {offsets = [0, 16], sizes = [8, 16], strides = [1, 1]} : vector<8x32xf32> to vector<8x16xf32>
    %32 = arith.truncf %31 : vector<8x16xf32> to vector<8x16xbf16>
    %cst_9 = arith.constant dense<0.000000e+00> : vector<8x8xf32>
    %33 = tpu.matmul %28, %30, %cst_9 {dimension_numbers = #tpu.dot_dimension_numbers<[1], [1], [0], [0], [0, 0, 1, 0], [], []>} : vector<8x16xbf16>, vector<8x16xbf16>, vector<8x8xf32> -> vector<8x8xf32>
    %cst_10 = arith.constant 2.500000e-01 : f32
    %34 = vector.broadcast %cst_10 : f32 to vector<8x8xf32>
    %35 = arith.mulf %33, %34 : vector<8x8xf32>
    %cst_11 = arith.constant dense<0xFF800000> : vector<8xf32>
    %36 = vector.multi_reduction <maximumf>, %35, %cst_11 [1] : vector<8x8xf32> to vector<8xf32>
    %37 = vector.shape_cast %36 : vector<8xf32> to vector<8x1xf32>
    %38 = vector.broadcast %37 : vector<8x1xf32> to vector<8x8xf32>
    %39 = arith.subf %35, %38 : vector<8x8xf32>
    %40 = math.exp %39 : vector<8x8xf32>
    %cst_12 = arith.constant dense<0.000000e+00> : vector<8xf32>
    %41 = vector.multi_reduction <add>, %40, %cst_12 [1] : vector<8x8xf32> to vector<8xf32>
    %42 = vector.shape_cast %41 : vector<8xf32> to vector<8x1xf32>
    %43 = arith.truncf %40 : vector<8x8xf32> to vector<8x8xbf16>
    %cst_13 = arith.constant dense<0.000000e+00> : vector<8x16xf32>
    %44 = tpu.matmul %43, %32, %cst_13 {dimension_numbers = #tpu.dot_dimension_numbers<[1], [0], [0], [1], [0, 0, 1, 1], [], []>} : vector<8x8xbf16>, vector<8x16xbf16>, vector<8x16xf32> -> vector<8x16xf32>
    %45 = tpu.reciprocal %42 {approx = true} : vector<8x1xf32> -> vector<8x1xf32>
    %46 = vector.broadcast %45 : vector<8x1xf32> to vector<8x16xf32>
    %47 = arith.mulf %44, %46 : vector<8x16xf32>
    %48 = tpu.concatenate %26, %47 in 1 : vector<8x16xf32>, vector<8x16xf32> -> vector<8x32xf32>
    %c0_14 = arith.constant 0 : index
    %c0_15 = arith.constant 0 : index
    %c0_16 = arith.constant 0 : index
    %49 = vector.load %arg3[%c0_14, %c0_15, %c0_16] : memref<1x8x32xf32, #tpu.memory_space<vmem>>, vector<1x8x32xf32>
    %50 = vector.shape_cast %49 : vector<1x8x32xf32> to vector<8x32xf32>
    %51 = vector.shape_cast %48 : vector<8x32xf32> to vector<1x8x32xf32>
    tpu.vector_store %arg3[%c0_14, %c0_15, %c0_16], %51 {strides = array<i32>} : memref<1x8x32xf32, #tpu.memory_space<vmem>>, vector<1x8x32xf32>,
    return
  }
  func.func @transform_0(%arg0: i32) -> (i32, i32, i32) {
    %c0_i32 = arith.constant 0 : i32
    %c0_i32_0 = arith.constant 0 : i32
    %c0_i32_1 = arith.constant 0 : i32
    return %arg0, %c0_i32, %c0_i32_0 : i32, i32, i32
  }
  func.func @transform_1(%arg0: i32) -> (i32, i32, i32) {
    %c0_i32 = arith.constant 0 : i32
    %c0_i32_0 = arith.constant 0 : i32
    %c0_i32_1 = arith.constant 0 : i32
    return %arg0, %c0_i32, %c0_i32_0 : i32, i32, i32
  }
  func.func @transform_2(%arg0: i32) -> (i32, i32, i32) {
    %c0_i32 = arith.constant 0 : i32
    %c0_i32_0 = arith.constant 0 : i32
    %c0_i32_1 = arith.constant 0 : i32
    return %arg0, %c0_i32, %c0_i32_0 : i32, i32, i32
  }
}

module attributes {stable_mosaic.version = 11 : i64} {
  func.func @_ffn_res_ln_kernel(%arg0: i32, %arg1: memref<8x32xf32, #tpu.memory_space<vmem>>, %arg2: memref<32x32xbf16, #tpu.memory_space<vmem>>, %arg3: memref<1x32xf32, #tpu.memory_space<vmem>>, %arg4: memref<32x32xbf16, #tpu.memory_space<vmem>>, %arg5: memref<1x32xf32, #tpu.memory_space<vmem>>, %arg6: memref<1x32xf32, #tpu.memory_space<vmem>>, %arg7: memref<1x32xf32, #tpu.memory_space<vmem>>, %arg8: memref<8x32xf32, #tpu.memory_space<vmem>>) attributes {dimension_semantics = [#tpu.dimension_semantics<parallel>], iteration_bounds = array<i64: 2>, scalar_prefetch = 0 : i64, scratch_operands = 0 : i64, tpu.core_type = #tpu.core_type<tc>, window_params = [{transform_indices = @transform_0, window_bounds = array<i64: 8, 32>}, {pipeline_mode = #tpu.pipeline_mode<synchronous>, transform_indices = @transform_1, window_bounds = array<i64: 32, 32>}, {pipeline_mode = #tpu.pipeline_mode<synchronous>, transform_indices = @transform_2, window_bounds = array<i64: 1, 32>}, {pipeline_mode = #tpu.pipeline_mode<synchronous>, transform_indices = @transform_3, window_bounds = array<i64: 32, 32>}, {pipeline_mode = #tpu.pipeline_mode<synchronous>, transform_indices = @transform_4, window_bounds = array<i64: 1, 32>}, {pipeline_mode = #tpu.pipeline_mode<synchronous>, transform_indices = @transform_5, window_bounds = array<i64: 1, 32>}, {pipeline_mode = #tpu.pipeline_mode<synchronous>, transform_indices = @transform_6, window_bounds = array<i64: 1, 32>}, {transform_indices = @transform_7, window_bounds = array<i64: 8, 32>}]} {
    %c0 = arith.constant 0 : index
    %c0_0 = arith.constant 0 : index
    %0 = vector.load %arg1[%c0, %c0_0] : memref<8x32xf32, #tpu.memory_space<vmem>>, vector<8x32xf32>
    %1 = arith.truncf %0 : vector<8x32xf32> to vector<8x32xbf16>
    %c0_1 = arith.constant 0 : index
    %c0_2 = arith.constant 0 : index
    %2 = vector.load %arg2[%c0_1, %c0_2] : memref<32x32xbf16, #tpu.memory_space<vmem>>, vector<32x32xbf16>
    %cst = arith.constant dense<0.000000e+00> : vector<8x32xf32>
    %3 = tpu.matmul %1, %2, %cst {dimension_numbers = #tpu.dot_dimension_numbers<[1], [0], [0], [1], [0, 0, 1, 1], [], []>} : vector<8x32xbf16>, vector<32x32xbf16>, vector<8x32xf32> -> vector<8x32xf32>
    %c0_3 = arith.constant 0 : index
    %c0_4 = arith.constant 0 : index
    %4 = vector.load %arg3[%c0_3, %c0_4] : memref<1x32xf32, #tpu.memory_space<vmem>>, vector<1x32xf32>
    %5 = vector.broadcast %4 : vector<1x32xf32> to vector<8x32xf32>
    %6 = arith.addf %3, %5 : vector<8x32xf32>
    %cst_5 = arith.constant 0.000000e+00 : f32
    %7 = vector.broadcast %cst_5 : f32 to vector<8x32xf32>
    %8 = arith.maximumf %6, %7 : vector<8x32xf32>
    %9 = arith.truncf %8 : vector<8x32xf32> to vector<8x32xbf16>
    %c0_6 = arith.constant 0 : index
    %c0_7 = arith.constant 0 : index
    %10 = vector.load %arg4[%c0_6, %c0_7] : memref<32x32xbf16, #tpu.memory_space<vmem>>, vector<32x32xbf16>
    %cst_8 = arith.constant dense<0.000000e+00> : vector<8x32xf32>
    %11 = tpu.matmul %9, %10, %cst_8 {dimension_numbers = #tpu.dot_dimension_numbers<[1], [0], [0], [1], [0, 0, 1, 1], [], []>} : vector<8x32xbf16>, vector<32x32xbf16>, vector<8x32xf32> -> vector<8x32xf32>
    %c0_9 = arith.constant 0 : index
    %c0_10 = arith.constant 0 : index
    %12 = vector.load %arg5[%c0_9, %c0_10] : memref<1x32xf32, #tpu.memory_space<vmem>>, vector<1x32xf32>
    %13 = vector.broadcast %12 : vector<1x32xf32> to vector<8x32xf32>
    %14 = arith.addf %11, %13 : vector<8x32xf32>
    %15 = arith.addf %14, %0 : vector<8x32xf32>
    %cst_11 = arith.constant dense<0.000000e+00> : vector<8xf32>
    %16 = vector.multi_reduction <add>, %15, %cst_11 [1] : vector<8x32xf32> to vector<8xf32>
    %17 = vector.shape_cast %16 : vector<8xf32> to vector<8x1xf32>
    %cst_12 = arith.constant 3.200000e+01 : f32
    %18 = vector.broadcast %cst_12 : f32 to vector<8x1xf32>
    %19 = arith.divf %17, %18 : vector<8x1xf32>
    %20 = vector.broadcast %19 : vector<8x1xf32> to vector<8x32xf32>
    %21 = arith.subf %15, %20 : vector<8x32xf32>
    %22 = arith.mulf %21, %21 : vector<8x32xf32>
    %cst_13 = arith.constant dense<0.000000e+00> : vector<8xf32>
    %23 = vector.multi_reduction <add>, %22, %cst_13 [1] : vector<8x32xf32> to vector<8xf32>
    %24 = vector.shape_cast %23 : vector<8xf32> to vector<8x1xf32>
    %cst_14 = arith.constant 3.200000e+01 : f32
    %25 = vector.broadcast %cst_14 : f32 to vector<8x1xf32>
    %26 = arith.divf %24, %25 : vector<8x1xf32>
    %cst_15 = arith.constant 9.99999974E-6 : f32
    %27 = vector.broadcast %cst_15 : f32 to vector<8x1xf32>
    %28 = arith.addf %26, %27 : vector<8x1xf32>
    %29 = math.rsqrt %28 : vector<8x1xf32>
    %30 = vector.broadcast %29 : vector<8x1xf32> to vector<8x32xf32>
    %31 = arith.mulf %21, %30 : vector<8x32xf32>
    %c0_16 = arith.constant 0 : index
    %c0_17 = arith.constant 0 : index
    %32 = vector.load %arg6[%c0_16, %c0_17] : memref<1x32xf32, #tpu.memory_space<vmem>>, vector<1x32xf32>
    %33 = vector.broadcast %32 : vector<1x32xf32> to vector<8x32xf32>
    %34 = arith.mulf %31, %33 : vector<8x32xf32>
    %c0_18 = arith.constant 0 : index
    %c0_19 = arith.constant 0 : index
    %35 = vector.load %arg7[%c0_18, %c0_19] : memref<1x32xf32, #tpu.memory_space<vmem>>, vector<1x32xf32>
    %36 = vector.broadcast %35 : vector<1x32xf32> to vector<8x32xf32>
    %37 = arith.addf %34, %36 : vector<8x32xf32>
    %c0_20 = arith.constant 0 : index
    %c0_21 = arith.constant 0 : index
    %38 = vector.load %arg8[%c0_20, %c0_21] : memref<8x32xf32, #tpu.memory_space<vmem>>, vector<8x32xf32>
    tpu.vector_store %arg8[%c0_20, %c0_21], %37 {strides = array<i32>} : memref<8x32xf32, #tpu.memory_space<vmem>>, vector<8x32xf32>,
    return
  }
  func.func @transform_0(%arg0: i32) -> (i32, i32) {
    %c0_i32 = arith.constant 0 : i32
    %c0_i32_0 = arith.constant 0 : i32
    return %arg0, %c0_i32 : i32, i32
  }
  func.func @transform_1(%arg0: i32) -> (i32, i32) {
    %c0_i32 = arith.constant 0 : i32
    %c0_i32_0 = arith.constant 0 : i32
    %c0_i32_1 = arith.constant 0 : i32
    return %c0_i32, %c0_i32_0 : i32, i32
  }
  func.func @transform_2(%arg0: i32) -> (i32, i32) {
    %c0_i32 = arith.constant 0 : i32
    %c0_i32_0 = arith.constant 0 : i32
    %c0_i32_1 = arith.constant 0 : i32
    return %c0_i32, %c0_i32_0 : i32, i32
  }
  func.func @transform_3(%arg0: i32) -> (i32, i32) {
    %c0_i32 = arith.constant 0 : i32
    %c0_i32_0 = arith.constant 0 : i32
    %c0_i32_1 = arith.constant 0 : i32
    return %c0_i32, %c0_i32_0 : i32, i32
  }
  func.func @transform_4(%arg0: i32) -> (i32, i32) {
    %c0_i32 = arith.constant 0 : i32
    %c0_i32_0 = arith.constant 0 : i32
    %c0_i32_1 = arith.constant 0 : i32
    return %c0_i32, %c0_i32_0 : i32, i32
  }
  func.func @transform_5(%arg0: i32) -> (i32, i32) {
    %c0_i32 = arith.constant 0 : i32
    %c0_i32_0 = arith.constant 0 : i32
    %c0_i32_1 = arith.constant 0 : i32
    return %c0_i32, %c0_i32_0 : i32, i32
  }
  func.func @transform_6(%arg0: i32) -> (i32, i32) {
    %c0_i32 = arith.constant 0 : i32
    %c0_i32_0 = arith.constant 0 : i32
    %c0_i32_1 = arith.constant 0 : i32
    return %c0_i32, %c0_i32_0 : i32, i32
  }
  func.func @transform_7(%arg0: i32) -> (i32, i32) {
    %c0_i32 = arith.constant 0 : i32
    %c0_i32_0 = arith.constant 0 : i32
    return %arg0, %c0_i32 : i32, i32
  }
}

module attributes {stable_mosaic.version = 11 : i64} {
  func.func @_proj_res_ln_kernel(%arg0: i32, %arg1: memref<8x32xf32, #tpu.memory_space<vmem>>, %arg2: memref<8x32xf32, #tpu.memory_space<vmem>>, %arg3: memref<32x32xbf16, #tpu.memory_space<vmem>>, %arg4: memref<1x32xf32, #tpu.memory_space<vmem>>, %arg5: memref<1x32xf32, #tpu.memory_space<vmem>>, %arg6: memref<1x32xf32, #tpu.memory_space<vmem>>, %arg7: memref<8x32xf32, #tpu.memory_space<vmem>>) attributes {dimension_semantics = [#tpu.dimension_semantics<parallel>], iteration_bounds = array<i64: 2>, scalar_prefetch = 0 : i64, scratch_operands = 0 : i64, tpu.core_type = #tpu.core_type<tc>, window_params = [{transform_indices = @transform_0, window_bounds = array<i64: 8, 32>}, {transform_indices = @transform_1, window_bounds = array<i64: 8, 32>}, {pipeline_mode = #tpu.pipeline_mode<synchronous>, transform_indices = @transform_2, window_bounds = array<i64: 32, 32>}, {pipeline_mode = #tpu.pipeline_mode<synchronous>, transform_indices = @transform_3, window_bounds = array<i64: 1, 32>}, {pipeline_mode = #tpu.pipeline_mode<synchronous>, transform_indices = @transform_4, window_bounds = array<i64: 1, 32>}, {pipeline_mode = #tpu.pipeline_mode<synchronous>, transform_indices = @transform_5, window_bounds = array<i64: 1, 32>}, {transform_indices = @transform_6, window_bounds = array<i64: 8, 32>}]} {
    %c0 = arith.constant 0 : index
    %c0_0 = arith.constant 0 : index
    %0 = vector.load %arg1[%c0, %c0_0] : memref<8x32xf32, #tpu.memory_space<vmem>>, vector<8x32xf32>
    %1 = arith.truncf %0 : vector<8x32xf32> to vector<8x32xbf16>
    %c0_1 = arith.constant 0 : index
    %c0_2 = arith.constant 0 : index
    %2 = vector.load %arg3[%c0_1, %c0_2] : memref<32x32xbf16, #tpu.memory_space<vmem>>, vector<32x32xbf16>
    %cst = arith.constant dense<0.000000e+00> : vector<8x32xf32>
    %3 = tpu.matmul %1, %2, %cst {dimension_numbers = #tpu.dot_dimension_numbers<[1], [0], [0], [1], [0, 0, 1, 1], [], []>} : vector<8x32xbf16>, vector<32x32xbf16>, vector<8x32xf32> -> vector<8x32xf32>
    %c0_3 = arith.constant 0 : index
    %c0_4 = arith.constant 0 : index
    %4 = vector.load %arg4[%c0_3, %c0_4] : memref<1x32xf32, #tpu.memory_space<vmem>>, vector<1x32xf32>
    %5 = vector.broadcast %4 : vector<1x32xf32> to vector<8x32xf32>
    %6 = arith.addf %3, %5 : vector<8x32xf32>
    %c0_5 = arith.constant 0 : index
    %c0_6 = arith.constant 0 : index
    %7 = vector.load %arg2[%c0_5, %c0_6] : memref<8x32xf32, #tpu.memory_space<vmem>>, vector<8x32xf32>
    %8 = arith.addf %6, %7 : vector<8x32xf32>
    %cst_7 = arith.constant dense<0.000000e+00> : vector<8xf32>
    %9 = vector.multi_reduction <add>, %8, %cst_7 [1] : vector<8x32xf32> to vector<8xf32>
    %10 = vector.shape_cast %9 : vector<8xf32> to vector<8x1xf32>
    %cst_8 = arith.constant 3.200000e+01 : f32
    %11 = vector.broadcast %cst_8 : f32 to vector<8x1xf32>
    %12 = arith.divf %10, %11 : vector<8x1xf32>
    %13 = vector.broadcast %12 : vector<8x1xf32> to vector<8x32xf32>
    %14 = arith.subf %8, %13 : vector<8x32xf32>
    %15 = arith.mulf %14, %14 : vector<8x32xf32>
    %cst_9 = arith.constant dense<0.000000e+00> : vector<8xf32>
    %16 = vector.multi_reduction <add>, %15, %cst_9 [1] : vector<8x32xf32> to vector<8xf32>
    %17 = vector.shape_cast %16 : vector<8xf32> to vector<8x1xf32>
    %cst_10 = arith.constant 3.200000e+01 : f32
    %18 = vector.broadcast %cst_10 : f32 to vector<8x1xf32>
    %19 = arith.divf %17, %18 : vector<8x1xf32>
    %cst_11 = arith.constant 9.99999974E-6 : f32
    %20 = vector.broadcast %cst_11 : f32 to vector<8x1xf32>
    %21 = arith.addf %19, %20 : vector<8x1xf32>
    %22 = math.rsqrt %21 : vector<8x1xf32>
    %23 = vector.broadcast %22 : vector<8x1xf32> to vector<8x32xf32>
    %24 = arith.mulf %14, %23 : vector<8x32xf32>
    %c0_12 = arith.constant 0 : index
    %c0_13 = arith.constant 0 : index
    %25 = vector.load %arg5[%c0_12, %c0_13] : memref<1x32xf32, #tpu.memory_space<vmem>>, vector<1x32xf32>
    %26 = vector.broadcast %25 : vector<1x32xf32> to vector<8x32xf32>
    %27 = arith.mulf %24, %26 : vector<8x32xf32>
    %c0_14 = arith.constant 0 : index
    %c0_15 = arith.constant 0 : index
    %28 = vector.load %arg6[%c0_14, %c0_15] : memref<1x32xf32, #tpu.memory_space<vmem>>, vector<1x32xf32>
    %29 = vector.broadcast %28 : vector<1x32xf32> to vector<8x32xf32>
    %30 = arith.addf %27, %29 : vector<8x32xf32>
    %c0_16 = arith.constant 0 : index
    %c0_17 = arith.constant 0 : index
    %31 = vector.load %arg7[%c0_16, %c0_17] : memref<8x32xf32, #tpu.memory_space<vmem>>, vector<8x32xf32>
    tpu.vector_store %arg7[%c0_16, %c0_17], %30 {strides = array<i32>} : memref<8x32xf32, #tpu.memory_space<vmem>>, vector<8x32xf32>,
    return
  }
  func.func @transform_0(%arg0: i32) -> (i32, i32) {
    %c0_i32 = arith.constant 0 : i32
    %c0_i32_0 = arith.constant 0 : i32
    return %arg0, %c0_i32 : i32, i32
  }
  func.func @transform_1(%arg0: i32) -> (i32, i32) {
    %c0_i32 = arith.constant 0 : i32
    %c0_i32_0 = arith.constant 0 : i32
    return %arg0, %c0_i32 : i32, i32
  }
  func.func @transform_2(%arg0: i32) -> (i32, i32) {
    %c0_i32 = arith.constant 0 : i32
    %c0_i32_0 = arith.constant 0 : i32
    %c0_i32_1 = arith.constant 0 : i32
    return %c0_i32, %c0_i32_0 : i32, i32
  }
  func.func @transform_3(%arg0: i32) -> (i32, i32) {
    %c0_i32 = arith.constant 0 : i32
    %c0_i32_0 = arith.constant 0 : i32
    %c0_i32_1 = arith.constant 0 : i32
    return %c0_i32, %c0_i32_0 : i32, i32
  }
  func.func @transform_4(%arg0: i32) -> (i32, i32) {
    %c0_i32 = arith.constant 0 : i32
    %c0_i32_0 = arith.constant 0 : i32
    %c0_i32_1 = arith.constant 0 : i32
    return %c0_i32, %c0_i32_0 : i32, i32
  }
  func.func @transform_5(%arg0: i32) -> (i32, i32) {
    %c0_i32 = arith.constant 0 : i32
    %c0_i32_0 = arith.constant 0 : i32
    %c0_i32_1 = arith.constant 0 : i32
    return %c0_i32, %c0_i32_0 : i32, i32
  }
  func.func @transform_6(%arg0: i32) -> (i32, i32) {
    %c0_i32 = arith.constant 0 : i32
    %c0_i32_0 = arith.constant 0 : i32
    return %arg0, %c0_i32 : i32, i32
  }
}

module attributes {stable_mosaic.version = 11 : i64} {
  func.func @_proj_res_ln_kernel(%arg0: i32, %arg1: memref<8x32xf32, #tpu.memory_space<vmem>>, %arg2: memref<8x32xf32, #tpu.memory_space<vmem>>, %arg3: memref<32x32xbf16, #tpu.memory_space<vmem>>, %arg4: memref<1x32xf32, #tpu.memory_space<vmem>>, %arg5: memref<1x32xf32, #tpu.memory_space<vmem>>, %arg6: memref<1x32xf32, #tpu.memory_space<vmem>>, %arg7: memref<8x32xf32, #tpu.memory_space<vmem>>) attributes {dimension_semantics = [#tpu.dimension_semantics<parallel>], iteration_bounds = array<i64: 2>, scalar_prefetch = 0 : i64, scratch_operands = 0 : i64, tpu.core_type = #tpu.core_type<tc>, window_params = [{transform_indices = @transform_0, window_bounds = array<i64: 8, 32>}, {transform_indices = @transform_1, window_bounds = array<i64: 8, 32>}, {pipeline_mode = #tpu.pipeline_mode<synchronous>, transform_indices = @transform_2, window_bounds = array<i64: 32, 32>}, {pipeline_mode = #tpu.pipeline_mode<synchronous>, transform_indices = @transform_3, window_bounds = array<i64: 1, 32>}, {pipeline_mode = #tpu.pipeline_mode<synchronous>, transform_indices = @transform_4, window_bounds = array<i64: 1, 32>}, {pipeline_mode = #tpu.pipeline_mode<synchronous>, transform_indices = @transform_5, window_bounds = array<i64: 1, 32>}, {transform_indices = @transform_6, window_bounds = array<i64: 8, 32>}]} {
    %c0 = arith.constant 0 : index
    %c0_0 = arith.constant 0 : index
    %0 = vector.load %arg1[%c0, %c0_0] : memref<8x32xf32, #tpu.memory_space<vmem>>, vector<8x32xf32>
    %1 = arith.truncf %0 : vector<8x32xf32> to vector<8x32xbf16>
    %c0_1 = arith.constant 0 : index
    %c0_2 = arith.constant 0 : index
    %2 = vector.load %arg3[%c0_1, %c0_2] : memref<32x32xbf16, #tpu.memory_space<vmem>>, vector<32x32xbf16>
    %cst = arith.constant dense<0.000000e+00> : vector<8x32xf32>
    %3 = tpu.matmul %1, %2, %cst {dimension_numbers = #tpu.dot_dimension_numbers<[1], [0], [0], [1], [0, 0, 1, 1], [], []>} : vector<8x32xbf16>, vector<32x32xbf16>, vector<8x32xf32> -> vector<8x32xf32>
    %c0_3 = arith.constant 0 : index
    %c0_4 = arith.constant 0 : index
    %4 = vector.load %arg4[%c0_3, %c0_4] : memref<1x32xf32, #tpu.memory_space<vmem>>, vector<1x32xf32>
    %5 = vector.broadcast %4 : vector<1x32xf32> to vector<8x32xf32>
    %6 = arith.addf %3, %5 : vector<8x32xf32>
    %c0_5 = arith.constant 0 : index
    %c0_6 = arith.constant 0 : index
    %7 = vector.load %arg2[%c0_5, %c0_6] : memref<8x32xf32, #tpu.memory_space<vmem>>, vector<8x32xf32>
    %8 = arith.addf %6, %7 : vector<8x32xf32>
    %cst_7 = arith.constant dense<0.000000e+00> : vector<8xf32>
    %9 = vector.multi_reduction <add>, %8, %cst_7 [1] : vector<8x32xf32> to vector<8xf32>
    %10 = vector.shape_cast %9 : vector<8xf32> to vector<8x1xf32>
    %cst_8 = arith.constant 3.200000e+01 : f32
    %11 = vector.broadcast %cst_8 : f32 to vector<8x1xf32>
    %12 = arith.divf %10, %11 : vector<8x1xf32>
    %13 = vector.broadcast %12 : vector<8x1xf32> to vector<8x32xf32>
    %14 = arith.subf %8, %13 : vector<8x32xf32>
    %15 = arith.mulf %14, %14 : vector<8x32xf32>
    %cst_9 = arith.constant dense<0.000000e+00> : vector<8xf32>
    %16 = vector.multi_reduction <add>, %15, %cst_9 [1] : vector<8x32xf32> to vector<8xf32>
    %17 = vector.shape_cast %16 : vector<8xf32> to vector<8x1xf32>
    %cst_10 = arith.constant 3.200000e+01 : f32
    %18 = vector.broadcast %cst_10 : f32 to vector<8x1xf32>
    %19 = arith.divf %17, %18 : vector<8x1xf32>
    %cst_11 = arith.constant 9.99999974E-6 : f32
    %20 = vector.broadcast %cst_11 : f32 to vector<8x1xf32>
    %21 = arith.addf %19, %20 : vector<8x1xf32>
    %22 = math.rsqrt %21 : vector<8x1xf32>
    %23 = vector.broadcast %22 : vector<8x1xf32> to vector<8x32xf32>
    %24 = arith.mulf %14, %23 : vector<8x32xf32>
    %c0_12 = arith.constant 0 : index
    %c0_13 = arith.constant 0 : index
    %25 = vector.load %arg5[%c0_12, %c0_13] : memref<1x32xf32, #tpu.memory_space<vmem>>, vector<1x32xf32>
    %26 = vector.broadcast %25 : vector<1x32xf32> to vector<8x32xf32>
    %27 = arith.mulf %24, %26 : vector<8x32xf32>
    %c0_14 = arith.constant 0 : index
    %c0_15 = arith.constant 0 : index
    %28 = vector.load %arg6[%c0_14, %c0_15] : memref<1x32xf32, #tpu.memory_space<vmem>>, vector<1x32xf32>
    %29 = vector.broadcast %28 : vector<1x32xf32> to vector<8x32xf32>
    %30 = arith.addf %27, %29 : vector<8x32xf32>
    %c0_16 = arith.constant 0 : index
    %c0_17 = arith.constant 0 : index
    %31 = vector.load %arg7[%c0_16, %c0_17] : memref<8x32xf32, #tpu.memory_space<vmem>>, vector<8x32xf32>
    tpu.vector_store %arg7[%c0_16, %c0_17], %30 {strides = array<i32>} : memref<8x32xf32, #tpu.memory_space<vmem>>, vector<8x32xf32>,
    return
  }
  func.func @transform_0(%arg0: i32) -> (i32, i32) {
    %c0_i32 = arith.constant 0 : i32
    %c0_i32_0 = arith.constant 0 : i32
    return %arg0, %c0_i32 : i32, i32
  }
  func.func @transform_1(%arg0: i32) -> (i32, i32) {
    %c0_i32 = arith.constant 0 : i32
    %c0_i32_0 = arith.constant 0 : i32
    return %arg0, %c0_i32 : i32, i32
  }
  func.func @transform_2(%arg0: i32) -> (i32, i32) {
    %c0_i32 = arith.constant 0 : i32
    %c0_i32_0 = arith.constant 0 : i32
    %c0_i32_1 = arith.constant 0 : i32
    return %c0_i32, %c0_i32_0 : i32, i32
  }
  func.func @transform_3(%arg0: i32) -> (i32, i32) {
    %c0_i32 = arith.constant 0 : i32
    %c0_i32_0 = arith.constant 0 : i32
    %c0_i32_1 = arith.constant 0 : i32
    return %c0_i32, %c0_i32_0 : i32, i32
  }
  func.func @transform_4(%arg0: i32) -> (i32, i32) {
    %c0_i32 = arith.constant 0 : i32
    %c0_i32_0 = arith.constant 0 : i32
    %c0_i32_1 = arith.constant 0 : i32
    return %c0_i32, %c0_i32_0 : i32, i32
  }
  func.func @transform_5(%arg0: i32) -> (i32, i32) {
    %c0_i32 = arith.constant 0 : i32
    %c0_i32_0 = arith.constant 0 : i32
    %c0_i32_1 = arith.constant 0 : i32
    return %c0_i32, %c0_i32_0 : i32, i32
  }
  func.func @transform_6(%arg0: i32) -> (i32, i32) {
    %c0_i32 = arith.constant 0 : i32
    %c0_i32_0 = arith.constant 0 : i32
    return %arg0, %c0_i32 : i32, i32
  }
}

module attributes {stable_mosaic.version = 11 : i64} {
  func.func @_proj_res_ln_kernel(%arg0: i32, %arg1: memref<8x32xf32, #tpu.memory_space<vmem>>, %arg2: memref<8x32xf32, #tpu.memory_space<vmem>>, %arg3: memref<32x32xbf16, #tpu.memory_space<vmem>>, %arg4: memref<1x32xf32, #tpu.memory_space<vmem>>, %arg5: memref<1x32xf32, #tpu.memory_space<vmem>>, %arg6: memref<1x32xf32, #tpu.memory_space<vmem>>, %arg7: memref<8x32xf32, #tpu.memory_space<vmem>>) attributes {dimension_semantics = [#tpu.dimension_semantics<parallel>], iteration_bounds = array<i64: 2>, scalar_prefetch = 0 : i64, scratch_operands = 0 : i64, tpu.core_type = #tpu.core_type<tc>, window_params = [{transform_indices = @transform_0, window_bounds = array<i64: 8, 32>}, {transform_indices = @transform_1, window_bounds = array<i64: 8, 32>}, {pipeline_mode = #tpu.pipeline_mode<synchronous>, transform_indices = @transform_2, window_bounds = array<i64: 32, 32>}, {pipeline_mode = #tpu.pipeline_mode<synchronous>, transform_indices = @transform_3, window_bounds = array<i64: 1, 32>}, {pipeline_mode = #tpu.pipeline_mode<synchronous>, transform_indices = @transform_4, window_bounds = array<i64: 1, 32>}, {pipeline_mode = #tpu.pipeline_mode<synchronous>, transform_indices = @transform_5, window_bounds = array<i64: 1, 32>}, {transform_indices = @transform_6, window_bounds = array<i64: 8, 32>}]} {
    %c0 = arith.constant 0 : index
    %c0_0 = arith.constant 0 : index
    %0 = vector.load %arg1[%c0, %c0_0] : memref<8x32xf32, #tpu.memory_space<vmem>>, vector<8x32xf32>
    %1 = arith.truncf %0 : vector<8x32xf32> to vector<8x32xbf16>
    %c0_1 = arith.constant 0 : index
    %c0_2 = arith.constant 0 : index
    %2 = vector.load %arg3[%c0_1, %c0_2] : memref<32x32xbf16, #tpu.memory_space<vmem>>, vector<32x32xbf16>
    %cst = arith.constant dense<0.000000e+00> : vector<8x32xf32>
    %3 = tpu.matmul %1, %2, %cst {dimension_numbers = #tpu.dot_dimension_numbers<[1], [0], [0], [1], [0, 0, 1, 1], [], []>} : vector<8x32xbf16>, vector<32x32xbf16>, vector<8x32xf32> -> vector<8x32xf32>
    %c0_3 = arith.constant 0 : index
    %c0_4 = arith.constant 0 : index
    %4 = vector.load %arg4[%c0_3, %c0_4] : memref<1x32xf32, #tpu.memory_space<vmem>>, vector<1x32xf32>
    %5 = vector.broadcast %4 : vector<1x32xf32> to vector<8x32xf32>
    %6 = arith.addf %3, %5 : vector<8x32xf32>
    %c0_5 = arith.constant 0 : index
    %c0_6 = arith.constant 0 : index
    %7 = vector.load %arg2[%c0_5, %c0_6] : memref<8x32xf32, #tpu.memory_space<vmem>>, vector<8x32xf32>
    %8 = arith.addf %6, %7 : vector<8x32xf32>
    %cst_7 = arith.constant dense<0.000000e+00> : vector<8xf32>
    %9 = vector.multi_reduction <add>, %8, %cst_7 [1] : vector<8x32xf32> to vector<8xf32>
    %10 = vector.shape_cast %9 : vector<8xf32> to vector<8x1xf32>
    %cst_8 = arith.constant 3.200000e+01 : f32
    %11 = vector.broadcast %cst_8 : f32 to vector<8x1xf32>
    %12 = arith.divf %10, %11 : vector<8x1xf32>
    %13 = vector.broadcast %12 : vector<8x1xf32> to vector<8x32xf32>
    %14 = arith.subf %8, %13 : vector<8x32xf32>
    %15 = arith.mulf %14, %14 : vector<8x32xf32>
    %cst_9 = arith.constant dense<0.000000e+00> : vector<8xf32>
    %16 = vector.multi_reduction <add>, %15, %cst_9 [1] : vector<8x32xf32> to vector<8xf32>
    %17 = vector.shape_cast %16 : vector<8xf32> to vector<8x1xf32>
    %cst_10 = arith.constant 3.200000e+01 : f32
    %18 = vector.broadcast %cst_10 : f32 to vector<8x1xf32>
    %19 = arith.divf %17, %18 : vector<8x1xf32>
    %cst_11 = arith.constant 9.99999974E-6 : f32
    %20 = vector.broadcast %cst_11 : f32 to vector<8x1xf32>
    %21 = arith.addf %19, %20 : vector<8x1xf32>
    %22 = math.rsqrt %21 : vector<8x1xf32>
    %23 = vector.broadcast %22 : vector<8x1xf32> to vector<8x32xf32>
    %24 = arith.mulf %14, %23 : vector<8x32xf32>
    %c0_12 = arith.constant 0 : index
    %c0_13 = arith.constant 0 : index
    %25 = vector.load %arg5[%c0_12, %c0_13] : memref<1x32xf32, #tpu.memory_space<vmem>>, vector<1x32xf32>
    %26 = vector.broadcast %25 : vector<1x32xf32> to vector<8x32xf32>
    %27 = arith.mulf %24, %26 : vector<8x32xf32>
    %c0_14 = arith.constant 0 : index
    %c0_15 = arith.constant 0 : index
    %28 = vector.load %arg6[%c0_14, %c0_15] : memref<1x32xf32, #tpu.memory_space<vmem>>, vector<1x32xf32>
    %29 = vector.broadcast %28 : vector<1x32xf32> to vector<8x32xf32>
    %30 = arith.addf %27, %29 : vector<8x32xf32>
    %c0_16 = arith.constant 0 : index
    %c0_17 = arith.constant 0 : index
    %31 = vector.load %arg7[%c0_16, %c0_17] : memref<8x32xf32, #tpu.memory_space<vmem>>, vector<8x32xf32>
    tpu.vector_store %arg7[%c0_16, %c0_17], %30 {strides = array<i32>} : memref<8x32xf32, #tpu.memory_space<vmem>>, vector<8x32xf32>,
    return
  }
  func.func @transform_0(%arg0: i32) -> (i32, i32) {
    %c0_i32 = arith.constant 0 : i32
    %c0_i32_0 = arith.constant 0 : i32
    return %arg0, %c0_i32 : i32, i32
  }
  func.func @transform_1(%arg0: i32) -> (i32, i32) {
    %c0_i32 = arith.constant 0 : i32
    %c0_i32_0 = arith.constant 0 : i32
    return %arg0, %c0_i32 : i32, i32
  }
  func.func @transform_2(%arg0: i32) -> (i32, i32) {
    %c0_i32 = arith.constant 0 : i32
    %c0_i32_0 = arith.constant 0 : i32
    %c0_i32_1 = arith.constant 0 : i32
    return %c0_i32, %c0_i32_0 : i32, i32
  }
  func.func @transform_3(%arg0: i32) -> (i32, i32) {
    %c0_i32 = arith.constant 0 : i32
    %c0_i32_0 = arith.constant 0 : i32
    %c0_i32_1 = arith.constant 0 : i32
    return %c0_i32, %c0_i32_0 : i32, i32
  }
  func.func @transform_4(%arg0: i32) -> (i32, i32) {
    %c0_i32 = arith.constant 0 : i32
    %c0_i32_0 = arith.constant 0 : i32
    %c0_i32_1 = arith.constant 0 : i32
    return %c0_i32, %c0_i32_0 : i32, i32
  }
  func.func @transform_5(%arg0: i32) -> (i32, i32) {
    %c0_i32 = arith.constant 0 : i32
    %c0_i32_0 = arith.constant 0 : i32
    %c0_i32_1 = arith.constant 0 : i32
    return %c0_i32, %c0_i32_0 : i32, i32
  }
  func.func @transform_6(%arg0: i32) -> (i32, i32) {
    %c0_i32 = arith.constant 0 : i32
    %c0_i32_0 = arith.constant 0 : i32
    return %arg0, %c0_i32 : i32, i32
  }
}

module attributes {stable_mosaic.version = 11 : i64} {
  func.func @_linear_kernel(%arg0: i32, %arg1: memref<8x32xf32, #tpu.memory_space<vmem>>, %arg2: memref<32x64xbf16, #tpu.memory_space<vmem>>, %arg3: memref<1x64xf32, #tpu.memory_space<vmem>>, %arg4: memref<8x64xf32, #tpu.memory_space<vmem>>) attributes {dimension_semantics = [#tpu.dimension_semantics<parallel>], iteration_bounds = array<i64: 2>, scalar_prefetch = 0 : i64, scratch_operands = 0 : i64, tpu.core_type = #tpu.core_type<tc>, window_params = [{transform_indices = @transform_0, window_bounds = array<i64: 8, 32>}, {pipeline_mode = #tpu.pipeline_mode<synchronous>, transform_indices = @transform_1, window_bounds = array<i64: 32, 64>}, {pipeline_mode = #tpu.pipeline_mode<synchronous>, transform_indices = @transform_2, window_bounds = array<i64: 1, 64>}, {transform_indices = @transform_3, window_bounds = array<i64: 8, 64>}]} {
    %c0 = arith.constant 0 : index
    %c0_0 = arith.constant 0 : index
    %0 = vector.load %arg1[%c0, %c0_0] : memref<8x32xf32, #tpu.memory_space<vmem>>, vector<8x32xf32>
    %1 = arith.truncf %0 : vector<8x32xf32> to vector<8x32xbf16>
    %c0_1 = arith.constant 0 : index
    %c0_2 = arith.constant 0 : index
    %2 = vector.load %arg2[%c0_1, %c0_2] : memref<32x64xbf16, #tpu.memory_space<vmem>>, vector<32x64xbf16>
    %cst = arith.constant dense<0.000000e+00> : vector<8x64xf32>
    %3 = tpu.matmul %1, %2, %cst {dimension_numbers = #tpu.dot_dimension_numbers<[1], [0], [0], [1], [0, 0, 1, 1], [], []>} : vector<8x32xbf16>, vector<32x64xbf16>, vector<8x64xf32> -> vector<8x64xf32>
    %c0_3 = arith.constant 0 : index
    %c0_4 = arith.constant 0 : index
    %4 = vector.load %arg3[%c0_3, %c0_4] : memref<1x64xf32, #tpu.memory_space<vmem>>, vector<1x64xf32>
    %5 = vector.broadcast %4 : vector<1x64xf32> to vector<8x64xf32>
    %6 = arith.addf %3, %5 : vector<8x64xf32>
    %c0_5 = arith.constant 0 : index
    %c0_6 = arith.constant 0 : index
    %7 = vector.load %arg4[%c0_5, %c0_6] : memref<8x64xf32, #tpu.memory_space<vmem>>, vector<8x64xf32>
    tpu.vector_store %arg4[%c0_5, %c0_6], %6 {strides = array<i32>} : memref<8x64xf32, #tpu.memory_space<vmem>>, vector<8x64xf32>,
    return
  }
  func.func @transform_0(%arg0: i32) -> (i32, i32) {
    %c0_i32 = arith.constant 0 : i32
    %c0_i32_0 = arith.constant 0 : i32
    return %arg0, %c0_i32 : i32, i32
  }
  func.func @transform_1(%arg0: i32) -> (i32, i32) {
    %c0_i32 = arith.constant 0 : i32
    %c0_i32_0 = arith.constant 0 : i32
    %c0_i32_1 = arith.constant 0 : i32
    return %c0_i32, %c0_i32_0 : i32, i32
  }
  func.func @transform_2(%arg0: i32) -> (i32, i32) {
    %c0_i32 = arith.constant 0 : i32
    %c0_i32_0 = arith.constant 0 : i32
    %c0_i32_1 = arith.constant 0 : i32
    return %c0_i32, %c0_i32_0 : i32, i32
  }
  func.func @transform_3(%arg0: i32) -> (i32, i32) {
    %c0_i32 = arith.constant 0 : i32
    %c0_i32_0 = arith.constant 0 : i32
    return %arg0, %c0_i32 : i32, i32
  }
}

module attributes {stable_mosaic.version = 11 : i64} {
  func.func @_kvq_proj_kernel(%arg0: i32, %arg1: memref<8x32xf32, #tpu.memory_space<vmem>>, %arg2: memref<32x96xbf16, #tpu.memory_space<vmem>>, %arg3: memref<1x96xf32, #tpu.memory_space<vmem>>, %arg4: memref<8x64xf32, #tpu.memory_space<vmem>>, %arg5: memref<8x32xf32, #tpu.memory_space<vmem>>) attributes {dimension_semantics = [#tpu.dimension_semantics<parallel>], iteration_bounds = array<i64: 2>, scalar_prefetch = 0 : i64, scratch_operands = 0 : i64, tpu.core_type = #tpu.core_type<tc>, window_params = [{transform_indices = @transform_0, window_bounds = array<i64: 8, 32>}, {pipeline_mode = #tpu.pipeline_mode<synchronous>, transform_indices = @transform_1, window_bounds = array<i64: 32, 96>}, {pipeline_mode = #tpu.pipeline_mode<synchronous>, transform_indices = @transform_2, window_bounds = array<i64: 1, 96>}, {transform_indices = @transform_3, window_bounds = array<i64: 8, 64>}, {transform_indices = @transform_4, window_bounds = array<i64: 8, 32>}]} {
    %c0 = arith.constant 0 : index
    %c0_0 = arith.constant 0 : index
    %0 = vector.load %arg1[%c0, %c0_0] : memref<8x32xf32, #tpu.memory_space<vmem>>, vector<8x32xf32>
    %1 = arith.truncf %0 : vector<8x32xf32> to vector<8x32xbf16>
    %c0_1 = arith.constant 0 : index
    %c0_2 = arith.constant 0 : index
    %2 = vector.load %arg2[%c0_1, %c0_2] : memref<32x96xbf16, #tpu.memory_space<vmem>>, vector<32x96xbf16>
    %cst = arith.constant dense<0.000000e+00> : vector<8x96xf32>
    %3 = tpu.matmul %1, %2, %cst {dimension_numbers = #tpu.dot_dimension_numbers<[1], [0], [0], [1], [0, 0, 1, 1], [], []>} : vector<8x32xbf16>, vector<32x96xbf16>, vector<8x96xf32> -> vector<8x96xf32>
    %c0_3 = arith.constant 0 : index
    %c0_4 = arith.constant 0 : index
    %4 = vector.load %arg3[%c0_3, %c0_4] : memref<1x96xf32, #tpu.memory_space<vmem>>, vector<1x96xf32>
    %5 = vector.broadcast %4 : vector<1x96xf32> to vector<8x96xf32>
    %6 = arith.addf %3, %5 : vector<8x96xf32>
    %7 = vector.extract_strided_slice %6 {offsets = [0, 0], sizes = [8, 64], strides = [1, 1]} : vector<8x96xf32> to vector<8x64xf32>
    %c0_5 = arith.constant 0 : index
    %c0_6 = arith.constant 0 : index
    %8 = vector.load %arg4[%c0_5, %c0_6] : memref<8x64xf32, #tpu.memory_space<vmem>>, vector<8x64xf32>
    tpu.vector_store %arg4[%c0_5, %c0_6], %7 {strides = array<i32>} : memref<8x64xf32, #tpu.memory_space<vmem>>, vector<8x64xf32>,
    %9 = vector.extract_strided_slice %6 {offsets = [0, 64], sizes = [8, 32], strides = [1, 1]} : vector<8x96xf32> to vector<8x32xf32>
    %c0_7 = arith.constant 0 : index
    %c0_8 = arith.constant 0 : index
    %10 = vector.load %arg5[%c0_7, %c0_8] : memref<8x32xf32, #tpu.memory_space<vmem>>, vector<8x32xf32>
    tpu.vector_store %arg5[%c0_7, %c0_8], %9 {strides = array<i32>} : memref<8x32xf32, #tpu.memory_space<vmem>>, vector<8x32xf32>,
    return
  }
  func.func @transform_0(%arg0: i32) -> (i32, i32) {
    %c0_i32 = arith.constant 0 : i32
    %c0_i32_0 = arith.constant 0 : i32
    return %arg0, %c0_i32 : i32, i32
  }
  func.func @transform_1(%arg0: i32) -> (i32, i32) {
    %c0_i32 = arith.constant 0 : i32
    %c0_i32_0 = arith.constant 0 : i32
    %c0_i32_1 = arith.constant 0 : i32
    return %c0_i32, %c0_i32_0 : i32, i32
  }
  func.func @transform_2(%arg0: i32) -> (i32, i32) {
    %c0_i32 = arith.constant 0 : i32
    %c0_i32_0 = arith.constant 0 : i32
    %c0_i32_1 = arith.constant 0 : i32
    return %c0_i32, %c0_i32_0 : i32, i32
  }
  func.func @transform_3(%arg0: i32) -> (i32, i32) {
    %c0_i32 = arith.constant 0 : i32
    %c0_i32_0 = arith.constant 0 : i32
    return %arg0, %c0_i32 : i32, i32
  }
  func.func @transform_4(%arg0: i32) -> (i32, i32) {
    %c0_i32 = arith.constant 0 : i32
    %c0_i32_0 = arith.constant 0 : i32
    return %arg0, %c0_i32 : i32, i32
  }
}

module attributes {stable_mosaic.version = 11 : i64} {
  func.func @_linear_kernel(%arg0: i32, %arg1: memref<8x32xf32, #tpu.memory_space<vmem>>, %arg2: memref<32x32xbf16, #tpu.memory_space<vmem>>, %arg3: memref<1x32xf32, #tpu.memory_space<vmem>>, %arg4: memref<8x32xf32, #tpu.memory_space<vmem>>) attributes {dimension_semantics = [#tpu.dimension_semantics<parallel>], iteration_bounds = array<i64: 2>, scalar_prefetch = 0 : i64, scratch_operands = 0 : i64, tpu.core_type = #tpu.core_type<tc>, window_params = [{transform_indices = @transform_0, window_bounds = array<i64: 8, 32>}, {pipeline_mode = #tpu.pipeline_mode<synchronous>, transform_indices = @transform_1, window_bounds = array<i64: 32, 32>}, {pipeline_mode = #tpu.pipeline_mode<synchronous>, transform_indices = @transform_2, window_bounds = array<i64: 1, 32>}, {transform_indices = @transform_3, window_bounds = array<i64: 8, 32>}]} {
    %c0 = arith.constant 0 : index
    %c0_0 = arith.constant 0 : index
    %0 = vector.load %arg1[%c0, %c0_0] : memref<8x32xf32, #tpu.memory_space<vmem>>, vector<8x32xf32>
    %1 = arith.truncf %0 : vector<8x32xf32> to vector<8x32xbf16>
    %c0_1 = arith.constant 0 : index
    %c0_2 = arith.constant 0 : index
    %2 = vector.load %arg2[%c0_1, %c0_2] : memref<32x32xbf16, #tpu.memory_space<vmem>>, vector<32x32xbf16>
    %cst = arith.constant dense<0.000000e+00> : vector<8x32xf32>
    %3 = tpu.matmul %1, %2, %cst {dimension_numbers = #tpu.dot_dimension_numbers<[1], [0], [0], [1], [0, 0, 1, 1], [], []>} : vector<8x32xbf16>, vector<32x32xbf16>, vector<8x32xf32> -> vector<8x32xf32>
    %c0_3 = arith.constant 0 : index
    %c0_4 = arith.constant 0 : index
    %4 = vector.load %arg3[%c0_3, %c0_4] : memref<1x32xf32, #tpu.memory_space<vmem>>, vector<1x32xf32>
    %5 = vector.broadcast %4 : vector<1x32xf32> to vector<8x32xf32>
    %6 = arith.addf %3, %5 : vector<8x32xf32>
    %c0_5 = arith.constant 0 : index
    %c0_6 = arith.constant 0 : index
    %7 = vector.load %arg4[%c0_5, %c0_6] : memref<8x32xf32, #tpu.memory_space<vmem>>, vector<8x32xf32>
    tpu.vector_store %arg4[%c0_5, %c0_6], %6 {strides = array<i32>} : memref<8x32xf32, #tpu.memory_space<vmem>>, vector<8x32xf32>,
    return
  }
  func.func @transform_0(%arg0: i32) -> (i32, i32) {
    %c0_i32 = arith.constant 0 : i32
    %c0_i32_0 = arith.constant 0 : i32
    return %arg0, %c0_i32 : i32, i32
  }
  func.func @transform_1(%arg0: i32) -> (i32, i32) {
    %c0_i32 = arith.constant 0 : i32
    %c0_i32_0 = arith.constant 0 : i32
    %c0_i32_1 = arith.constant 0 : i32
    return %c0_i32, %c0_i32_0 : i32, i32
  }
  func.func @transform_2(%arg0: i32) -> (i32, i32) {
    %c0_i32 = arith.constant 0 : i32
    %c0_i32_0 = arith.constant 0 : i32
    %c0_i32_1 = arith.constant 0 : i32
    return %c0_i32, %c0_i32_0 : i32, i32
  }
  func.func @transform_3(%arg0: i32) -> (i32, i32) {
    %c0_i32 = arith.constant 0 : i32
    %c0_i32_0 = arith.constant 0 : i32
    return %arg0, %c0_i32 : i32, i32
  }
}

module attributes {stable_mosaic.version = 11 : i64} {
  func.func @_linear_kernel(%arg0: i32, %arg1: memref<8x32xf32, #tpu.memory_space<vmem>>, %arg2: memref<32x64xbf16, #tpu.memory_space<vmem>>, %arg3: memref<1x64xf32, #tpu.memory_space<vmem>>, %arg4: memref<8x64xf32, #tpu.memory_space<vmem>>) attributes {dimension_semantics = [#tpu.dimension_semantics<parallel>], iteration_bounds = array<i64: 2>, scalar_prefetch = 0 : i64, scratch_operands = 0 : i64, tpu.core_type = #tpu.core_type<tc>, window_params = [{transform_indices = @transform_0, window_bounds = array<i64: 8, 32>}, {pipeline_mode = #tpu.pipeline_mode<synchronous>, transform_indices = @transform_1, window_bounds = array<i64: 32, 64>}, {pipeline_mode = #tpu.pipeline_mode<synchronous>, transform_indices = @transform_2, window_bounds = array<i64: 1, 64>}, {transform_indices = @transform_3, window_bounds = array<i64: 8, 64>}]} {
    %c0 = arith.constant 0 : index
    %c0_0 = arith.constant 0 : index
    %0 = vector.load %arg1[%c0, %c0_0] : memref<8x32xf32, #tpu.memory_space<vmem>>, vector<8x32xf32>
    %1 = arith.truncf %0 : vector<8x32xf32> to vector<8x32xbf16>
    %c0_1 = arith.constant 0 : index
    %c0_2 = arith.constant 0 : index
    %2 = vector.load %arg2[%c0_1, %c0_2] : memref<32x64xbf16, #tpu.memory_space<vmem>>, vector<32x64xbf16>
    %cst = arith.constant dense<0.000000e+00> : vector<8x64xf32>
    %3 = tpu.matmul %1, %2, %cst {dimension_numbers = #tpu.dot_dimension_numbers<[1], [0], [0], [1], [0, 0, 1, 1], [], []>} : vector<8x32xbf16>, vector<32x64xbf16>, vector<8x64xf32> -> vector<8x64xf32>
    %c0_3 = arith.constant 0 : index
    %c0_4 = arith.constant 0 : index
    %4 = vector.load %arg3[%c0_3, %c0_4] : memref<1x64xf32, #tpu.memory_space<vmem>>, vector<1x64xf32>
    %5 = vector.broadcast %4 : vector<1x64xf32> to vector<8x64xf32>
    %6 = arith.addf %3, %5 : vector<8x64xf32>
    %c0_5 = arith.constant 0 : index
    %c0_6 = arith.constant 0 : index
    %7 = vector.load %arg4[%c0_5, %c0_6] : memref<8x64xf32, #tpu.memory_space<vmem>>, vector<8x64xf32>
    tpu.vector_store %arg4[%c0_5, %c0_6], %6 {strides = array<i32>} : memref<8x64xf32, #tpu.memory_space<vmem>>, vector<8x64xf32>,
    return
  }
  func.func @transform_0(%arg0: i32) -> (i32, i32) {
    %c0_i32 = arith.constant 0 : i32
    %c0_i32_0 = arith.constant 0 : i32
    return %arg0, %c0_i32 : i32, i32
  }
  func.func @transform_1(%arg0: i32) -> (i32, i32) {
    %c0_i32 = arith.constant 0 : i32
    %c0_i32_0 = arith.constant 0 : i32
    %c0_i32_1 = arith.constant 0 : i32
    return %c0_i32, %c0_i32_0 : i32, i32
  }
  func.func @transform_2(%arg0: i32) -> (i32, i32) {
    %c0_i32 = arith.constant 0 : i32
    %c0_i32_0 = arith.constant 0 : i32
    %c0_i32_1 = arith.constant 0 : i32
    return %c0_i32, %c0_i32_0 : i32, i32
  }
  func.func @transform_3(%arg0: i32) -> (i32, i32) {
    %c0_i32 = arith.constant 0 : i32
    %c0_i32_0 = arith.constant 0 : i32
    return %arg0, %c0_i32 : i32, i32
  }
}

module attributes {stable_mosaic.version = 11 : i64} {
  func.func @_ffn_res_ln_kernel(%arg0: i32, %arg1: memref<8x32xf32, #tpu.memory_space<vmem>>, %arg2: memref<32x32xbf16, #tpu.memory_space<vmem>>, %arg3: memref<1x32xf32, #tpu.memory_space<vmem>>, %arg4: memref<32x32xbf16, #tpu.memory_space<vmem>>, %arg5: memref<1x32xf32, #tpu.memory_space<vmem>>, %arg6: memref<1x32xf32, #tpu.memory_space<vmem>>, %arg7: memref<1x32xf32, #tpu.memory_space<vmem>>, %arg8: memref<8x32xf32, #tpu.memory_space<vmem>>) attributes {dimension_semantics = [#tpu.dimension_semantics<parallel>], iteration_bounds = array<i64: 2>, scalar_prefetch = 0 : i64, scratch_operands = 0 : i64, tpu.core_type = #tpu.core_type<tc>, window_params = [{transform_indices = @transform_0, window_bounds = array<i64: 8, 32>}, {pipeline_mode = #tpu.pipeline_mode<synchronous>, transform_indices = @transform_1, window_bounds = array<i64: 32, 32>}, {pipeline_mode = #tpu.pipeline_mode<synchronous>, transform_indices = @transform_2, window_bounds = array<i64: 1, 32>}, {pipeline_mode = #tpu.pipeline_mode<synchronous>, transform_indices = @transform_3, window_bounds = array<i64: 32, 32>}, {pipeline_mode = #tpu.pipeline_mode<synchronous>, transform_indices = @transform_4, window_bounds = array<i64: 1, 32>}, {pipeline_mode = #tpu.pipeline_mode<synchronous>, transform_indices = @transform_5, window_bounds = array<i64: 1, 32>}, {pipeline_mode = #tpu.pipeline_mode<synchronous>, transform_indices = @transform_6, window_bounds = array<i64: 1, 32>}, {transform_indices = @transform_7, window_bounds = array<i64: 8, 32>}]} {
    %c0 = arith.constant 0 : index
    %c0_0 = arith.constant 0 : index
    %0 = vector.load %arg1[%c0, %c0_0] : memref<8x32xf32, #tpu.memory_space<vmem>>, vector<8x32xf32>
    %1 = arith.truncf %0 : vector<8x32xf32> to vector<8x32xbf16>
    %c0_1 = arith.constant 0 : index
    %c0_2 = arith.constant 0 : index
    %2 = vector.load %arg2[%c0_1, %c0_2] : memref<32x32xbf16, #tpu.memory_space<vmem>>, vector<32x32xbf16>
    %cst = arith.constant dense<0.000000e+00> : vector<8x32xf32>
    %3 = tpu.matmul %1, %2, %cst {dimension_numbers = #tpu.dot_dimension_numbers<[1], [0], [0], [1], [0, 0, 1, 1], [], []>} : vector<8x32xbf16>, vector<32x32xbf16>, vector<8x32xf32> -> vector<8x32xf32>
    %c0_3 = arith.constant 0 : index
    %c0_4 = arith.constant 0 : index
    %4 = vector.load %arg3[%c0_3, %c0_4] : memref<1x32xf32, #tpu.memory_space<vmem>>, vector<1x32xf32>
    %5 = vector.broadcast %4 : vector<1x32xf32> to vector<8x32xf32>
    %6 = arith.addf %3, %5 : vector<8x32xf32>
    %cst_5 = arith.constant 0.000000e+00 : f32
    %7 = vector.broadcast %cst_5 : f32 to vector<8x32xf32>
    %8 = arith.maximumf %6, %7 : vector<8x32xf32>
    %9 = arith.truncf %8 : vector<8x32xf32> to vector<8x32xbf16>
    %c0_6 = arith.constant 0 : index
    %c0_7 = arith.constant 0 : index
    %10 = vector.load %arg4[%c0_6, %c0_7] : memref<32x32xbf16, #tpu.memory_space<vmem>>, vector<32x32xbf16>
    %cst_8 = arith.constant dense<0.000000e+00> : vector<8x32xf32>
    %11 = tpu.matmul %9, %10, %cst_8 {dimension_numbers = #tpu.dot_dimension_numbers<[1], [0], [0], [1], [0, 0, 1, 1], [], []>} : vector<8x32xbf16>, vector<32x32xbf16>, vector<8x32xf32> -> vector<8x32xf32>
    %c0_9 = arith.constant 0 : index
    %c0_10 = arith.constant 0 : index
    %12 = vector.load %arg5[%c0_9, %c0_10] : memref<1x32xf32, #tpu.memory_space<vmem>>, vector<1x32xf32>
    %13 = vector.broadcast %12 : vector<1x32xf32> to vector<8x32xf32>
    %14 = arith.addf %11, %13 : vector<8x32xf32>
    %15 = arith.addf %14, %0 : vector<8x32xf32>
    %cst_11 = arith.constant dense<0.000000e+00> : vector<8xf32>
    %16 = vector.multi_reduction <add>, %15, %cst_11 [1] : vector<8x32xf32> to vector<8xf32>
    %17 = vector.shape_cast %16 : vector<8xf32> to vector<8x1xf32>
    %cst_12 = arith.constant 3.200000e+01 : f32
    %18 = vector.broadcast %cst_12 : f32 to vector<8x1xf32>
    %19 = arith.divf %17, %18 : vector<8x1xf32>
    %20 = vector.broadcast %19 : vector<8x1xf32> to vector<8x32xf32>
    %21 = arith.subf %15, %20 : vector<8x32xf32>
    %22 = arith.mulf %21, %21 : vector<8x32xf32>
    %cst_13 = arith.constant dense<0.000000e+00> : vector<8xf32>
    %23 = vector.multi_reduction <add>, %22, %cst_13 [1] : vector<8x32xf32> to vector<8xf32>
    %24 = vector.shape_cast %23 : vector<8xf32> to vector<8x1xf32>
    %cst_14 = arith.constant 3.200000e+01 : f32
    %25 = vector.broadcast %cst_14 : f32 to vector<8x1xf32>
    %26 = arith.divf %24, %25 : vector<8x1xf32>
    %cst_15 = arith.constant 9.99999974E-6 : f32
    %27 = vector.broadcast %cst_15 : f32 to vector<8x1xf32>
    %28 = arith.addf %26, %27 : vector<8x1xf32>
    %29 = math.rsqrt %28 : vector<8x1xf32>
    %30 = vector.broadcast %29 : vector<8x1xf32> to vector<8x32xf32>
    %31 = arith.mulf %21, %30 : vector<8x32xf32>
    %c0_16 = arith.constant 0 : index
    %c0_17 = arith.constant 0 : index
    %32 = vector.load %arg6[%c0_16, %c0_17] : memref<1x32xf32, #tpu.memory_space<vmem>>, vector<1x32xf32>
    %33 = vector.broadcast %32 : vector<1x32xf32> to vector<8x32xf32>
    %34 = arith.mulf %31, %33 : vector<8x32xf32>
    %c0_18 = arith.constant 0 : index
    %c0_19 = arith.constant 0 : index
    %35 = vector.load %arg7[%c0_18, %c0_19] : memref<1x32xf32, #tpu.memory_space<vmem>>, vector<1x32xf32>
    %36 = vector.broadcast %35 : vector<1x32xf32> to vector<8x32xf32>
    %37 = arith.addf %34, %36 : vector<8x32xf32>
    %c0_20 = arith.constant 0 : index
    %c0_21 = arith.constant 0 : index
    %38 = vector.load %arg8[%c0_20, %c0_21] : memref<8x32xf32, #tpu.memory_space<vmem>>, vector<8x32xf32>
    tpu.vector_store %arg8[%c0_20, %c0_21], %37 {strides = array<i32>} : memref<8x32xf32, #tpu.memory_space<vmem>>, vector<8x32xf32>,
    return
  }
  func.func @transform_0(%arg0: i32) -> (i32, i32) {
    %c0_i32 = arith.constant 0 : i32
    %c0_i32_0 = arith.constant 0 : i32
    return %arg0, %c0_i32 : i32, i32
  }
  func.func @transform_1(%arg0: i32) -> (i32, i32) {
    %c0_i32 = arith.constant 0 : i32
    %c0_i32_0 = arith.constant 0 : i32
    %c0_i32_1 = arith.constant 0 : i32
    return %c0_i32, %c0_i32_0 : i32, i32
  }
  func.func @transform_2(%arg0: i32) -> (i32, i32) {
    %c0_i32 = arith.constant 0 : i32
    %c0_i32_0 = arith.constant 0 : i32
    %c0_i32_1 = arith.constant 0 : i32
    return %c0_i32, %c0_i32_0 : i32, i32
  }
  func.func @transform_3(%arg0: i32) -> (i32, i32) {
    %c0_i32 = arith.constant 0 : i32
    %c0_i32_0 = arith.constant 0 : i32
    %c0_i32_1 = arith.constant 0 : i32
    return %c0_i32, %c0_i32_0 : i32, i32
  }
  func.func @transform_4(%arg0: i32) -> (i32, i32) {
    %c0_i32 = arith.constant 0 : i32
    %c0_i32_0 = arith.constant 0 : i32
    %c0_i32_1 = arith.constant 0 : i32
    return %c0_i32, %c0_i32_0 : i32, i32
  }
  func.func @transform_5(%arg0: i32) -> (i32, i32) {
    %c0_i32 = arith.constant 0 : i32
    %c0_i32_0 = arith.constant 0 : i32
    %c0_i32_1 = arith.constant 0 : i32
    return %c0_i32, %c0_i32_0 : i32, i32
  }
  func.func @transform_6(%arg0: i32) -> (i32, i32) {
    %c0_i32 = arith.constant 0 : i32
    %c0_i32_0 = arith.constant 0 : i32
    %c0_i32_1 = arith.constant 0 : i32
    return %c0_i32, %c0_i32_0 : i32, i32
  }
  func.func @transform_7(%arg0: i32) -> (i32, i32) {
    %c0_i32 = arith.constant 0 : i32
    %c0_i32_0 = arith.constant 0 : i32
    return %arg0, %c0_i32 : i32, i32
  }
}

module attributes {stable_mosaic.version = 11 : i64} {
  func.func @_linear_kernel(%arg0: i32, %arg1: memref<8x32xf32, #tpu.memory_space<vmem>>, %arg2: memref<32x128xbf16, #tpu.memory_space<vmem>>, %arg3: memref<1x128xf32, #tpu.memory_space<vmem>>, %arg4: memref<8x128xf32, #tpu.memory_space<vmem>>) attributes {dimension_semantics = [#tpu.dimension_semantics<parallel>], iteration_bounds = array<i64: 2>, scalar_prefetch = 0 : i64, scratch_operands = 0 : i64, tpu.core_type = #tpu.core_type<tc>, window_params = [{transform_indices = @transform_0, window_bounds = array<i64: 8, 32>}, {pipeline_mode = #tpu.pipeline_mode<synchronous>, transform_indices = @transform_1, window_bounds = array<i64: 32, 128>}, {pipeline_mode = #tpu.pipeline_mode<synchronous>, transform_indices = @transform_2, window_bounds = array<i64: 1, 128>}, {transform_indices = @transform_3, window_bounds = array<i64: 8, 128>}]} {
    %c0 = arith.constant 0 : index
    %c0_0 = arith.constant 0 : index
    %0 = vector.load %arg1[%c0, %c0_0] : memref<8x32xf32, #tpu.memory_space<vmem>>, vector<8x32xf32>
    %1 = arith.truncf %0 : vector<8x32xf32> to vector<8x32xbf16>
    %c0_1 = arith.constant 0 : index
    %c0_2 = arith.constant 0 : index
    %2 = vector.load %arg2[%c0_1, %c0_2] : memref<32x128xbf16, #tpu.memory_space<vmem>>, vector<32x128xbf16>
    %cst = arith.constant dense<0.000000e+00> : vector<8x128xf32>
    %3 = tpu.matmul %1, %2, %cst {dimension_numbers = #tpu.dot_dimension_numbers<[1], [0], [0], [1], [0, 0, 1, 1], [], []>} : vector<8x32xbf16>, vector<32x128xbf16>, vector<8x128xf32> -> vector<8x128xf32>
    %c0_3 = arith.constant 0 : index
    %c0_4 = arith.constant 0 : index
    %4 = vector.load %arg3[%c0_3, %c0_4] : memref<1x128xf32, #tpu.memory_space<vmem>>, vector<1x128xf32>
    %5 = vector.broadcast %4 : vector<1x128xf32> to vector<8x128xf32>
    %6 = arith.addf %3, %5 : vector<8x128xf32>
    %c0_5 = arith.constant 0 : index
    %c0_6 = arith.constant 0 : index
    %7 = vector.load %arg4[%c0_5, %c0_6] : memref<8x128xf32, #tpu.memory_space<vmem>>, vector<8x128xf32>
    tpu.vector_store %arg4[%c0_5, %c0_6], %6 {strides = array<i32>} : memref<8x128xf32, #tpu.memory_space<vmem>>, vector<8x128xf32>,
    return
  }
  func.func @transform_0(%arg0: i32) -> (i32, i32) {
    %c0_i32 = arith.constant 0 : i32
    %c0_i32_0 = arith.constant 0 : i32
    return %arg0, %c0_i32 : i32, i32
  }
  func.func @transform_1(%arg0: i32) -> (i32, i32) {
    %c0_i32 = arith.constant 0 : i32
    %c0_i32_0 = arith.constant 0 : i32
    %c0_i32_1 = arith.constant 0 : i32
    return %c0_i32, %c0_i32_0 : i32, i32
  }
  func.func @transform_2(%arg0: i32) -> (i32, i32) {
    %c0_i32 = arith.constant 0 : i32
    %c0_i32_0 = arith.constant 0 : i32
    %c0_i32_1 = arith.constant 0 : i32
    return %c0_i32, %c0_i32_0 : i32, i32
  }
  func.func @transform_3(%arg0: i32) -> (i32, i32) {
    %c0_i32 = arith.constant 0 : i32
    %c0_i32_0 = arith.constant 0 : i32
    return %arg0, %c0_i32 : i32, i32
  }
}

</mosaic_0001>

<bundles_post_ra>
// kernel: transformer_forward.34
= control target key start
LH: loop header
LB: loop body
LE: loop exit
PB: predicated region body
PF: predicated region fallthrough
CT: control target
= control target key end

     0   :  { %s419_s9 = smov 0   ;;  %s457_s0 = inlined_call_operand.vmem [shape: f32[2,8,32], index: 0, kind: input, shape index: {}]   ;;  %s458_s1 = inlined_call_operand.vmem [shape: f32[2,8,64], index: 1, kind: input, shape index: {}]   ;;  %s459_s2 = inlined_call_operand.vmem [shape: f32[2,8,32], index: 2, kind: output, shape index: {}]  }
   0x1 LB: > { %s356_s10 = sadd.s32 4294967295, %s397_s9   ;;  %p360_p0 = scmp.ge.s32.totalorder %s397_s9, 1  ;;  %s397_s9 = sphi %s419_s9, %s12_s9  }
   0x2   : > { %p120_p1 = scmp.lt.s32.totalorder %s397_s9, 3 }
   0x4   : > { %p121_p2 = pnand %p360_p0, %p120_p1 }
   0x5   : > { %p144_p3 = scmp.lt.s32.totalorder (!%p121_p2), %s356_s10, 1  ;;  %s399_s18 = smov (!%p121_p2), 112  }
   0x6   : > { %124 = sbr.rel (%p121_p2) target bundleno = 672 (0x2a0), region = 28  ;;  %s401_s19 = smov (!%p121_p2), 96  }
   0x7   : > { %s402_s20 = smov (!%p121_p2), 80   ;;  %s403_s21 = smov (!%p121_p2), 16  }
   0xb   : > { %s461_s10 = smov (!%p144_p3, %s356_s10), 1  ;;  %vm167_vm0 = vcmask 130048   ;;  %v159_v8 = vlaneseq  ;;  %v400_v13 = vmov -1e+09   ;;  %vm189_vm2 = vcmask 64512  }
   0xc   : > { %s427_s11 = sshll.u32 %s461_s10, 3  ;;  %vm206_vm3 = vcmask 1043456   ;;  %vm289_vm4 = vcmask 261120  }
   0xd   : > { %s151_s14 = scalar_lea.vmem %s458_s1, %s427_s11  ;;  %s147_s17 = scalar_lea.vmem %s457_s0, %s427_s11  ;;  %v160_v9 = vshrl.u32 %v159_v8, 7  ;;  %v162_v10 = vand.u32 127, %v159_v8 }
   0xe   : > { %v158_v0 = vld [vmem:[%s151_s14] sm:$0xff]  ;;  %s155_s24 = scalar_lea.vmem %s459_s2, %s427_s11 }
   0xf   : > { %v166_v1 = vpack.c.bf16 %v158_v0, %v158_v0  ;;  %v157_v2 = vld [vmem:[%s147_s17] sm:$0xff]  ;;  %vm163_vm1 = vcmp.le.s32.totalorder %v162_v10, %v160_v9 }
  0x10   : > { %v165_v3 = vpack.c.bf16 %v157_v2, %v157_v2  ;;  %v164_v14 = vsel %vm163_vm1, 0.0, %v400_v13 }
  0x11   : > { %228 = vrot.lane.b32.xlu0 %v166_v1, %s399_s18  ;;  %v172_v4 = vsel %vm167_vm0, %v166_v1, 0 }
  0x12   : > { %181 = vmatpush.bf16.xpose.msra.mxu0 %v172_v4 }
  0x19   : > { %226 = vrot.lane.b32.xlu0 %v165_v3, %s399_s18  ;;  %364 = vmatmul.msk.bf16.vlgmr.msra.gmra.mxu0 %vm167_vm0, %v165_v3 }
  0x83   : > { %v229_v5 = vpop.permute.xlu0 %228 }
  0x84   : > { %v234_v6 = vsel %vm167_vm0, %v229_v5, 0 }
  0x85   : > { %243 = vmatpush.bf16.xpose.msra.mxu2 %v234_v6 }
  0x8b   : > { %v227_v7 = vpop.permute.xlu0 %226 }
  0x8c   : > { %366 = vmatmul.msk.bf16.vlgmr.msra.gmra.mxu2 %vm167_vm0, %v227_v7 }
  0x96   : > { %v183_v11 = vpop.f32.mrf.mxu0 }
  0x97   : > { %v187_v12 = vmul.f32 0.25, %v183_v11 }
  0x99   : > { %v188_v15 = vadd.f32 %v187_v12, %v164_v14 }
  0x9b   : > { %v190_v16 = vsel %vm189_vm2, %v188_v15, -inf }
  0x9c   : > { %191 = vmax.xlane.f32.xlu2 %v190_v16 }
  0x9e   : > { %v185_v17 = vpop.f32.mrf.mxu0 }
  0xb4   : > { %201 = vrot.lane.b32.xlu2 %v166_v1, %s401_s19 }
 0x10f   : > { %v245_v18 = vpop.f32.mrf.mxu2  ;;  %v192_v23 = vpop.xlane.xlu2 %191 }
 0x110   : > { %v249_v19 = vmul.f32 0.25, %v245_v18  ;;  %v193_v24 = vsub.f32 %v188_v15, %v192_v23 }
 0x112   : > { %v250_v20 = vadd.f32 %v249_v19, %v164_v14  ;;  %v194_v25 = vmul.f32 1.442695, %v193_v24 }
 0x114   : > { %v251_v21 = vsel %vm189_vm2, %v250_v20, -inf  ;;  %383 = vpow2.f32 %v194_v25 }
 0x115   : > { %252 = vmax.xlane.f32.xlu1 %v251_v21 }
 0x117   : > { %v247_v22 = vpop.f32.mrf.mxu2  ;;  %v202_v26 = vpop.permute.xlu2 %201 }
 0x118   : > { %v208_v27 = vsel %vm206_vm3, %v202_v26, 0 }
 0x119   : > { %217 = vmatpush.bf16.msra.mxu1 %v208_v27 }
 0x11a   : > { %v384_v28 = vpop.eup %383 }
 0x11b   : > { %v199_v29 = vpack.c.bf16 %v384_v28, %v384_v28  ;;  %v196_v30 = vsel %vm189_vm2, %v384_v28, 0.0 }
 0x11c   : > { %197 = vadd.xlane.f32.xlu2 %v196_v30 }
 0x11d   : > { %365 = vmatmul.msk.bf16.vlgmr.msra.gmra.mxu1 %vm189_vm2, %v199_v29 }
 0x12e   : > { %261 = vrot.lane.b32.xlu1 %v166_v1, %s402_s20 }
 0x188   : > { %v253_v31 = vpop.xlane.xlu1 %252 }
 0x189   : > { %v254_v32 = vsub.f32 %v250_v20, %v253_v31 }
 0x18b   : > { %v255_v33 = vmul.f32 1.442695, %v254_v32 }
 0x18d   : > { %385 = vpow2.f32 %v255_v33 }
 0x18f   : > { %v198_v46 = vpop.xlane.xlu2 %197 }
 0x193   : > { %v386_v34 = vpop.eup %385 }
 0x194   : > { %v257_v35 = vsel %vm189_vm2, %v386_v34, 0.0  ;;  %v260_v38 = vpack.c.bf16 %v386_v34, %v386_v34 }
 0x195   : > { %258 = vadd.xlane.f32.xlu0 %v257_v35 }
 0x19a   : > { %v219_v39 = vpop.f32.mrf.mxu1 }
 0x1a0   : > { %v262_v36 = vpop.permute.xlu1 %261 }
 0x1a1   : > { %v267_v37 = vsel %vm206_vm3, %v262_v36, 0 }
 0x1a2   : > { %276 = vmatpush.bf16.msra.mxu3 %v267_v37  ;;  %v221_v40 = vpop.f32.mrf.mxu1 }
 0x1a5   : > { %367 = vmatmul.msk.bf16.vlgmr.msra.gmra.mxu3 %vm189_vm2, %v260_v38 }
 0x208   : > { %v259_v41 = vpop.xlane.xlu0 %258 }
 0x209   : > { %387 = vrcp.f32 %v259_v41 }
 0x20a   : > { %389 = vrcp.f32 %v198_v46 }
 0x20f   : > { %v388_v42 = vpop.eup %387 }
 0x210   : > { %v390_v47 = vpop.eup %389 }
 0x211   : > { %v224_v48 = vmul.f32 %v390_v47, %v219_v39 }
 0x228   : > { %v278_v43 = vpop.f32.mrf.mxu3 }
 0x229   : > { %v283_v44 = vmul.f32 %v388_v42, %v278_v43 }
 0x22b   : > { %285 = vrot.lane.b32.xlu1 %v283_v44, %s403_s21 }
 0x230   : > { %v280_v45 = vpop.f32.mrf.mxu3 }
 0x29d   : > { %v286_v49 = vpop.permute.xlu1 %285 }
 0x29e   : > { %v288_v50 = vsel %vm167_vm0, %v224_v48, %v286_v49 }
 0x29f   : > { %290 = vst.msk [vmem:[%s155_s24] sm:$0xff] %vm289_vm4, %v288_v50 }
 0x2a0 PF: > { %s12_s9 = sadd.s32 1, %s397_s9  }
 0x2a1   : > { %p9_p4 = scmp.ge.s32.totalorder %s12_s9, 4  }
 0x2a3   :  { %11 = sbr.rel (!%p9_p4) target bundleno = 1 (0x1), region = 61 }

// kernel: transformer_forward.35
= control target key start
LH: loop header
LB: loop body
LE: loop exit
PB: predicated region body
PF: predicated region fallthrough
CT: control target
= control target key end

     0   :  { %s492_s21 = smov 0   ;;  %s536_s0 = inlined_call_operand.vmem [shape: f32[16,32], index: 0, kind: input, shape index: {}]   ;;  %s537_s1 = inlined_call_operand.vmem [shape: f32[16,32], index: 1, kind: input, shape index: {}]   ;;  %s538_s2 = inlined_call_operand.vmem [shape: bf16[32,32], index: 2, kind: input, shape index: {}]   ;;  %s539_s3 = inlined_call_operand.vmem [shape: f32[1,32], index: 3, kind: input, shape index: {}]   ;;  %s540_s4 = inlined_call_operand.vmem [shape: f32[1,32], index: 4, kind: input, shape index: {}]   ;;  %s541_s5 = inlined_call_operand.vmem [shape: f32[1,32], index: 5, kind: input, shape index: {}]   ;;  %s542_s6 = inlined_call_operand.vmem [shape: f32[16,32], index: 6, kind: output, shape index: {}]  }
   0x1 LB: > { %s411_s22 = sadd.s32 4294967295, %s454_s21   ;;  %p415_p0 = scmp.ge.s32.totalorder %s454_s21, 1  ;;  %s454_s21 = sphi %s492_s21, %s16_s21  }
   0x2   : > { %p220_p1 = scmp.lt.s32.totalorder %s454_s21, 3 }
   0x4   : > { %p221_p2 = pnand %p415_p0, %p220_p1 }
   0x5   : > { %p252_p3 = scmp.lt.s32.totalorder (!%p221_p2), %s411_s22, 1 }
   0x6   : > { %224 = sbr.rel (%p221_p2) target bundleno = 418 (0x1a2), region = 44 }
   0xb   : > { %v431_v0 = vld [vmem:[%s538_s2 + $0x8] sm:$0xff]  ;;  %v430_v1 = vld [vmem:[%s538_s2] sm:$0xff]  ;;  %s544_s22 = smov (!%p252_p3, %s411_s22), 1  ;;  %vm287_vm0 = vcmask 261120   ;;  %v456_v11 = vmov 32.0  }
   0xc   : > { %297 = vmatpush.bf16.msra.mxu0 %v431_v0  ;;  %s506_s27 = sshll.u32 %s544_s22, 3  ;;  %v441_v4 = vld [vmem:[%s539_s3] ss:$0 sm:$0xff]  ;;  %444 = vrcp.f32 %v456_v11 }
   0xd   : > { %s255_s30 = scalar_lea.vmem %s536_s0, %s506_s27  ;;  %s259_s11 = scalar_lea.vmem %s537_s1, %s506_s27  ;;  %v442_v32 = vld [vmem:[%s540_s4] ss:$0 sm:$0xff] }
   0xe   : > { %v265_v2 = vld [vmem:[%s255_s30] sm:$0xff]  ;;  %s263_s18 = scalar_lea.vmem %s542_s6, %s506_s27 }
   0xf   : > { %v266_v3 = vpack.c.bf16 %v265_v2, %v265_v2  ;;  %v304_v6 = vld [vmem:[%s259_s11] sm:$0xff] }
  0x10   : > { %298 = vmatpush.bf16.msra.mxu0 %v430_v1  ;;  %v443_v34 = vld [vmem:[%s541_s5] ss:$0 sm:$0xff] }
  0x12   : > { %v445_v12 = vpop.eup %444 }
  0x13   : > { %427 = vmatmul.msk.bf16.vlgmr.msra.gmra.mxu0 %vm287_vm0, %v266_v3  ;;  %v310_v13 = vmul.f32 32.0, %v445_v12  ;;  %vm314_vm1 = vweird.f32 %v445_v12 }
  0x15   : > { %v311_v14 = vsub.f32 1.0, %v310_v13 }
  0x17   : > { %v312_v15 = vmul.f32 %v445_v12, %v311_v14 }
  0x19   : > { %v313_v16 = vadd.f32 %v445_v12, %v312_v15 }
  0x1b   : > { %v315_v17 = vsel %vm314_vm1, %v445_v12, %v313_v16 }
  0x90   : > { %v300_v5 = vpop.f32.mrf.mxu0 }
  0x91   : > { %v301_v7 = vadd.f32 %v441_v4, %v300_v5 }
  0x93   : > { %v305_v8 = vadd.f32 %v304_v6, %v301_v7 }
  0x95   : > { %v306_v9 = vsel %vm287_vm0, %v305_v8, 0.0 }
  0x96   : > { %307 = vadd.xlane.f32.xlu0 %v306_v9 }
  0x98   : > { %v302_v10 = vpop.f32.mrf.mxu0 }
 0x109   : > { %v308_v18 = vpop.xlane.xlu0 %307 }
 0x10a   : > { %v316_v19 = vmul.f32 %v315_v17, %v308_v18 }
 0x10c   : > { %v317_v20 = vsub.f32 %v305_v8, %v316_v19 }
 0x10e   : > { %v318_v21 = vmul.f32 %v317_v20, %v317_v20 }
 0x110   : > { %v319_v22 = vsel %vm287_vm0, %v318_v21, 0.0 }
 0x111   : > { %320 = vadd.xlane.f32.xlu0 %v319_v22 }
 0x184   : > { %v321_v23 = vpop.xlane.xlu0 %320 }
 0x185   : > { %v322_v24 = vmul.f32 %v321_v23, %v315_v17 }
 0x187   : > { %v323_v25 = vadd.f32 1e-05, %v322_v24 }
 0x189   : > { %446 = vrsqrt.f32 %v323_v25  ;;  %vm330_vm3 = vweird.f32 %v323_v25 }
 0x18f   : > { %v447_v26 = vpop.eup %446 }
 0x190   : > { %v325_v27 = vmul.f32 %v447_v26, %v323_v25  ;;  %vm331_vm2 = vweird.f32 %v447_v26 }
 0x191   : > { %vm332_vm4 = vmor %vm330_vm3, %vm331_vm2 }
 0x192   : > { %v326_v28 = vmul.f32 %v447_v26, %v325_v27 }
 0x194   : > { %v327_v29 = vmul.f32 0.5, %v326_v28 }
 0x196   : > { %v328_v30 = vsub.f32 1.5, %v327_v29 }
 0x198   : > { %v329_v31 = vmul.f32 %v447_v26, %v328_v30 }
 0x19a   : > { %v333_v33 = vsel %vm332_vm4, %v447_v26, %v329_v31 }
 0x19b   : > { %v334_v35 = vmul.f32 %v333_v33, %v317_v20 }
 0x19d   : > { %v339_v36 = vmul.f32 %v442_v32, %v334_v35 }
 0x19f   : > { %v344_v37 = vadd.f32 %v443_v34, %v339_v36 }
 0x1a1   : > { %345 = vst.msk [vmem:[%s263_s18] sm:$0xff] %vm287_vm0, %v344_v37 }
 0x1a2 PF: > { %s16_s21 = sadd.s32 1, %s454_s21  }
 0x1a3   : > { %p13_p4 = scmp.ge.s32.totalorder %s16_s21, 4  }
 0x1a5   :  { %15 = sbr.rel (!%p13_p4) target bundleno = 1 (0x1), region = 77 }

// kernel: transformer_forward.33
= control target key start
LH: loop header
LB: loop body
LE: loop exit
PB: predicated region body
PF: predicated region fallthrough
CT: control target
= control target key end

     0   :  { %s400_s15 = smov 0   ;;  %s429_s0 = inlined_call_operand.vmem [shape: f32[16,32], index: 0, kind: input, shape index: {}]   ;;  %s430_s1 = inlined_call_operand.vmem [shape: bf16[32,96], index: 1, kind: input, shape index: {}]   ;;  %s431_s2 = inlined_call_operand.vmem [shape: f32[1,96], index: 2, kind: input, shape index: {}]   ;;  %s432_s3 = inlined_call_operand.vmem [shape: f32[16,64], index: 3, kind: output, shape index: {0}]   ;;  %s433_s4 = inlined_call_operand.vmem [shape: f32[16,32], index: 4, kind: output, shape index: {1}]  }
   0x1 LB: > { %s335_s16 = sadd.s32 4294967295, %s372_s15   ;;  %p339_p0 = scmp.ge.s32.totalorder %s372_s15, 1  ;;  %s372_s15 = sphi %s400_s15, %s15_s15  }
   0x2   : > { %p164_p1 = scmp.lt.s32.totalorder %s372_s15, 3 }
   0x4   : > { %p165_p2 = pnand %p339_p0, %p164_p1 }
   0x5   : > { %p192_p3 = scmp.lt.s32.totalorder (!%p165_p2), %s335_s16, 1  ;;  %s374_s30 = smov (!%p165_p2), 64  }
   0x6   : > { %168 = sbr.rel (%p165_p2) target bundleno = 263 (0x107), region = 32 }
   0xb   : > { %v355_v0 = vld [vmem:[%s430_s1 + $0x8] sm:$0xff]  ;;  %v354_v1 = vld [vmem:[%s430_s1] sm:$0xff]  ;;  %s435_s16 = smov (!%p192_p3, %s335_s16), 1  ;;  %vm227_vm0 = vcmask 261120   ;;  %vm244_vm1 = vcmask 523264  }
   0xc   : > { %237 = vmatpush.bf16.msra.mxu0 %v355_v0  ;;  %s340_s21 = sshll.u32 %s435_s16, 3  ;;  %v365_v4 = vld [vmem:[%s431_s2] ss:$0 sm:$0xff] }
   0xd   : > { %s195_s24 = scalar_lea.vmem %s429_s0, %s340_s21  ;;  %s199_s29 = scalar_lea.vmem %s432_s3, %s340_s21 }
   0xe   : > { %v205_v2 = vld [vmem:[%s195_s24] sm:$0xff]  ;;  %s203_s7 = scalar_lea.vmem %s433_s4, %s340_s21 }
   0xf   : > { %v206_v3 = vpack.c.bf16 %v205_v2, %v205_v2 }
  0x10   : > { %238 = vmatpush.bf16.msra.mxu0 %v354_v1 }
  0x13   : > { %351 = vmatmul.msk.bf16.vlgmr.msra.gmra.mxu0 %vm227_vm0, %v206_v3 }
  0x90   : > { %v240_v5 = vpop.f32.mrf.mxu0 }
  0x91   : > { %v241_v6 = vadd.f32 %v365_v4, %v240_v5 }
  0x93   : > { %245 = vst.msk [vmem:[%s199_s29] sm:$0xff] %vm244_vm1, %v241_v6  ;;  %247 = vrot.lane.b32.xlu0 %v241_v6, %s374_s30 }
  0x98   : > { %v242_v7 = vpop.f32.mrf.mxu0 }
 0x105   : > { %v248_v8 = vpop.permute.xlu0 %247 }
 0x106   : > { %250 = vst.msk [vmem:[%s203_s7] sm:$0xff] %vm227_vm0, %v248_v8 }
 0x107 PF: > { %s15_s15 = sadd.s32 1, %s372_s15  }
 0x108   : > { %p12_p4 = scmp.ge.s32.totalorder %s15_s15, 4  }
 0x10a   :  { %14 = sbr.rel (!%p12_p4) target bundleno = 1 (0x1), region = 74 }

// kernel: transformer_forward.36
= control target key start
LH: loop header
LB: loop body
LE: loop exit
PB: predicated region body
PF: predicated region fallthrough
CT: control target
= control target key end

     0   :  { %s317_s12 = smov 0   ;;  %s337_s0 = inlined_call_operand.vmem [shape: f32[16,32], index: 0, kind: input, shape index: {}]   ;;  %s338_s1 = inlined_call_operand.vmem [shape: bf16[32,32], index: 1, kind: input, shape index: {}]   ;;  %s339_s2 = inlined_call_operand.vmem [shape: f32[1,32], index: 2, kind: input, shape index: {}]   ;;  %s340_s3 = inlined_call_operand.vmem [shape: f32[16,32], index: 3, kind: output, shape index: {}]  }
   0x1 LB: > { %s260_s13 = sadd.s32 4294967295, %s295_s12   ;;  %p264_p0 = scmp.ge.s32.totalorder %s295_s12, 1  ;;  %s295_s12 = sphi %s317_s12, %s13_s12  }
   0x2   : > { %p136_p1 = scmp.lt.s32.totalorder %s295_s12, 3 }
   0x4   : > { %p137_p2 = pnand %p264_p0, %p136_p1 }
   0x5   : > { %p158_p3 = scmp.lt.s32.totalorder (!%p137_p2), %s260_s13, 1 }
   0x6   : > { %140 = sbr.rel (%p137_p2) target bundleno = 153 (0x99), region = 32 }
   0xb   : > { %v279_v0 = vld [vmem:[%s338_s1 + $0x8] sm:$0xff]  ;;  %v278_v1 = vld [vmem:[%s338_s1] sm:$0xff]  ;;  %s342_s13 = smov (!%p158_p3, %s260_s13), 1  ;;  %vm189_vm0 = vcmask 261120  }
   0xc   : > { %199 = vmatpush.bf16.msra.mxu0 %v279_v0  ;;  %s265_s18 = sshll.u32 %s342_s13, 3  ;;  %v288_v4 = vld [vmem:[%s339_s2] ss:$0 sm:$0xff] }
   0xd   : > { %s161_s21 = scalar_lea.vmem %s337_s0, %s265_s18  ;;  %s165_s26 = scalar_lea.vmem %s340_s3, %s265_s18 }
   0xe   : > { %v167_v2 = vld [vmem:[%s161_s21] sm:$0xff] }
   0xf   : > { %v168_v3 = vpack.c.bf16 %v167_v2, %v167_v2 }
  0x10   : > { %200 = vmatpush.bf16.msra.mxu0 %v278_v1 }
  0x13   : > { %275 = vmatmul.msk.bf16.vlgmr.msra.gmra.mxu0 %vm189_vm0, %v168_v3 }
  0x90   : > { %v202_v5 = vpop.f32.mrf.mxu0 }
  0x91   : > { %v203_v6 = vadd.f32 %v288_v4, %v202_v5 }
  0x93   : > { %206 = vst.msk [vmem:[%s165_s26] sm:$0xff] %vm189_vm0, %v203_v6 }
  0x98   : > { %v204_v7 = vpop.f32.mrf.mxu0 }
  0x99 PF: > { %s13_s12 = sadd.s32 1, %s295_s12  }
  0x9a   : > { %p10_p4 = scmp.ge.s32.totalorder %s13_s12, 4  }
  0x9c   :  { %12 = sbr.rel (!%p10_p4) target bundleno = 1 (0x1), region = 62 }

// kernel: transformer_forward.28
= control target key start
LH: loop header
LB: loop body
LE: loop exit
PB: predicated region body
PF: predicated region fallthrough
CT: control target
= control target key end

     0   :  { %s543_s24 = smov 0   ;;  %s596_s0 = inlined_call_operand.vmem [shape: f32[16,32], index: 0, kind: input, shape index: {}]   ;;  %s597_s1 = inlined_call_operand.vmem [shape: bf16[32,32], index: 1, kind: input, shape index: {}]   ;;  %s598_s2 = inlined_call_operand.vmem [shape: f32[1,32], index: 2, kind: input, shape index: {}]   ;;  %s599_s3 = inlined_call_operand.vmem [shape: bf16[32,32], index: 3, kind: input, shape index: {}]   ;;  %s600_s4 = inlined_call_operand.vmem [shape: f32[1,32], index: 4, kind: input, shape index: {}]   ;;  %s601_s5 = inlined_call_operand.vmem [shape: f32[1,32], index: 5, kind: input, shape index: {}]   ;;  %s602_s6 = inlined_call_operand.vmem [shape: f32[1,32], index: 6, kind: input, shape index: {}]   ;;  %s603_s7 = inlined_call_operand.vmem [shape: f32[16,32], index: 7, kind: output, shape index: {}]  }
   0x1 LB: > { %s446_s25 = sadd.s32 4294967295, %s500_s24   ;;  %p450_p0 = scmp.ge.s32.totalorder %s500_s24, 1  ;;  %s500_s24 = sphi %s543_s24, %s17_s24  }
   0x2   : > { %p236_p1 = scmp.lt.s32.totalorder %s500_s24, 3 }
   0x4   : > { %p237_p2 = pnand %p450_p0, %p236_p1 }
   0x5   : > { %p266_p3 = scmp.lt.s32.totalorder (!%p237_p2), %s446_s25, 1 }
   0x6   : > { %240 = sbr.rel (%p237_p2) target bundleno = 550 (0x226), region = 48 }
   0xb   : > { %v474_v0 = vld [vmem:[%s597_s1 + $0x8] sm:$0xff]  ;;  %v473_v1 = vld [vmem:[%s597_s1] sm:$0xff]  ;;  %s605_s25 = smov (!%p266_p3, %s446_s25), 1  ;;  %vm297_vm0 = vcmask 261120   ;;  %v502_v18 = vmov 32.0  }
   0xc   : > { %307 = vmatpush.bf16.msra.mxu0 %v474_v0  ;;  %s451_s30 = sshll.u32 %s605_s25, 3  ;;  %v476_v4 = vld [vmem:[%s599_s3 + $0x8] sm:$0xff]  ;;  %v475_v5 = vld [vmem:[%s599_s3] sm:$0xff]  ;;  %490 = vrcp.f32 %v502_v18 }
   0xd   : > { %s269_s10 = scalar_lea.vmem %s596_s0, %s451_s30  ;;  %345 = vmatpush.bf16.msra.mxu1 %v476_v4  ;;  %v486_v6 = vld [vmem:[%s598_s2] ss:$0 sm:$0xff]  ;;  %s273_s27 = scalar_lea.vmem %s603_s7, %s451_s30 }
   0xe   : > { %v275_v2 = vld [vmem:[%s269_s10] sm:$0xff] }
   0xf   : > { %v276_v3 = vpack.c.bf16 %v275_v2, %v275_v2  ;;  %v487_v12 = vld [vmem:[%s600_s4] ss:$0 sm:$0xff] }
  0x10   : > { %308 = vmatpush.bf16.msra.mxu0 %v473_v1  ;;  %v488_v39 = vld [vmem:[%s601_s5] ss:$0 sm:$0xff] }
  0x11   : > { %346 = vmatpush.bf16.msra.mxu1 %v475_v5  ;;  %v489_v41 = vld [vmem:[%s602_s6] ss:$0 sm:$0xff] }
  0x12   : > { %v491_v19 = vpop.eup %490 }
  0x13   : > { %461 = vmatmul.msk.bf16.vlgmr.msra.gmra.mxu0 %vm297_vm0, %v276_v3  ;;  %v357_v20 = vmul.f32 32.0, %v491_v19  ;;  %vm361_vm1 = vweird.f32 %v491_v19 }
  0x15   : > { %v358_v21 = vsub.f32 1.0, %v357_v20 }
  0x17   : > { %v359_v22 = vmul.f32 %v491_v19, %v358_v21 }
  0x19   : > { %v360_v23 = vadd.f32 %v491_v19, %v359_v22 }
  0x1b   : > { %v362_v24 = vsel %vm361_vm1, %v491_v19, %v360_v23 }
  0x90   : > { %v310_v7 = vpop.f32.mrf.mxu0 }
  0x91   : > { %v311_v8 = vadd.f32 %v486_v6, %v310_v7 }
  0x93   : > { %v314_v9 = vmax.f32 %v311_v8, 0.0 }
  0x95   : > { %v315_v10 = vpack.c.bf16 %v314_v9, %v314_v9 }
  0x97   : > { %470 = vmatmul.msk.bf16.vlgmr.msra.gmra.mxu1 %vm297_vm0, %v315_v10 }
  0x98   : > { %v312_v11 = vpop.f32.mrf.mxu0 }
 0x114   : > { %v348_v13 = vpop.f32.mrf.mxu1 }
 0x115   : > { %v349_v14 = vadd.f32 %v487_v12, %v348_v13 }
 0x117   : > { %v352_v15 = vadd.f32 %v349_v14, %v275_v2 }
 0x119   : > { %v353_v16 = vsel %vm297_vm0, %v352_v15, 0.0 }
 0x11a   : > { %354 = vadd.xlane.f32.xlu0 %v353_v16 }
 0x11c   : > { %v350_v17 = vpop.f32.mrf.mxu1 }
 0x18d   : > { %v355_v25 = vpop.xlane.xlu0 %354 }
 0x18e   : > { %v363_v26 = vmul.f32 %v362_v24, %v355_v25 }
 0x190   : > { %v364_v27 = vsub.f32 %v352_v15, %v363_v26 }
 0x192   : > { %v365_v28 = vmul.f32 %v364_v27, %v364_v27 }
 0x194   : > { %v366_v29 = vsel %vm297_vm0, %v365_v28, 0.0 }
 0x195   : > { %367 = vadd.xlane.f32.xlu0 %v366_v29 }
 0x208   : > { %v368_v30 = vpop.xlane.xlu0 %367 }
 0x209   : > { %v369_v31 = vmul.f32 %v368_v30, %v362_v24 }
 0x20b   : > { %v370_v32 = vadd.f32 1e-05, %v369_v31 }
 0x20d   : > { %492 = vrsqrt.f32 %v370_v32  ;;  %vm377_vm3 = vweird.f32 %v370_v32 }
 0x213   : > { %v493_v33 = vpop.eup %492 }
 0x214   : > { %v372_v34 = vmul.f32 %v493_v33, %v370_v32  ;;  %vm378_vm2 = vweird.f32 %v493_v33 }
 0x215   : > { %vm379_vm4 = vmor %vm377_vm3, %vm378_vm2 }
 0x216   : > { %v373_v35 = vmul.f32 %v493_v33, %v372_v34 }
 0x218   : > { %v374_v36 = vmul.f32 0.5, %v373_v35 }
 0x21a   : > { %v375_v37 = vsub.f32 1.5, %v374_v36 }
 0x21c   : > { %v376_v38 = vmul.f32 %v493_v33, %v375_v37 }
 0x21e   : > { %v380_v40 = vsel %vm379_vm4, %v493_v33, %v376_v38 }
 0x21f   : > { %v381_v42 = vmul.f32 %v380_v40, %v364_v27 }
 0x221   : > { %v386_v43 = vmul.f32 %v488_v39, %v381_v42 }
 0x223   : > { %v391_v44 = vadd.f32 %v489_v41, %v386_v43 }
 0x225   : > { %392 = vst.msk [vmem:[%s273_s27] sm:$0xff] %vm297_vm0, %v391_v44 }
 0x226 PF: > { %s17_s24 = sadd.s32 1, %s500_s24  }
 0x227   : > { %p14_p4 = scmp.ge.s32.totalorder %s17_s24, 4  }
 0x229   :  { %16 = sbr.rel (!%p14_p4) target bundleno = 1 (0x1), region = 78 }

// kernel: transformer_forward.26
= control target key start
LH: loop header
LB: loop body
LE: loop exit
PB: predicated region body
PF: predicated region fallthrough
CT: control target
= control target key end

     0   :  { %s409_s9 = smov 0   ;;  %s447_s0 = inlined_call_operand.vmem [shape: f32[2,8,32], index: 0, kind: input, shape index: {}]   ;;  %s448_s1 = inlined_call_operand.vmem [shape: f32[2,8,64], index: 1, kind: input, shape index: {}]   ;;  %s449_s2 = inlined_call_operand.vmem [shape: f32[2,8,32], index: 2, kind: output, shape index: {}]  }
   0x1 LB: > { %s348_s10 = sadd.s32 4294967295, %s388_s9   ;;  %p352_p0 = scmp.ge.s32.totalorder %s388_s9, 1  ;;  %s388_s9 = sphi %s409_s9, %s12_s9  }
   0x2   : > { %p120_p1 = scmp.lt.s32.totalorder %s388_s9, 3 }
   0x4   : > { %p121_p2 = pnand %p352_p0, %p120_p1 }
   0x5   : > { %p144_p3 = scmp.lt.s32.totalorder (!%p121_p2), %s348_s10, 1  ;;  %s390_s18 = smov (!%p121_p2), 112  }
   0x6   : > { %124 = sbr.rel (%p121_p2) target bundleno = 670 (0x29e), region = 28  ;;  %s391_s19 = smov (!%p121_p2), 96  }
   0x7   : > { %s392_s20 = smov (!%p121_p2), 80   ;;  %s393_s21 = smov (!%p121_p2), 16  }
   0xb   : > { %s451_s10 = smov (!%p144_p3, %s348_s10), 1  ;;  %vm161_vm0 = vcmask 130048   ;;  %vm182_vm1 = vcmask 64512   ;;  %vm199_vm2 = vcmask 1043456   ;;  %vm281_vm3 = vcmask 261120  }
   0xc   : > { %s417_s11 = sshll.u32 %s451_s10, 3 }
   0xd   : > { %s151_s14 = scalar_lea.vmem %s448_s1, %s417_s11  ;;  %s147_s17 = scalar_lea.vmem %s447_s0, %s417_s11 }
   0xe   : > { %v158_v0 = vld [vmem:[%s151_s14] sm:$0xff]  ;;  %s155_s24 = scalar_lea.vmem %s449_s2, %s417_s11 }
   0xf   : > { %v160_v1 = vpack.c.bf16 %v158_v0, %v158_v0  ;;  %v157_v2 = vld [vmem:[%s147_s17] sm:$0xff] }
  0x10   : > { %v159_v3 = vpack.c.bf16 %v157_v2, %v157_v2 }
  0x11   : > { %221 = vrot.lane.b32.xlu0 %v160_v1, %s390_s18  ;;  %v166_v4 = vsel %vm161_vm0, %v160_v1, 0 }
  0x12   : > { %175 = vmatpush.bf16.xpose.msra.mxu0 %v166_v4 }
  0x19   : > { %219 = vrot.lane.b32.xlu0 %v159_v3, %s390_s18  ;;  %356 = vmatmul.msk.bf16.vlgmr.msra.gmra.mxu0 %vm161_vm0, %v159_v3 }
  0x83   : > { %v222_v5 = vpop.permute.xlu0 %221 }
  0x84   : > { %v227_v6 = vsel %vm161_vm0, %v222_v5, 0 }
  0x85   : > { %236 = vmatpush.bf16.xpose.msra.mxu2 %v227_v6 }
  0x8b   : > { %v220_v7 = vpop.permute.xlu0 %219 }
  0x8c   : > { %358 = vmatmul.msk.bf16.vlgmr.msra.gmra.mxu2 %vm161_vm0, %v220_v7 }
  0x96   : > { %v177_v8 = vpop.f32.mrf.mxu0 }
  0x97   : > { %v181_v9 = vmul.f32 0.25, %v177_v8 }
  0x99   : > { %v183_v10 = vsel %vm182_vm1, %v181_v9, -inf }
  0x9a   : > { %184 = vmax.xlane.f32.xlu2 %v183_v10 }
  0x9e   : > { %v179_v11 = vpop.f32.mrf.mxu0 }
  0xb2   : > { %194 = vrot.lane.b32.xlu2 %v160_v1, %s391_s19 }
 0x10d   : > { %v185_v16 = vpop.xlane.xlu2 %184 }
 0x10e   : > { %v186_v17 = vsub.f32 %v181_v9, %v185_v16 }
 0x10f   : > { %v238_v12 = vpop.f32.mrf.mxu2 }
 0x110   : > { %v242_v13 = vmul.f32 0.25, %v238_v12  ;;  %v187_v18 = vmul.f32 1.442695, %v186_v17 }
 0x112   : > { %v243_v14 = vsel %vm182_vm1, %v242_v13, -inf  ;;  %374 = vpow2.f32 %v187_v18 }
 0x113   : > { %244 = vmax.xlane.f32.xlu1 %v243_v14 }
 0x115   : > { %v195_v19 = vpop.permute.xlu2 %194 }
 0x116   : > { %v201_v20 = vsel %vm199_vm2, %v195_v19, 0 }
 0x117   : > { %v240_v15 = vpop.f32.mrf.mxu2  ;;  %210 = vmatpush.bf16.msra.mxu1 %v201_v20 }
 0x118   : > { %v375_v21 = vpop.eup %374 }
 0x119   : > { %v192_v22 = vpack.c.bf16 %v375_v21, %v375_v21  ;;  %v189_v23 = vsel %vm182_vm1, %v375_v21, 0.0 }
 0x11a   : > { %190 = vadd.xlane.f32.xlu2 %v189_v23 }
 0x11b   : > { %357 = vmatmul.msk.bf16.vlgmr.msra.gmra.mxu1 %vm182_vm1, %v192_v22 }
 0x12c   : > { %253 = vrot.lane.b32.xlu1 %v160_v1, %s392_s20 }
 0x186   : > { %v245_v24 = vpop.xlane.xlu1 %244 }
 0x187   : > { %v246_v25 = vsub.f32 %v242_v13, %v245_v24 }
 0x189   : > { %v247_v26 = vmul.f32 1.442695, %v246_v25 }
 0x18b   : > { %376 = vpow2.f32 %v247_v26 }
 0x18d   : > { %v191_v39 = vpop.xlane.xlu2 %190 }
 0x191   : > { %v377_v27 = vpop.eup %376 }
 0x192   : > { %v249_v28 = vsel %vm182_vm1, %v377_v27, 0.0  ;;  %v252_v31 = vpack.c.bf16 %v377_v27, %v377_v27 }
 0x193   : > { %250 = vadd.xlane.f32.xlu0 %v249_v28 }
 0x198   : > { %v212_v32 = vpop.f32.mrf.mxu1 }
 0x19e   : > { %v254_v29 = vpop.permute.xlu1 %253 }
 0x19f   : > { %v259_v30 = vsel %vm199_vm2, %v254_v29, 0 }
 0x1a0   : > { %268 = vmatpush.bf16.msra.mxu3 %v259_v30  ;;  %v214_v33 = vpop.f32.mrf.mxu1 }
 0x1a3   : > { %359 = vmatmul.msk.bf16.vlgmr.msra.gmra.mxu3 %vm182_vm1, %v252_v31 }
 0x206   : > { %v251_v34 = vpop.xlane.xlu0 %250 }
 0x207   : > { %378 = vrcp.f32 %v251_v34 }
 0x208   : > { %380 = vrcp.f32 %v191_v39 }
 0x20d   : > { %v379_v35 = vpop.eup %378 }
 0x20e   : > { %v381_v40 = vpop.eup %380 }
 0x20f   : > { %v217_v41 = vmul.f32 %v381_v40, %v212_v32 }
 0x226   : > { %v270_v36 = vpop.f32.mrf.mxu3 }
 0x227   : > { %v275_v37 = vmul.f32 %v379_v35, %v270_v36 }
 0x229   : > { %277 = vrot.lane.b32.xlu1 %v275_v37, %s393_s21 }
 0x22e   : > { %v272_v38 = vpop.f32.mrf.mxu3 }
 0x29b   : > { %v278_v42 = vpop.permute.xlu1 %277 }
 0x29c   : > { %v280_v43 = vsel %vm161_vm0, %v217_v41, %v278_v42 }
 0x29d   : > { %282 = vst.msk [vmem:[%s155_s24] sm:$0xff] %vm281_vm3, %v280_v43 }
 0x29e PF: > { %s12_s9 = sadd.s32 1, %s388_s9  }
 0x29f   : > { %p9_p4 = scmp.ge.s32.totalorder %s12_s9, 4  }
 0x2a1   :  { %11 = sbr.rel (!%p9_p4) target bundleno = 1 (0x1), region = 61 }

// kernel: transformer_forward.31
= control target key start
LH: loop header
LB: loop body
LE: loop exit
PB: predicated region body
PF: predicated region fallthrough
CT: control target
= control target key end

     0   :  { %11 = vsyncpa [#allocation3], 0  ;;  %s567_s21 = smov 0   ;;  %s611_s0 = inlined_call_operand.vmem [shape: f32[16,32], index: 0, kind: input, shape index: {}]   ;;  %s612_s1 = inlined_call_operand.vmem [shape: f32[16,32], index: 1, kind: input, shape index: {}]   ;;  %s613_s2 = inlined_call_operand.vmem [shape: bf16[32,32], index: 2, kind: input, shape index: {}]   ;;  %s614_s3 = inlined_call_operand.vmem [shape: f32[1,32], index: 3, kind: input, shape index: {}]   ;;  %s615_s4 = inlined_call_operand.vmem [shape: f32[1,32], index: 4, kind: input, shape index: {}]   ;;  %s616_s5 = inlined_call_operand.hbm [shape: f32[1,32], index: 5, kind: input, shape index: {}]   ;;  %s617_s6 = inlined_call_operand.vmem [shape: f32[16,32], index: 6, kind: output, shape index: {}]  }
   0x1 LB: > { %s438_s22 = sadd.s32 4294967295, %s528_s21   ;;  %p440_p0 = scmp.ge.s32.totalorder %s528_s21, 1  ;;  %s528_s21 = sphi %s567_s21, %s17_s21  }
   0x2   : > { %p184_p1 = scmp.lt.s32.totalorder %s528_s21, 3  ;;  %s205_s25 = sshll.u32 %s616_s5, 4  ;;  %s206_s25 = int_to_ptr.hbm [resolvable:$true] %s205_s25 }
   0x3   : > { %p469_p3 = scmp.eq.s32.totalorder %s438_s22, 0  ;;  %s530_s26 = smov [#allocation2]  }
   0x4   : > { %p185_p2 = pnand %p440_p0, %p184_p1  ;;  %s207_s27 = sshll.u32 %s530_s26, 4  ;;  %s208_s27 = int_to_ptr.vmem [resolvable:$true] %s207_s27 }
   0x6   : > { %p465_p4 = pneg %p185_p2  ;;  %234 = sbr.rel (%p185_p2) target bundleno = 419 (0x1a3), region = 44 }
   0x8   : > { %p466_p5 = pnand %p469_p3, %p465_p4 }
   0xa   : > { %468 = dma.hbm_to_vmem [thread:$0]  (!%p466_p5), %s206_s25, 16, %s208_s27, [#allocation3]  }
   0xb   : > { %523 = dma.done.wait (%p469_p3), [#allocation3], 16  }
   0xc   : > { %525 = vsyncadd (%p469_p3), [#allocation3], 4294967280  ;;  %p267_p6 = scmp.lt.s32.totalorder %s438_s22, 1  ;;  %v460_v0 = vld [vmem:[%s613_s2 + $0x8] sm:$0xff]  ;;  %v459_v1 = vld [vmem:[%s613_s2] sm:$0xff]  ;;  %vm302_vm0 = vcmask 261120  }
   0xd   : > { %312 = vmatpush.bf16.msra.mxu0 %v460_v0  ;;  %v481_v4 = vld [vmem:[%s614_s3] ss:$0 sm:$0xff]  ;;  %v531_v11 = vmov 32.0  }
   0xe   : > { %s619_s22 = smov (!%p267_p6, %s438_s22), 1  ;;  %484 = vrcp.f32 %v531_v11  ;;  %v482_v32 = vld [vmem:[%s615_s4] ss:$0 sm:$0xff] }
   0xf   : > { %s578_s28 = sshll.u32 %s619_s22, 3  ;;  %v483_v34 = vld [vmem:[#allocation2] ss:$0 sm:$0xff] }
  0x10   : > { %s270_s7 = scalar_lea.vmem %s611_s0, %s578_s28  ;;  %s274_s16 = scalar_lea.vmem %s612_s1, %s578_s28 }
  0x11   : > { %v280_v2 = vld [vmem:[%s270_s7] sm:$0xff]  ;;  %313 = vmatpush.bf16.msra.mxu0 %v459_v1  ;;  %s278_s22 = scalar_lea.vmem %s617_s6, %s578_s28 }
  0x12   : > { %v281_v3 = vpack.c.bf16 %v280_v2, %v280_v2  ;;  %v319_v6 = vld [vmem:[%s274_s16] sm:$0xff] }
  0x14   : > { %456 = vmatmul.msk.bf16.vlgmr.msra.gmra.mxu0 %vm302_vm0, %v281_v3  ;;  %v485_v12 = vpop.eup %484 }
  0x15   : > { %v325_v13 = vmul.f32 32.0, %v485_v12  ;;  %vm329_vm1 = vweird.f32 %v485_v12 }
  0x17   : > { %v326_v14 = vsub.f32 1.0, %v325_v13 }
  0x19   : > { %v327_v15 = vmul.f32 %v485_v12, %v326_v14 }
  0x1b   : > { %v328_v16 = vadd.f32 %v485_v12, %v327_v15 }
  0x1d   : > { %v330_v17 = vsel %vm329_vm1, %v485_v12, %v328_v16 }
  0x91   : > { %v315_v5 = vpop.f32.mrf.mxu0 }
  0x92   : > { %v316_v7 = vadd.f32 %v481_v4, %v315_v5 }
  0x94   : > { %v320_v8 = vadd.f32 %v319_v6, %v316_v7 }
  0x96   : > { %v321_v9 = vsel %vm302_vm0, %v320_v8, 0.0 }
  0x97   : > { %322 = vadd.xlane.f32.xlu0 %v321_v9 }
  0x99   : > { %v317_v10 = vpop.f32.mrf.mxu0 }
 0x10a   : > { %v323_v18 = vpop.xlane.xlu0 %322 }
 0x10b   : > { %v331_v19 = vmul.f32 %v330_v17, %v323_v18 }
 0x10d   : > { %v332_v20 = vsub.f32 %v320_v8, %v331_v19 }
 0x10f   : > { %v333_v21 = vmul.f32 %v332_v20, %v332_v20 }
 0x111   : > { %v334_v22 = vsel %vm302_vm0, %v333_v21, 0.0 }
 0x112   : > { %335 = vadd.xlane.f32.xlu0 %v334_v22 }
 0x185   : > { %v336_v23 = vpop.xlane.xlu0 %335 }
 0x186   : > { %v337_v24 = vmul.f32 %v336_v23, %v330_v17 }
 0x188   : > { %v338_v25 = vadd.f32 1e-05, %v337_v24 }
 0x18a   : > { %486 = vrsqrt.f32 %v338_v25  ;;  %vm345_vm3 = vweird.f32 %v338_v25 }
 0x190   : > { %v487_v26 = vpop.eup %486 }
 0x191   : > { %v340_v27 = vmul.f32 %v487_v26, %v338_v25  ;;  %vm346_vm2 = vweird.f32 %v487_v26 }
 0x192   : > { %vm347_vm4 = vmor %vm345_vm3, %vm346_vm2 }
 0x193   : > { %v341_v28 = vmul.f32 %v487_v26, %v340_v27 }
 0x195   : > { %v342_v29 = vmul.f32 0.5, %v341_v28 }
 0x197   : > { %v343_v30 = vsub.f32 1.5, %v342_v29 }
 0x199   : > { %v344_v31 = vmul.f32 %v487_v26, %v343_v30 }
 0x19b   : > { %v348_v33 = vsel %vm347_vm4, %v487_v26, %v344_v31 }
 0x19c   : > { %v349_v35 = vmul.f32 %v348_v33, %v332_v20 }
 0x19e   : > { %v354_v36 = vmul.f32 %v482_v32, %v349_v35 }
 0x1a0   : > { %v359_v37 = vadd.f32 %v483_v34, %v354_v36 }
 0x1a2   : > { %360 = vst.msk [vmem:[%s278_s22] sm:$0xff] %vm302_vm0, %v359_v37 }
 0x1a3 PF: > { %s17_s21 = sadd.s32 1, %s528_s21  }
 0x1a4   : > { %p14_p7 = scmp.ge.s32.totalorder %s17_s21, 4  }
 0x1a6   :  { %16 = sbr.rel (!%p14_p7) target bundleno = 1 (0x1), region = 82 }
 0x1ab   :  { %380 = vsyncpa [#allocation3], 1 }
 0x1ac   :  { %382 = vsyncpa [#allocation3 + $0x1], 1 }

// kernel: transformer_forward.32
= control target key start
LH: loop header
LB: loop body
LE: loop exit
PB: predicated region body
PF: predicated region fallthrough
CT: control target
= control target key end

     0   :  { %12 = vsyncpa [#allocation3], 0  ;;  %s920_s0 = inlined_call_operand.vmem [shape: f32[16,32], index: 0, kind: input, shape index: {}]   ;;  %s921_s1 = inlined_call_operand.vmem [shape: bf16[32,32], index: 1, kind: input, shape index: {}]   ;;  %s922_s2 = inlined_call_operand.hbm [shape: f32[1,32], index: 2, kind: input, shape index: {}]   ;;  %s923_s3 = inlined_call_operand.vmem [shape: bf16[32,32], index: 3, kind: input, shape index: {}]   ;;  %s924_s4 = inlined_call_operand.hbm [shape: f32[1,32], index: 4, kind: input, shape index: {}]   ;;  %s925_s5 = inlined_call_operand.hbm [shape: f32[1,32], index: 5, kind: input, shape index: {}]   ;;  %s926_s6 = inlined_call_operand.hbm [shape: f32[1,32], index: 6, kind: input, shape index: {}]   ;;  %s927_s7 = inlined_call_operand.vmem [shape: f32[16,32], index: 7, kind: output, shape index: {}]  }
   0x1   :  { %13 = vsyncpa [#allocation5], 0 }
   0x2   :  { %14 = vsyncpa [#allocation8], 0  ;;  %s828_s24 = smov 0  }
   0x3 LB: > { %s233_s27 = sshll.u32 %s924_s4, 4  ;;  %s837_s28 = sadd.s32 4294967295, %s781_s24   ;;  %s781_s24 = sphi %s828_s24, %s20_s24   ;;  %s234_s27 = int_to_ptr.hbm [resolvable:$true] %s233_s27 }
   0x4   : > { %p548_p0 = scmp.ge.s32.totalorder %s781_s24, 1  ;;  %p203_p1 = scmp.lt.s32.totalorder %s781_s24, 3 }
   0x5   : > { %p614_p2 = scmp.eq.s32.totalorder %s837_s28, 0  ;;  %s783_s30 = smov [#allocation4]  }
   0x6   : > { %p842_p3 = pnand %p548_p0, %p203_p1  ;;  %s235_s8 = sshll.u32 %s783_s30, 4  ;;  %s236_s8 = int_to_ptr.vmem [resolvable:$true] %s235_s8 }
   0x7   : > { %s218_s11 = sshll.u32 %s922_s2, 4  ;;  %s245_s14 = sshll.u32 %s925_s5, 4  ;;  %s219_s11 = int_to_ptr.hbm [resolvable:$true] %s218_s11  ;;  %s246_s14 = int_to_ptr.hbm [resolvable:$true] %s245_s14 }
   0x8   : > { %p601_p4 = pneg %p842_p3  ;;  %s784_s16 = smov [#allocation2]  }
   0x9   : > { %s220_s17 = sshll.u32 %s784_s16, 4  ;;  %s785_s18 = smov [#allocation6]   ;;  %s221_s17 = int_to_ptr.vmem [resolvable:$true] %s220_s17 }
   0xa   : > { %p856_p5 = pnand %p614_p2, %p601_p4  ;;  %s247_s19 = sshll.u32 %s785_s18, 4  ;;  %s248_s19 = int_to_ptr.vmem [resolvable:$true] %s247_s19 }
   0xb   : > { %s257_s22 = sshll.u32 %s926_s6, 4  ;;  %s786_s23 = smov [#allocation7]   ;;  %s258_s22 = int_to_ptr.hbm [resolvable:$true] %s257_s22 }
   0xc   : > { %607 = dma.hbm_to_vmem [thread:$0]  (!%p856_p5), %s234_s27, 16, %s236_s8, [#allocation5]  }
   0xd   : > { %604 = dma.hbm_to_vmem [thread:$0]  (!%p856_p5), %s219_s11, 16, %s221_s17, [#allocation3]  }
   0xe   : > { %610 = dma.hbm_to_vmem [thread:$0]  (!%p856_p5), %s246_s14, 16, %s248_s19, [#allocation5]  }
   0xf   : > { %s259_s25 = sshll.u32 %s786_s23, 4  ;;  %279 = sbr.rel (%p842_p3) target bundleno = 564 (0x234), region = 48  ;;  %s260_s25 = int_to_ptr.vmem [resolvable:$true] %s259_s25 }
  0x10   : > { %613 = dma.hbm_to_vmem [thread:$0]  (!%p856_p5), %s258_s22, 16, %s260_s25, [#allocation8]  }
  0x14   : > { %768 = dma.done.wait (%p614_p2), [#allocation3], 16  }
  0x15   : > { %770 = vsyncadd (%p614_p2), [#allocation3], 4294967280 }
  0x16   : > { %772 = dma.done.wait (%p614_p2), [#allocation5], 32  }
  0x17   : > { %774 = vsyncadd (%p614_p2), [#allocation5], 4294967264 }
  0x18   : > { %776 = dma.done.wait (%p614_p2), [#allocation8], 16  }
  0x19   : > { %778 = vsyncadd (%p614_p2), [#allocation8], 4294967280  ;;  %p325_p6 = scmp.lt.s32.totalorder %s837_s28, 1  ;;  %v582_v0 = vld [vmem:[%s921_s1 + $0x8] sm:$0xff]  ;;  %v581_v1 = vld [vmem:[%s921_s1] sm:$0xff]  ;;  %vm356_vm0 = vcmask 261120  }
  0x1a   : > { %366 = vmatpush.bf16.msra.mxu0 %v582_v0  ;;  %v584_v4 = vld [vmem:[%s923_s3 + $0x8] sm:$0xff]  ;;  %v583_v5 = vld [vmem:[%s923_s3] sm:$0xff]  ;;  %v787_v18 = vmov 32.0  }
  0x1b   : > { %s931_s28 = smov (!%p325_p6, %s837_s28), 1  ;;  %404 = vmatpush.bf16.msra.mxu1 %v584_v4  ;;  %v635_v6 = vld [vmem:[#allocation2] ss:$0 sm:$0xff]  ;;  %v636_v12 = vld [vmem:[#allocation4] ss:$0 sm:$0xff]  ;;  %639 = vrcp.f32 %v787_v18 }
  0x1c   : > { %s559_s26 = sshll.u32 %s931_s28, 3  ;;  %v637_v39 = vld [vmem:[#allocation6] ss:$0 sm:$0xff]  ;;  %v638_v41 = vld [vmem:[#allocation7] ss:$0 sm:$0xff] }
  0x1d   : > { %s328_s30 = scalar_lea.vmem %s920_s0, %s559_s26  ;;  %s332_s18 = scalar_lea.vmem %s927_s7, %s559_s26 }
  0x1e   : > { %v334_v2 = vld [vmem:[%s328_s30] sm:$0xff]  ;;  %367 = vmatpush.bf16.msra.mxu0 %v581_v1 }
  0x1f   : > { %v335_v3 = vpack.c.bf16 %v334_v2, %v334_v2  ;;  %405 = vmatpush.bf16.msra.mxu1 %v583_v5 }
  0x21   : > { %569 = vmatmul.msk.bf16.vlgmr.msra.gmra.mxu0 %vm356_vm0, %v335_v3  ;;  %v640_v19 = vpop.eup %639 }
  0x22   : > { %v416_v20 = vmul.f32 32.0, %v640_v19  ;;  %vm420_vm1 = vweird.f32 %v640_v19 }
  0x24   : > { %v417_v21 = vsub.f32 1.0, %v416_v20 }
  0x26   : > { %v418_v22 = vmul.f32 %v640_v19, %v417_v21 }
  0x28   : > { %v419_v23 = vadd.f32 %v640_v19, %v418_v22 }
  0x2a   : > { %v421_v24 = vsel %vm420_vm1, %v640_v19, %v419_v23 }
  0x9e   : > { %v369_v7 = vpop.f32.mrf.mxu0 }
  0x9f   : > { %v370_v8 = vadd.f32 %v635_v6, %v369_v7 }
  0xa1   : > { %v373_v9 = vmax.f32 %v370_v8, 0.0 }
  0xa3   : > { %v374_v10 = vpack.c.bf16 %v373_v9, %v373_v9 }
  0xa5   : > { %578 = vmatmul.msk.bf16.vlgmr.msra.gmra.mxu1 %vm356_vm0, %v374_v10 }
  0xa6   : > { %v371_v11 = vpop.f32.mrf.mxu0 }
 0x122   : > { %v407_v13 = vpop.f32.mrf.mxu1 }
 0x123   : > { %v408_v14 = vadd.f32 %v636_v12, %v407_v13 }
 0x125   : > { %v411_v15 = vadd.f32 %v408_v14, %v334_v2 }
 0x127   : > { %v412_v16 = vsel %vm356_vm0, %v411_v15, 0.0 }
 0x128   : > { %413 = vadd.xlane.f32.xlu0 %v412_v16 }
 0x12a   : > { %v409_v17 = vpop.f32.mrf.mxu1 }
 0x19b   : > { %v414_v25 = vpop.xlane.xlu0 %413 }
 0x19c   : > { %v422_v26 = vmul.f32 %v421_v24, %v414_v25 }
 0x19e   : > { %v423_v27 = vsub.f32 %v411_v15, %v422_v26 }
 0x1a0   : > { %v424_v28 = vmul.f32 %v423_v27, %v423_v27 }
 0x1a2   : > { %v425_v29 = vsel %vm356_vm0, %v424_v28, 0.0 }
 0x1a3   : > { %426 = vadd.xlane.f32.xlu0 %v425_v29 }
 0x216   : > { %v427_v30 = vpop.xlane.xlu0 %426 }
 0x217   : > { %v428_v31 = vmul.f32 %v427_v30, %v421_v24 }
 0x219   : > { %v429_v32 = vadd.f32 1e-05, %v428_v31 }
 0x21b   : > { %641 = vrsqrt.f32 %v429_v32  ;;  %vm436_vm3 = vweird.f32 %v429_v32 }
 0x221   : > { %v642_v33 = vpop.eup %641 }
 0x222   : > { %v431_v34 = vmul.f32 %v642_v33, %v429_v32  ;;  %vm437_vm2 = vweird.f32 %v642_v33 }
 0x223   : > { %vm438_vm4 = vmor %vm436_vm3, %vm437_vm2 }
 0x224   : > { %v432_v35 = vmul.f32 %v642_v33, %v431_v34 }
 0x226   : > { %v433_v36 = vmul.f32 0.5, %v432_v35 }
 0x228   : > { %v434_v37 = vsub.f32 1.5, %v433_v36 }
 0x22a   : > { %v435_v38 = vmul.f32 %v642_v33, %v434_v37 }
 0x22c   : > { %v439_v40 = vsel %vm438_vm4, %v642_v33, %v435_v38 }
 0x22d   : > { %v440_v42 = vmul.f32 %v439_v40, %v423_v27 }
 0x22f   : > { %v445_v43 = vmul.f32 %v637_v39, %v440_v42 }
 0x231   : > { %v450_v44 = vadd.f32 %v638_v41, %v445_v43 }
 0x233   : > { %451 = vst.msk [vmem:[%s332_s18] sm:$0xff] %vm356_vm0, %v450_v44 }
 0x234 PF: > { %s20_s24 = sadd.s32 1, %s781_s24  }
 0x235   : > { %p17_p7 = scmp.ge.s32.totalorder %s20_s24, 4  }
 0x237   :  { %19 = sbr.rel (!%p17_p7) target bundleno = 3 (0x3), region = 95 }
 0x23c   :  { %471 = vsyncpa [#allocation3], 1 }
 0x23d   :  { %473 = vsyncpa [#allocation3 + $0x1], 1 }
 0x23e   :  { %474 = vsyncpa [#allocation5], 1 }
 0x23f   :  { %475 = vsyncpa [#allocation8], 1 }

// kernel: transformer_forward.43
= control target key start
LH: loop header
LB: loop body
LE: loop exit
PB: predicated region body
PF: predicated region fallthrough
CT: control target
= control target key end

     0   :  { %11 = vsyncpa [#allocation3], 0  ;;  %s863_s0 = inlined_call_operand.vmem [shape: f32[16,32], index: 0, kind: input, shape index: {}]   ;;  %s864_s1 = inlined_call_operand.vmem [shape: f32[16,32], index: 1, kind: input, shape index: {}]   ;;  %s865_s2 = inlined_call_operand.hbm [shape: bf16[32,32], index: 2, kind: input, shape index: {}]   ;;  %s866_s3 = inlined_call_operand.hbm [shape: f32[1,32], index: 3, kind: input, shape index: {}]   ;;  %s867_s4 = inlined_call_operand.hbm [shape: f32[1,32], index: 4, kind: input, shape index: {}]   ;;  %s868_s5 = inlined_call_operand.hbm [shape: f32[1,32], index: 5, kind: input, shape index: {}]   ;;  %s869_s6 = inlined_call_operand.vmem [shape: f32[16,32], index: 6, kind: output, shape index: {}]  }
   0x1   :  { %12 = vsyncpa [#allocation5], 0 }
   0x2   :  { %13 = vsyncpa [#allocation8], 0  ;;  %s783_s21 = smov 0  }
   0x3 LB: > { %s212_s24 = sshll.u32 %s866_s3, 4  ;;  %s792_s25 = sadd.s32 4294967295, %s739_s21   ;;  %s739_s21 = sphi %s783_s21, %s19_s21   ;;  %s213_s24 = int_to_ptr.hbm [resolvable:$true] %s212_s24 }
   0x4   : > { %p515_p0 = scmp.ge.s32.totalorder %s739_s21, 1  ;;  %p186_p1 = scmp.lt.s32.totalorder %s739_s21, 3 }
   0x5   : > { %p571_p2 = scmp.eq.s32.totalorder %s792_s25, 0  ;;  %s741_s27 = smov [#allocation4]  }
   0x6   : > { %p797_p3 = pnand %p515_p0, %p186_p1  ;;  %s214_s28 = sshll.u32 %s741_s27, 4  ;;  %s215_s28 = int_to_ptr.vmem [resolvable:$true] %s214_s28 }
   0x7   : > { %s197_s7 = sshll.u32 %s865_s2, 4  ;;  %s742_s9 = smov [#allocation2]   ;;  %s198_s7 = int_to_ptr.hbm [resolvable:$true] %s197_s7 }
   0x8   : > { %p558_p4 = pneg %p797_p3  ;;  %s199_s10 = sshll.u32 %s742_s9, 4  ;;  %s200_s10 = int_to_ptr.vmem [resolvable:$true] %s199_s10 }
   0x9   : > { %s224_s13 = sshll.u32 %s867_s4, 4  ;;  %s743_s14 = smov 64   ;;  %s225_s13 = int_to_ptr.hbm [resolvable:$true] %s224_s13 }
   0xa   : > { %p808_p5 = pnand %p571_p2, %p558_p4  ;;  %s744_s15 = smov 4  }
   0xb   : > { %s745_s16 = smov [#allocation6]   ;;  %s236_s20 = sshll.u32 %s868_s5, 4  ;;  %s237_s20 = int_to_ptr.hbm [resolvable:$true] %s236_s20 }
   0xc   : > { %564 = dma.hbm_to_vmem [thread:$0]  (!%p808_p5), %s213_s24, 16, %s215_s28, [#allocation5]  }
   0xd   : > { %561 = dma.hbm_to_vmem [thread:$0]  (!%p808_p5), %s198_s7, 256, %s200_s10, [#allocation3], %s743_s14, %s743_s14, %s744_s15  }
   0xe   : > { %s226_s17 = sshll.u32 %s745_s16, 4  ;;  %s746_s22 = smov [#allocation7]   ;;  %s227_s17 = int_to_ptr.vmem [resolvable:$true] %s226_s17 }
   0xf   : > { %567 = dma.hbm_to_vmem [thread:$0]  (!%p808_p5), %s225_s13, 16, %s227_s17, [#allocation5]  }
  0x10   : > { %s238_s23 = sshll.u32 %s746_s22, 4  ;;  %265 = sbr.rel (%p797_p3) target bundleno = 433 (0x1b1), region = 44  ;;  %s239_s23 = int_to_ptr.vmem [resolvable:$true] %s238_s23 }
  0x11   : > { %570 = dma.hbm_to_vmem [thread:$0]  (!%p808_p5), %s237_s20, 16, %s239_s23, [#allocation8]  }
  0x15   : > { %726 = dma.done.wait (%p571_p2), [#allocation3], 256  }
  0x16   : > { %728 = vsyncadd (%p571_p2), [#allocation3], 4294967040 }
  0x17   : > { %730 = dma.done.wait (%p571_p2), [#allocation5], 32  }
  0x18   : > { %732 = vsyncadd (%p571_p2), [#allocation5], 4294967264 }
  0x19   : > { %734 = dma.done.wait (%p571_p2), [#allocation8], 16  }
  0x1a   : > { %736 = vsyncadd (%p571_p2), [#allocation8], 4294967280  ;;  %p313_p6 = scmp.lt.s32.totalorder %s792_s25, 1  ;;  %v541_v0 = vld [vmem:[#allocation2 + $0x8] sm:$0xff]  ;;  %v540_v1 = vld [vmem:[#allocation2] sm:$0xff]  ;;  %vm348_vm0 = vcmask 261120  }
  0x1b   : > { %358 = vmatpush.bf16.msra.mxu0 %v541_v0  ;;  %v594_v4 = vld [vmem:[#allocation4] ss:$0 sm:$0xff]  ;;  %v747_v11 = vmov 32.0   ;;  %v595_v32 = vld [vmem:[#allocation6] ss:$0 sm:$0xff] }
  0x1c   : > { %s873_s25 = smov (!%p313_p6, %s792_s25), 1  ;;  %597 = vrcp.f32 %v747_v11  ;;  %v596_v34 = vld [vmem:[#allocation7] ss:$0 sm:$0xff] }
  0x1d   : > { %s842_s24 = sshll.u32 %s873_s25, 3 }
  0x1e   : > { %s316_s28 = scalar_lea.vmem %s863_s0, %s842_s24  ;;  %s320_s25 = scalar_lea.vmem %s864_s1, %s842_s24 }
  0x1f   : > { %v326_v2 = vld [vmem:[%s316_s28] sm:$0xff]  ;;  %359 = vmatpush.bf16.msra.mxu0 %v540_v1  ;;  %s324_s9 = scalar_lea.vmem %s869_s6, %s842_s24 }
  0x20   : > { %v327_v3 = vpack.c.bf16 %v326_v2, %v326_v2  ;;  %v365_v6 = vld [vmem:[%s320_s25] sm:$0xff] }
  0x22   : > { %537 = vmatmul.msk.bf16.vlgmr.msra.gmra.mxu0 %vm348_vm0, %v327_v3  ;;  %v598_v12 = vpop.eup %597 }
  0x23   : > { %v371_v13 = vmul.f32 32.0, %v598_v12  ;;  %vm375_vm1 = vweird.f32 %v598_v12 }
  0x25   : > { %v372_v14 = vsub.f32 1.0, %v371_v13 }
  0x27   : > { %v373_v15 = vmul.f32 %v598_v12, %v372_v14 }
  0x29   : > { %v374_v16 = vadd.f32 %v598_v12, %v373_v15 }
  0x2b   : > { %v376_v17 = vsel %vm375_vm1, %v598_v12, %v374_v16 }
  0x9f   : > { %v361_v5 = vpop.f32.mrf.mxu0 }
  0xa0   : > { %v362_v7 = vadd.f32 %v594_v4, %v361_v5 }
  0xa2   : > { %v366_v8 = vadd.f32 %v365_v6, %v362_v7 }
  0xa4   : > { %v367_v9 = vsel %vm348_vm0, %v366_v8, 0.0 }
  0xa5   : > { %368 = vadd.xlane.f32.xlu0 %v367_v9 }
  0xa7   : > { %v363_v10 = vpop.f32.mrf.mxu0 }
 0x118   : > { %v369_v18 = vpop.xlane.xlu0 %368 }
 0x119   : > { %v377_v19 = vmul.f32 %v376_v17, %v369_v18 }
 0x11b   : > { %v378_v20 = vsub.f32 %v366_v8, %v377_v19 }
 0x11d   : > { %v379_v21 = vmul.f32 %v378_v20, %v378_v20 }
 0x11f   : > { %v380_v22 = vsel %vm348_vm0, %v379_v21, 0.0 }
 0x120   : > { %381 = vadd.xlane.f32.xlu0 %v380_v22 }
 0x193   : > { %v382_v23 = vpop.xlane.xlu0 %381 }
 0x194   : > { %v383_v24 = vmul.f32 %v382_v23, %v376_v17 }
 0x196   : > { %v384_v25 = vadd.f32 1e-05, %v383_v24 }
 0x198   : > { %599 = vrsqrt.f32 %v384_v25  ;;  %vm391_vm3 = vweird.f32 %v384_v25 }
 0x19e   : > { %v600_v26 = vpop.eup %599 }
 0x19f   : > { %v386_v27 = vmul.f32 %v600_v26, %v384_v25  ;;  %vm392_vm2 = vweird.f32 %v600_v26 }
 0x1a0   : > { %vm393_vm4 = vmor %vm391_vm3, %vm392_vm2 }
 0x1a1   : > { %v387_v28 = vmul.f32 %v600_v26, %v386_v27 }
 0x1a3   : > { %v388_v29 = vmul.f32 0.5, %v387_v28 }
 0x1a5   : > { %v389_v30 = vsub.f32 1.5, %v388_v29 }
 0x1a7   : > { %v390_v31 = vmul.f32 %v600_v26, %v389_v30 }
 0x1a9   : > { %v394_v33 = vsel %vm393_vm4, %v600_v26, %v390_v31 }
 0x1aa   : > { %v395_v35 = vmul.f32 %v394_v33, %v378_v20 }
 0x1ac   : > { %v400_v36 = vmul.f32 %v595_v32, %v395_v35 }
 0x1ae   : > { %v405_v37 = vadd.f32 %v596_v34, %v400_v36 }
 0x1b0   : > { %406 = vst.msk [vmem:[%s324_s9] sm:$0xff] %vm348_vm0, %v405_v37 }
 0x1b1 PF: > { %s19_s21 = sadd.s32 1, %s739_s21  }
 0x1b2   : > { %p16_p7 = scmp.ge.s32.totalorder %s19_s21, 4  }
 0x1b4   :  { %18 = sbr.rel (!%p16_p7) target bundleno = 3 (0x3), region = 94 }
 0x1b9   :  { %426 = vsyncpa [#allocation3], 1 }
 0x1ba   :  { %428 = vsyncpa [#allocation3 + $0x1], 1 }
 0x1bb   :  { %429 = vsyncpa [#allocation5], 1 }
 0x1bc   :  { %430 = vsyncpa [#allocation8], 1 }

// kernel: transformer_forward.37
= control target key start
LH: loop header
LB: loop body
LE: loop exit
PB: predicated region body
PF: predicated region fallthrough
CT: control target
= control target key end

     0   :  { %8 = vsyncpa [#allocation3], 0  ;;  %s393_s12 = smov 0   ;;  %s419_s0 = inlined_call_operand.vmem [shape: f32[16,32], index: 0, kind: input, shape index: {}]   ;;  %s420_s1 = inlined_call_operand.vmem [shape: bf16[32,64], index: 1, kind: input, shape index: {}]   ;;  %s421_s2 = inlined_call_operand.hbm [shape: f32[1,64], index: 2, kind: input, shape index: {}]   ;;  %s422_s3 = inlined_call_operand.vmem [shape: f32[16,64], index: 3, kind: output, shape index: {}]  }
   0x1 LB: > { %s288_s13 = sadd.s32 4294967295, %s370_s12   ;;  %p290_p0 = scmp.ge.s32.totalorder %s370_s12, 1  ;;  %s370_s12 = sphi %s393_s12, %s14_s12  }
   0x2   : > { %p113_p1 = scmp.lt.s32.totalorder %s370_s12, 3  ;;  %s128_s16 = sshll.u32 %s421_s2, 4  ;;  %s129_s16 = int_to_ptr.hbm [resolvable:$true] %s128_s16 }
   0x3   : > { %p318_p3 = scmp.eq.s32.totalorder %s288_s13, 0  ;;  %s372_s17 = smov [#allocation2]  }
   0x4   : > { %p114_p2 = pnand %p290_p0, %p113_p1  ;;  %s130_s18 = sshll.u32 %s372_s17, 4  ;;  %s131_s18 = int_to_ptr.vmem [resolvable:$true] %s130_s18 }
   0x6   : > { %p314_p4 = pneg %p114_p2  ;;  %150 = sbr.rel (%p114_p2) target bundleno = 154 (0x9a), region = 32 }
   0x8   : > { %p315_p5 = pnand %p318_p3, %p314_p4 }
   0xa   : > { %317 = dma.hbm_to_vmem [thread:$0]  (!%p315_p5), %s129_s16, 16, %s131_s18, [#allocation3]  }
   0xb   : > { %365 = dma.done.wait (%p318_p3), [#allocation3], 16  }
   0xc   : > { %367 = vsyncadd (%p318_p3), [#allocation3], 4294967280  ;;  %p173_p6 = scmp.lt.s32.totalorder %s288_s13, 1  ;;  %v309_v0 = vld [vmem:[%s420_s1 + $0x8] sm:$0xff]  ;;  %v308_v1 = vld [vmem:[%s420_s1] sm:$0xff]  ;;  %vm204_vm0 = vcmask 261120  }
   0xd   : > { %214 = vmatpush.bf16.msra.mxu0 %v309_v0  ;;  %v329_v4 = vld [vmem:[#allocation2] ss:$0 sm:$0xff]  ;;  %vm221_vm1 = vcmask 523264  }
   0xe   : > { %s424_s13 = smov (!%p173_p6, %s288_s13), 1 }
   0xf   : > { %s295_s19 = sshll.u32 %s424_s13, 3 }
  0x10   : > { %s176_s22 = scalar_lea.vmem %s419_s0, %s295_s19  ;;  %s180_s29 = scalar_lea.vmem %s422_s3, %s295_s19 }
  0x11   : > { %v182_v2 = vld [vmem:[%s176_s22] sm:$0xff]  ;;  %215 = vmatpush.bf16.msra.mxu0 %v308_v1 }
  0x12   : > { %v183_v3 = vpack.c.bf16 %v182_v2, %v182_v2 }
  0x14   : > { %305 = vmatmul.msk.bf16.vlgmr.msra.gmra.mxu0 %vm204_vm0, %v183_v3 }
  0x91   : > { %v217_v5 = vpop.f32.mrf.mxu0 }
  0x92   : > { %v218_v6 = vadd.f32 %v329_v4, %v217_v5 }
  0x94   : > { %222 = vst.msk [vmem:[%s180_s29] sm:$0xff] %vm221_vm1, %v218_v6 }
  0x99   : > { %v219_v7 = vpop.f32.mrf.mxu0 }
  0x9a PF: > { %s14_s12 = sadd.s32 1, %s370_s12  }
  0x9b   : > { %p11_p7 = scmp.ge.s32.totalorder %s14_s12, 4  }
  0x9d   :  { %13 = sbr.rel (!%p11_p7) target bundleno = 1 (0x1), region = 67 }
  0xa2   :  { %242 = vsyncpa [#allocation3], 1 }
  0xa3   :  { %244 = vsyncpa [#allocation3 + $0x1], 1 }

// kernel: transformer_forward.41
= control target key start
LH: loop header
LB: loop body
LE: loop exit
PB: predicated region body
PF: predicated region fallthrough
CT: control target
= control target key end

     0   :  { %10 = vsyncpa [#allocation3], 0  ;;  %s475_s15 = smov 0   ;;  %s504_s0 = inlined_call_operand.vmem [shape: f32[16,32], index: 0, kind: input, shape index: {}]   ;;  %s505_s1 = inlined_call_operand.vmem [shape: bf16[32,96], index: 1, kind: input, shape index: {}]   ;;  %s506_s2 = inlined_call_operand.hbm [shape: f32[1,96], index: 2, kind: input, shape index: {}]   ;;  %s507_s3 = inlined_call_operand.vmem [shape: f32[16,64], index: 3, kind: output, shape index: {0}]   ;;  %s508_s4 = inlined_call_operand.vmem [shape: f32[16,32], index: 4, kind: output, shape index: {1}]  }
   0x1 LB: > { %s362_s16 = sadd.s32 4294967295, %s446_s15   ;;  %p364_p0 = scmp.ge.s32.totalorder %s446_s15, 1  ;;  %s446_s15 = sphi %s475_s15, %s16_s15  }
   0x2   : > { %p141_p1 = scmp.lt.s32.totalorder %s446_s15, 3  ;;  %s156_s19 = sshll.u32 %s506_s2, 4  ;;  %s157_s19 = int_to_ptr.hbm [resolvable:$true] %s156_s19 }
   0x3   : > { %p393_p3 = scmp.eq.s32.totalorder %s362_s16, 0  ;;  %s448_s20 = smov [#allocation2]  }
   0x4   : > { %p142_p2 = pnand %p364_p0, %p141_p1  ;;  %s158_s21 = sshll.u32 %s448_s20, 4  ;;  %s159_s21 = int_to_ptr.vmem [resolvable:$true] %s158_s21 }
   0x6   : > { %p389_p4 = pneg %p142_p2  ;;  %178 = sbr.rel (%p142_p2) target bundleno = 264 (0x108), region = 32 }
   0x8   : > { %p390_p5 = pnand %p393_p3, %p389_p4 }
   0xa   : > { %392 = dma.hbm_to_vmem [thread:$0]  (!%p390_p5), %s157_s19, 16, %s159_s21, [#allocation3]  }
   0xb   : > { %441 = dma.done.wait (%p393_p3), [#allocation3], 16  }
   0xc   : > { %443 = vsyncadd (%p393_p3), [#allocation3], 4294967280  ;;  %p207_p6 = scmp.lt.s32.totalorder %s362_s16, 1  ;;  %v384_v0 = vld [vmem:[%s505_s1 + $0x8] sm:$0xff]  ;;  %v383_v1 = vld [vmem:[%s505_s1] sm:$0xff]  ;;  %vm242_vm0 = vcmask 261120  }
   0xd   : > { %252 = vmatpush.bf16.msra.mxu0 %v384_v0  ;;  %v405_v4 = vld [vmem:[#allocation2] ss:$0 sm:$0xff]  ;;  %vm259_vm1 = vcmask 523264   ;;  %s449_s7 = smov 64  }
   0xe   : > { %s510_s16 = smov (!%p207_p6, %s362_s16), 1 }
   0xf   : > { %s369_s22 = sshll.u32 %s510_s16, 3 }
  0x10   : > { %s210_s25 = scalar_lea.vmem %s504_s0, %s369_s22  ;;  %s214_s6 = scalar_lea.vmem %s507_s3, %s369_s22 }
  0x11   : > { %v220_v2 = vld [vmem:[%s210_s25] sm:$0xff]  ;;  %253 = vmatpush.bf16.msra.mxu0 %v383_v1  ;;  %s218_s10 = scalar_lea.vmem %s508_s4, %s369_s22 }
  0x12   : > { %v221_v3 = vpack.c.bf16 %v220_v2, %v220_v2 }
  0x14   : > { %380 = vmatmul.msk.bf16.vlgmr.msra.gmra.mxu0 %vm242_vm0, %v221_v3 }
  0x91   : > { %v255_v5 = vpop.f32.mrf.mxu0 }
  0x92   : > { %v256_v6 = vadd.f32 %v405_v4, %v255_v5 }
  0x94   : > { %260 = vst.msk [vmem:[%s214_s6] sm:$0xff] %vm259_vm1, %v256_v6  ;;  %262 = vrot.lane.b32.xlu0 %v256_v6, %s449_s7 }
  0x99   : > { %v257_v7 = vpop.f32.mrf.mxu0 }
 0x106   : > { %v263_v8 = vpop.permute.xlu0 %262 }
 0x107   : > { %265 = vst.msk [vmem:[%s218_s10] sm:$0xff] %vm242_vm0, %v263_v8 }
 0x108 PF: > { %s16_s15 = sadd.s32 1, %s446_s15  }
 0x109   : > { %p13_p7 = scmp.ge.s32.totalorder %s16_s15, 4  }
 0x10b   :  { %15 = sbr.rel (!%p13_p7) target bundleno = 1 (0x1), region = 79 }
 0x110   :  { %299 = vsyncpa [#allocation3], 1 }
 0x111   :  { %301 = vsyncpa [#allocation3 + $0x1], 1 }

// kernel: transformer_forward.39
= control target key start
LH: loop header
LB: loop body
LE: loop exit
PB: predicated region body
PF: predicated region fallthrough
CT: control target
= control target key end

     0   :  { %11 = vsyncpa [#allocation3], 0  ;;  %s762_s0 = inlined_call_operand.vmem [shape: f32[16,32], index: 0, kind: input, shape index: {}]   ;;  %s763_s1 = inlined_call_operand.vmem [shape: f32[16,32], index: 1, kind: input, shape index: {}]   ;;  %s764_s2 = inlined_call_operand.vmem [shape: bf16[32,32], index: 2, kind: input, shape index: {}]   ;;  %s765_s3 = inlined_call_operand.hbm [shape: f32[1,32], index: 3, kind: input, shape index: {}]   ;;  %s766_s4 = inlined_call_operand.hbm [shape: f32[1,32], index: 4, kind: input, shape index: {}]   ;;  %s767_s5 = inlined_call_operand.hbm [shape: f32[1,32], index: 5, kind: input, shape index: {}]   ;;  %s768_s6 = inlined_call_operand.vmem [shape: f32[16,32], index: 6, kind: output, shape index: {}]  }
   0x1   :  { %12 = vsyncpa [#allocation5], 0  ;;  %s705_s21 = smov 0  }
   0x2 LB: > { %s212_s24 = sshll.u32 %s766_s4, 4  ;;  %s486_s25 = sadd.s32 4294967295, %s664_s21   ;;  %s664_s21 = sphi %s705_s21, %s18_s21   ;;  %s213_s24 = int_to_ptr.hbm [resolvable:$true] %s212_s24 }
   0x3   : > { %p488_p0 = scmp.ge.s32.totalorder %s664_s21, 1  ;;  %p185_p1 = scmp.lt.s32.totalorder %s664_s21, 3 }
   0x4   : > { %p535_p2 = scmp.eq.s32.totalorder %s486_s25, 0  ;;  %s666_s27 = smov [#allocation4]  }
   0x5   : > { %p716_p3 = pnand %p488_p0, %p185_p1  ;;  %s214_s28 = sshll.u32 %s666_s27, 4  ;;  %s215_s28 = int_to_ptr.vmem [resolvable:$true] %s214_s28 }
   0x6   : > { %s200_s7 = sshll.u32 %s765_s3, 4  ;;  %s224_s10 = sshll.u32 %s767_s5, 4  ;;  %s201_s7 = int_to_ptr.hbm [resolvable:$true] %s200_s7  ;;  %s225_s10 = int_to_ptr.hbm [resolvable:$true] %s224_s10 }
   0x7   : > { %p525_p4 = pneg %p716_p3  ;;  %s667_s11 = smov [#allocation2]  }
   0x8   : > { %s202_s12 = sshll.u32 %s667_s11, 4  ;;  %s668_s13 = smov [#allocation6]   ;;  %s203_s12 = int_to_ptr.vmem [resolvable:$true] %s202_s12 }
   0x9   : > { %p526_p5 = pnand %p535_p2, %p525_p4  ;;  %s226_s14 = sshll.u32 %s668_s13, 4  ;;  %s227_s14 = int_to_ptr.vmem [resolvable:$true] %s226_s14 }
   0xa   : > { %253 = sbr.rel (%p716_p3) target bundleno = 425 (0x1a9), region = 44 }
   0xb   : > { %531 = dma.hbm_to_vmem [thread:$0]  (!%p526_p5), %s213_s24, 16, %s215_s28, [#allocation5]  }
   0xc   : > { %528 = dma.hbm_to_vmem [thread:$0]  (!%p526_p5), %s201_s7, 16, %s203_s12, [#allocation3]  }
   0xd   : > { %534 = dma.hbm_to_vmem [thread:$0]  (!%p526_p5), %s225_s10, 16, %s227_s14, [#allocation5]  }
   0xf   : > { %655 = dma.done.wait (%p535_p2), [#allocation3], 16  }
  0x10   : > { %657 = vsyncadd (%p535_p2), [#allocation3], 4294967280 }
  0x11   : > { %659 = dma.done.wait (%p535_p2), [#allocation5], 32  }
  0x12   : > { %661 = vsyncadd (%p535_p2), [#allocation5], 4294967264  ;;  %p296_p6 = scmp.lt.s32.totalorder %s486_s25, 1  ;;  %v512_v0 = vld [vmem:[%s764_s2 + $0x8] sm:$0xff]  ;;  %v511_v1 = vld [vmem:[%s764_s2] sm:$0xff]  ;;  %vm331_vm0 = vcmask 261120  }
  0x13   : > { %341 = vmatpush.bf16.msra.mxu0 %v512_v0  ;;  %v553_v4 = vld [vmem:[#allocation2] ss:$0 sm:$0xff]  ;;  %v669_v11 = vmov 32.0   ;;  %v554_v32 = vld [vmem:[#allocation4] ss:$0 sm:$0xff] }
  0x14   : > { %s771_s25 = smov (!%p296_p6, %s486_s25), 1  ;;  %556 = vrcp.f32 %v669_v11  ;;  %v555_v34 = vld [vmem:[#allocation6] ss:$0 sm:$0xff] }
  0x15   : > { %s735_s15 = sshll.u32 %s771_s25, 3 }
  0x16   : > { %s299_s18 = scalar_lea.vmem %s762_s0, %s735_s15  ;;  %s303_s26 = scalar_lea.vmem %s763_s1, %s735_s15 }
  0x17   : > { %v309_v2 = vld [vmem:[%s299_s18] sm:$0xff]  ;;  %342 = vmatpush.bf16.msra.mxu0 %v511_v1  ;;  %s307_s29 = scalar_lea.vmem %s768_s6, %s735_s15 }
  0x18   : > { %v310_v3 = vpack.c.bf16 %v309_v2, %v309_v2  ;;  %v348_v6 = vld [vmem:[%s303_s26] sm:$0xff] }
  0x1a   : > { %508 = vmatmul.msk.bf16.vlgmr.msra.gmra.mxu0 %vm331_vm0, %v310_v3  ;;  %v557_v12 = vpop.eup %556 }
  0x1b   : > { %v354_v13 = vmul.f32 32.0, %v557_v12  ;;  %vm358_vm1 = vweird.f32 %v557_v12 }
  0x1d   : > { %v355_v14 = vsub.f32 1.0, %v354_v13 }
  0x1f   : > { %v356_v15 = vmul.f32 %v557_v12, %v355_v14 }
  0x21   : > { %v357_v16 = vadd.f32 %v557_v12, %v356_v15 }
  0x23   : > { %v359_v17 = vsel %vm358_vm1, %v557_v12, %v357_v16 }
  0x97   : > { %v344_v5 = vpop.f32.mrf.mxu0 }
  0x98   : > { %v345_v7 = vadd.f32 %v553_v4, %v344_v5 }
  0x9a   : > { %v349_v8 = vadd.f32 %v348_v6, %v345_v7 }
  0x9c   : > { %v350_v9 = vsel %vm331_vm0, %v349_v8, 0.0 }
  0x9d   : > { %351 = vadd.xlane.f32.xlu0 %v350_v9 }
  0x9f   : > { %v346_v10 = vpop.f32.mrf.mxu0 }
 0x110   : > { %v352_v18 = vpop.xlane.xlu0 %351 }
 0x111   : > { %v360_v19 = vmul.f32 %v359_v17, %v352_v18 }
 0x113   : > { %v361_v20 = vsub.f32 %v349_v8, %v360_v19 }
 0x115   : > { %v362_v21 = vmul.f32 %v361_v20, %v361_v20 }
 0x117   : > { %v363_v22 = vsel %vm331_vm0, %v362_v21, 0.0 }
 0x118   : > { %364 = vadd.xlane.f32.xlu0 %v363_v22 }
 0x18b   : > { %v365_v23 = vpop.xlane.xlu0 %364 }
 0x18c   : > { %v366_v24 = vmul.f32 %v365_v23, %v359_v17 }
 0x18e   : > { %v367_v25 = vadd.f32 1e-05, %v366_v24 }
 0x190   : > { %558 = vrsqrt.f32 %v367_v25  ;;  %vm374_vm3 = vweird.f32 %v367_v25 }
 0x196   : > { %v559_v26 = vpop.eup %558 }
 0x197   : > { %v369_v27 = vmul.f32 %v559_v26, %v367_v25  ;;  %vm375_vm2 = vweird.f32 %v559_v26 }
 0x198   : > { %vm376_vm4 = vmor %vm374_vm3, %vm375_vm2 }
 0x199   : > { %v370_v28 = vmul.f32 %v559_v26, %v369_v27 }
 0x19b   : > { %v371_v29 = vmul.f32 0.5, %v370_v28 }
 0x19d   : > { %v372_v30 = vsub.f32 1.5, %v371_v29 }
 0x19f   : > { %v373_v31 = vmul.f32 %v559_v26, %v372_v30 }
 0x1a1   : > { %v377_v33 = vsel %vm376_vm4, %v559_v26, %v373_v31 }
 0x1a2   : > { %v378_v35 = vmul.f32 %v377_v33, %v361_v20 }
 0x1a4   : > { %v383_v36 = vmul.f32 %v554_v32, %v378_v35 }
 0x1a6   : > { %v388_v37 = vadd.f32 %v555_v34, %v383_v36 }
 0x1a8   : > { %389 = vst.msk [vmem:[%s307_s29] sm:$0xff] %vm331_vm0, %v388_v37 }
 0x1a9 PF: > { %s18_s21 = sadd.s32 1, %s664_s21  }
 0x1aa   : > { %p15_p7 = scmp.ge.s32.totalorder %s18_s21, 4  }
 0x1ac   :  { %17 = sbr.rel (!%p15_p7) target bundleno = 2 (0x2), region = 90 }
 0x1b1   :  { %409 = vsyncpa [#allocation3], 1 }
 0x1b2   :  { %411 = vsyncpa [#allocation3 + $0x1], 1 }
 0x1b3   :  { %412 = vsyncpa [#allocation5], 1 }

// kernel: transformer_forward.44
= control target key start
LH: loop header
LB: loop body
LE: loop exit
PB: predicated region body
PF: predicated region fallthrough
CT: control target
= control target key end

     0   :  { %8 = vsyncpa [#allocation3], 0  ;;  %s506_s0 = inlined_call_operand.vmem [shape: f32[16,32], index: 0, kind: input, shape index: {}]   ;;  %s507_s1 = inlined_call_operand.hbm [shape: bf16[32,32], index: 1, kind: input, shape index: {}]   ;;  %s508_s2 = inlined_call_operand.hbm [shape: f32[1,32], index: 2, kind: input, shape index: {}]   ;;  %s509_s3 = inlined_call_operand.vmem [shape: f32[16,32], index: 3, kind: output, shape index: {}]  }
   0x1   :  { %9 = vsyncpa [#allocation5], 0  ;;  %s470_s12 = smov 0  }
   0x2 LB: > { %s125_s15 = sshll.u32 %s507_s1, 4  ;;  %s314_s16 = sadd.s32 4294967295, %s444_s12   ;;  %s444_s12 = sphi %s470_s12, %s15_s12   ;;  %s126_s15 = int_to_ptr.hbm [resolvable:$true] %s125_s15 }
   0x3   : > { %p316_p0 = scmp.ge.s32.totalorder %s444_s12, 1  ;;  %p114_p1 = scmp.lt.s32.totalorder %s444_s12, 3 }
   0x4   : > { %p353_p2 = scmp.eq.s32.totalorder %s314_s16, 0  ;;  %s446_s18 = smov [#allocation2]  }
   0x5   : > { %p481_p3 = pnand %p316_p0, %p114_p1  ;;  %s127_s19 = sshll.u32 %s446_s18, 4  ;;  %s128_s19 = int_to_ptr.vmem [resolvable:$true] %s127_s19 }
   0x6   : > { %s140_s22 = sshll.u32 %s508_s2, 4  ;;  %s447_s23 = smov [#allocation4]   ;;  %s141_s22 = int_to_ptr.hbm [resolvable:$true] %s140_s22 }
   0x7   : > { %p346_p4 = pneg %p481_p3  ;;  %s142_s24 = sshll.u32 %s447_s23, 4  ;;  %s143_s24 = int_to_ptr.vmem [resolvable:$true] %s142_s24 }
   0x8   : > { %s448_s25 = smov 64   ;;  %s449_s26 = smov 4  }
   0x9   : > { %p347_p5 = pnand %p353_p2, %p346_p4  ;;  %162 = sbr.rel (%p481_p3) target bundleno = 159 (0x9f), region = 32 }
   0xb   : > { %349 = dma.hbm_to_vmem [thread:$0]  (!%p347_p5), %s126_s15, 256, %s128_s19, [#allocation3], %s448_s25, %s448_s25, %s449_s26  }
   0xc   : > { %352 = dma.hbm_to_vmem [thread:$0]  (!%p347_p5), %s141_s22, 16, %s143_s24, [#allocation5]  }
   0xe   : > { %435 = dma.done.wait (%p353_p2), [#allocation3], 256  }
   0xf   : > { %437 = vsyncadd (%p353_p2), [#allocation3], 4294967040 }
  0x10   : > { %439 = dma.done.wait (%p353_p2), [#allocation5], 16  }
  0x11   : > { %441 = vsyncadd (%p353_p2), [#allocation5], 4294967280  ;;  %p190_p6 = scmp.lt.s32.totalorder %s314_s16, 1  ;;  %v337_v0 = vld [vmem:[#allocation2 + $0x8] sm:$0xff]  ;;  %v336_v1 = vld [vmem:[#allocation2] sm:$0xff]  ;;  %vm221_vm0 = vcmask 261120  }
  0x12   : > { %231 = vmatpush.bf16.msra.mxu0 %v337_v0  ;;  %v369_v4 = vld [vmem:[#allocation4] ss:$0 sm:$0xff] }
  0x13   : > { %s512_s16 = smov (!%p190_p6, %s314_s16), 1 }
  0x14   : > { %s323_s27 = sshll.u32 %s512_s16, 3 }
  0x15   : > { %s193_s30 = scalar_lea.vmem %s506_s0, %s323_s27  ;;  %s197_s6 = scalar_lea.vmem %s509_s3, %s323_s27 }
  0x16   : > { %v199_v2 = vld [vmem:[%s193_s30] sm:$0xff]  ;;  %232 = vmatpush.bf16.msra.mxu0 %v336_v1 }
  0x17   : > { %v200_v3 = vpack.c.bf16 %v199_v2, %v199_v2 }
  0x19   : > { %333 = vmatmul.msk.bf16.vlgmr.msra.gmra.mxu0 %vm221_vm0, %v200_v3 }
  0x96   : > { %v234_v5 = vpop.f32.mrf.mxu0 }
  0x97   : > { %v235_v6 = vadd.f32 %v369_v4, %v234_v5 }
  0x99   : > { %238 = vst.msk [vmem:[%s197_s6] sm:$0xff] %vm221_vm0, %v235_v6 }
  0x9e   : > { %v236_v7 = vpop.f32.mrf.mxu0 }
  0x9f PF: > { %s15_s12 = sadd.s32 1, %s444_s12  }
  0xa0   : > { %p12_p7 = scmp.ge.s32.totalorder %s15_s12, 4  }
  0xa2   :  { %14 = sbr.rel (!%p12_p7) target bundleno = 2 (0x2), region = 71 }
  0xa7   :  { %258 = vsyncpa [#allocation3], 1 }
  0xa8   :  { %260 = vsyncpa [#allocation3 + $0x1], 1 }
  0xa9   :  { %261 = vsyncpa [#allocation5], 1 }

// kernel: transformer_forward.45
= control target key start
LH: loop header
LB: loop body
LE: loop exit
PB: predicated region body
PF: predicated region fallthrough
CT: control target
= control target key end

     0   :  { %8 = vsyncpa [#allocation3], 0  ;;  %s507_s0 = inlined_call_operand.vmem [shape: f32[16,32], index: 0, kind: input, shape index: {}]   ;;  %s508_s1 = inlined_call_operand.hbm [shape: bf16[32,64], index: 1, kind: input, shape index: {}]   ;;  %s509_s2 = inlined_call_operand.hbm [shape: f32[1,64], index: 2, kind: input, shape index: {}]   ;;  %s510_s3 = inlined_call_operand.vmem [shape: f32[16,64], index: 3, kind: output, shape index: {}]  }
   0x1   :  { %9 = vsyncpa [#allocation5], 0  ;;  %s471_s12 = smov 0  }
   0x2 LB: > { %s125_s15 = sshll.u32 %s508_s1, 4  ;;  %s315_s16 = sadd.s32 4294967295, %s445_s12   ;;  %s445_s12 = sphi %s471_s12, %s15_s12   ;;  %s126_s15 = int_to_ptr.hbm [resolvable:$true] %s125_s15 }
   0x3   : > { %p317_p0 = scmp.ge.s32.totalorder %s445_s12, 1  ;;  %p114_p1 = scmp.lt.s32.totalorder %s445_s12, 3 }
   0x4   : > { %p354_p2 = scmp.eq.s32.totalorder %s315_s16, 0  ;;  %s447_s18 = smov [#allocation2]  }
   0x5   : > { %p482_p3 = pnand %p317_p0, %p114_p1  ;;  %s127_s19 = sshll.u32 %s447_s18, 4  ;;  %s128_s19 = int_to_ptr.vmem [resolvable:$true] %s127_s19 }
   0x6   : > { %s140_s22 = sshll.u32 %s509_s2, 4  ;;  %s448_s23 = smov [#allocation4]   ;;  %s141_s22 = int_to_ptr.hbm [resolvable:$true] %s140_s22 }
   0x7   : > { %p347_p4 = pneg %p482_p3  ;;  %s142_s24 = sshll.u32 %s448_s23, 4  ;;  %s143_s24 = int_to_ptr.vmem [resolvable:$true] %s142_s24 }
   0x8   : > { %s449_s25 = smov 64   ;;  %s450_s26 = smov 4  }
   0x9   : > { %p348_p5 = pnand %p354_p2, %p347_p4  ;;  %162 = sbr.rel (%p482_p3) target bundleno = 159 (0x9f), region = 32 }
   0xb   : > { %350 = dma.hbm_to_vmem [thread:$0]  (!%p348_p5), %s126_s15, 256, %s128_s19, [#allocation3], %s449_s25, %s449_s25, %s450_s26  }
   0xc   : > { %353 = dma.hbm_to_vmem [thread:$0]  (!%p348_p5), %s141_s22, 16, %s143_s24, [#allocation5]  }
   0xe   : > { %436 = dma.done.wait (%p354_p2), [#allocation3], 256  }
   0xf   : > { %438 = vsyncadd (%p354_p2), [#allocation3], 4294967040 }
  0x10   : > { %440 = dma.done.wait (%p354_p2), [#allocation5], 16  }
  0x11   : > { %442 = vsyncadd (%p354_p2), [#allocation5], 4294967280  ;;  %p190_p6 = scmp.lt.s32.totalorder %s315_s16, 1  ;;  %v338_v0 = vld [vmem:[#allocation2 + $0x8] sm:$0xff]  ;;  %v337_v1 = vld [vmem:[#allocation2] sm:$0xff]  ;;  %vm221_vm0 = vcmask 261120  }
  0x12   : > { %231 = vmatpush.bf16.msra.mxu0 %v338_v0  ;;  %v370_v4 = vld [vmem:[#allocation4] ss:$0 sm:$0xff]  ;;  %vm238_vm1 = vcmask 523264  }
  0x13   : > { %s513_s16 = smov (!%p190_p6, %s315_s16), 1 }
  0x14   : > { %s324_s27 = sshll.u32 %s513_s16, 3 }
  0x15   : > { %s193_s30 = scalar_lea.vmem %s507_s0, %s324_s27  ;;  %s197_s6 = scalar_lea.vmem %s510_s3, %s324_s27 }
  0x16   : > { %v199_v2 = vld [vmem:[%s193_s30] sm:$0xff]  ;;  %232 = vmatpush.bf16.msra.mxu0 %v337_v1 }
  0x17   : > { %v200_v3 = vpack.c.bf16 %v199_v2, %v199_v2 }
  0x19   : > { %334 = vmatmul.msk.bf16.vlgmr.msra.gmra.mxu0 %vm221_vm0, %v200_v3 }
  0x96   : > { %v234_v5 = vpop.f32.mrf.mxu0 }
  0x97   : > { %v235_v6 = vadd.f32 %v370_v4, %v234_v5 }
  0x99   : > { %239 = vst.msk [vmem:[%s197_s6] sm:$0xff] %vm238_vm1, %v235_v6 }
  0x9e   : > { %v236_v7 = vpop.f32.mrf.mxu0 }
  0x9f PF: > { %s15_s12 = sadd.s32 1, %s445_s12  }
  0xa0   : > { %p12_p7 = scmp.ge.s32.totalorder %s15_s12, 4  }
  0xa2   :  { %14 = sbr.rel (!%p12_p7) target bundleno = 2 (0x2), region = 71 }
  0xa7   :  { %259 = vsyncpa [#allocation3], 1 }
  0xa8   :  { %261 = vsyncpa [#allocation3 + $0x1], 1 }
  0xa9   :  { %262 = vsyncpa [#allocation5], 1 }

// kernel: transformer_forward.49
= control target key start
LH: loop header
LB: loop body
LE: loop exit
PB: predicated region body
PF: predicated region fallthrough
CT: control target
= control target key end

     0   :  { %8 = vsyncpa [#allocation3], 0  ;;  %s398_s12 = smov 0   ;;  %s421_s0 = inlined_call_operand.vmem [shape: f32[16,32], index: 0, kind: input, shape index: {}]   ;;  %s422_s1 = inlined_call_operand.hbm [shape: bf16[32,128], index: 1, kind: input, shape index: {}]   ;;  %s423_s2 = inlined_call_operand.vmem [shape: f32[1,128], index: 2, kind: input, shape index: {}]   ;;  %s424_s3 = inlined_call_operand.vmem [shape: f32[16,128], index: 3, kind: output, shape index: {}]  }
   0x1 LB: > { %s124_s15 = sshll.u32 %s422_s1, 4  ;;  %s289_s16 = sadd.s32 4294967295, %s373_s12   ;;  %s373_s12 = sphi %s398_s12, %s14_s12   ;;  %s125_s15 = int_to_ptr.hbm [resolvable:$true] %s124_s15 }
   0x2   : > { %p291_p0 = scmp.ge.s32.totalorder %s373_s12, 1  ;;  %p113_p1 = scmp.lt.s32.totalorder %s373_s12, 3 }
   0x3   : > { %p319_p2 = scmp.eq.s32.totalorder %s289_s16, 0  ;;  %s375_s17 = smov [#allocation2]  }
   0x4   : > { %p114_p3 = pnand %p291_p0, %p113_p1  ;;  %s126_s18 = sshll.u32 %s375_s17, 4  ;;  %s127_s18 = int_to_ptr.vmem [resolvable:$true] %s126_s18 }
   0x5   : > { %s376_s19 = smov 64   ;;  %s377_s20 = smov 4  }
   0x6   : > { %p315_p4 = pneg %p114_p3  ;;  %152 = sbr.rel (%p114_p3) target bundleno = 154 (0x9a), region = 32 }
   0x8   : > { %p316_p5 = pnand %p319_p2, %p315_p4 }
   0xa   : > { %318 = dma.hbm_to_vmem [thread:$0]  (!%p316_p5), %s125_s15, 256, %s127_s18, [#allocation3], %s376_s19, %s376_s19, %s377_s20  }
   0xb   : > { %368 = dma.done.wait (%p319_p2), [#allocation3], 256  }
   0xc   : > { %370 = vsyncadd (%p319_p2), [#allocation3], 4294967040  ;;  %p175_p6 = scmp.lt.s32.totalorder %s289_s16, 1  ;;  %v310_v0 = vld [vmem:[#allocation2 + $0x8] sm:$0xff]  ;;  %v309_v1 = vld [vmem:[#allocation2] sm:$0xff]  ;;  %vm206_vm0 = vcmask 261120  }
   0xd   : > { %216 = vmatpush.bf16.msra.mxu0 %v310_v0  ;;  %v332_v4 = vld [vmem:[%s423_s2] ss:$0 sm:$0xff] }
   0xe   : > { %s426_s16 = smov (!%p175_p6, %s289_s16), 1 }
   0xf   : > { %s296_s21 = sshll.u32 %s426_s16, 3 }
  0x10   : > { %s178_s24 = scalar_lea.vmem %s421_s0, %s296_s21  ;;  %s182_s29 = scalar_lea.vmem %s424_s3, %s296_s21 }
  0x11   : > { %v184_v2 = vld [vmem:[%s178_s24] sm:$0xff]  ;;  %217 = vmatpush.bf16.msra.mxu0 %v309_v1 }
  0x12   : > { %v185_v3 = vpack.c.bf16 %v184_v2, %v184_v2 }
  0x14   : > { %306 = vmatmul.msk.bf16.vlgmr.msra.gmra.mxu0 %vm206_vm0, %v185_v3 }
  0x91   : > { %v219_v5 = vpop.f32.mrf.mxu0 }
  0x92   : > { %v220_v6 = vadd.f32 %v332_v4, %v219_v5 }
  0x94   : > { %223 = vst [vmem:[%s182_s29] sm:$0xff] %v220_v6 }
  0x99   : > { %v221_v7 = vpop.f32.mrf.mxu0 }
  0x9a PF: > { %s14_s12 = sadd.s32 1, %s373_s12  }
  0x9b   : > { %p11_p7 = scmp.ge.s32.totalorder %s14_s12, 4  }
  0x9d   :  { %13 = sbr.rel (!%p11_p7) target bundleno = 1 (0x1), region = 67 }
  0xa2   :  { %243 = vsyncpa [#allocation3], 1 }
  0xa3   :  { %245 = vsyncpa [#allocation3 + $0x1], 1 }

// kernel: transformer_forward.48
= control target key start
LH: loop header
LB: loop body
LE: loop exit
PB: predicated region body
PF: predicated region fallthrough
CT: control target
= control target key end

     0   :  { %12 = vsyncpa [#allocation3], 0  ;;  %s1068_s0 = inlined_call_operand.vmem [shape: f32[16,32], index: 0, kind: input, shape index: {}]   ;;  %s1069_s1 = inlined_call_operand.hbm [shape: bf16[32,32], index: 1, kind: input, shape index: {}]   ;;  %s1070_s2 = inlined_call_operand.hbm [shape: f32[1,32], index: 2, kind: input, shape index: {}]   ;;  %s1071_s3 = inlined_call_operand.hbm [shape: bf16[32,32], index: 3, kind: input, shape index: {}]   ;;  %s1072_s4 = inlined_call_operand.hbm [shape: f32[1,32], index: 4, kind: input, shape index: {}]   ;;  %s1073_s5 = inlined_call_operand.hbm [shape: f32[1,32], index: 5, kind: input, shape index: {}]   ;;  %s1074_s6 = inlined_call_operand.hbm [shape: f32[1,32], index: 6, kind: input, shape index: {}]   ;;  %s1075_s7 = inlined_call_operand.vmem [shape: f32[16,32], index: 7, kind: output, shape index: {}]  }
   0x1   :  { %13 = vsyncpa [#allocation5], 0 }
   0x2   :  { %14 = vsyncpa [#allocation8], 0 }
   0x3   :  { %15 = vsyncpa [#allocation11], 0  ;;  %s974_s24 = smov 0  }
   0x4 LB: > { %s230_s27 = sshll.u32 %s1070_s2, 4  ;;  %s983_s28 = sadd.s32 4294967295, %s923_s24   ;;  %s923_s24 = sphi %s974_s24, %s21_s24   ;;  %s231_s27 = int_to_ptr.hbm [resolvable:$true] %s230_s27 }
   0x5   : > { %p600_p0 = scmp.ge.s32.totalorder %s923_s24, 1  ;;  %p204_p1 = scmp.lt.s32.totalorder %s923_s24, 3 }
   0x6   : > { %p684_p2 = scmp.eq.s32.totalorder %s983_s28, 0  ;;  %s925_s30 = smov [#allocation4]  }
   0x7   : > { %p988_p3 = pnand %p600_p0, %p204_p1  ;;  %s232_s8 = sshll.u32 %s925_s30, 4  ;;  %s233_s8 = int_to_ptr.vmem [resolvable:$true] %s232_s8 }
   0x8   : > { %s256_s11 = sshll.u32 %s1072_s4, 4  ;;  %s215_s14 = sshll.u32 %s1069_s1, 4  ;;  %s257_s11 = int_to_ptr.hbm [resolvable:$true] %s256_s11  ;;  %s216_s14 = int_to_ptr.hbm [resolvable:$true] %s215_s14 }
   0x9   : > { %p665_p4 = pneg %p988_p3  ;;  %s926_s16 = smov [#allocation7]  }
   0xa   : > { %s258_s17 = sshll.u32 %s926_s16, 4  ;;  %s927_s18 = smov [#allocation2]   ;;  %s259_s17 = int_to_ptr.vmem [resolvable:$true] %s258_s17 }
   0xb   : > { %p1002_p5 = pnand %p684_p2, %p665_p4  ;;  %s217_s19 = sshll.u32 %s927_s18, 4  ;;  %s218_s19 = int_to_ptr.vmem [resolvable:$true] %s217_s19 }
   0xc   : > { %s928_s20 = smov 64   ;;  %s929_s21 = smov 4  }
   0xd   : > { %671 = dma.hbm_to_vmem [thread:$0]  (!%p1002_p5), %s231_s27, 16, %s233_s8, [#allocation5]  }
   0xe   : > { %677 = dma.hbm_to_vmem [thread:$0]  (!%p1002_p5), %s257_s11, 16, %s259_s17, [#allocation8]  }
   0xf   : > { %668 = dma.hbm_to_vmem [thread:$0]  (!%p1002_p5), %s216_s14, 256, %s218_s19, [#allocation3], %s928_s20, %s928_s20, %s929_s21  }
  0x10   : > { %s241_s25 = sshll.u32 %s1071_s3, 4  ;;  %s930_s26 = smov [#allocation6]   ;;  %s242_s25 = int_to_ptr.hbm [resolvable:$true] %s241_s25 }
  0x11   : > { %s243_s30 = sshll.u32 %s930_s26, 4  ;;  %s268_s9 = sshll.u32 %s1073_s5, 4  ;;  %s244_s30 = int_to_ptr.vmem [resolvable:$true] %s243_s30  ;;  %s269_s9 = int_to_ptr.hbm [resolvable:$true] %s268_s9 }
  0x12   : > { %674 = dma.hbm_to_vmem [thread:$0]  (!%p1002_p5), %s242_s25, 256, %s244_s30, [#allocation5], %s928_s20, %s928_s20, %s929_s21  }
  0x13   : > { %s931_s10 = smov [#allocation9]   ;;  %s280_s14 = sshll.u32 %s1074_s6, 4  ;;  %s281_s14 = int_to_ptr.hbm [resolvable:$true] %s280_s14 }
  0x14   : > { %s270_s11 = sshll.u32 %s931_s10, 4  ;;  %s932_s16 = smov [#allocation10]   ;;  %s271_s11 = int_to_ptr.vmem [resolvable:$true] %s270_s11 }
  0x15   : > { %680 = dma.hbm_to_vmem [thread:$0]  (!%p1002_p5), %s269_s9, 16, %s271_s11, [#allocation8]  }
  0x16   : > { %s282_s17 = sshll.u32 %s932_s16, 4  ;;  %302 = sbr.rel (%p988_p3) target bundleno = 573 (0x23d), region = 48  ;;  %s283_s17 = int_to_ptr.vmem [resolvable:$true] %s282_s17 }
  0x17   : > { %683 = dma.hbm_to_vmem [thread:$0]  (!%p1002_p5), %s281_s14, 16, %s283_s17, [#allocation11]  }
  0x1b   : > { %906 = dma.done.wait (%p684_p2), [#allocation3], 256  }
  0x1c   : > { %908 = vsyncadd (%p684_p2), [#allocation3], 4294967040 }
  0x1d   : > { %910 = dma.done.wait (%p684_p2), [#allocation5], 272  }
  0x1e   : > { %912 = vsyncadd (%p684_p2), [#allocation5], 4294967024 }
  0x1f   : > { %914 = dma.done.wait (%p684_p2), [#allocation8], 32  }
  0x20   : > { %916 = vsyncadd (%p684_p2), [#allocation8], 4294967264 }
  0x21   : > { %918 = dma.done.wait (%p684_p2), [#allocation11], 16  }
  0x22   : > { %920 = vsyncadd (%p684_p2), [#allocation11], 4294967280  ;;  %p358_p6 = scmp.lt.s32.totalorder %s983_s28, 1  ;;  %v638_v0 = vld [vmem:[#allocation2 + $0x8] sm:$0xff]  ;;  %v637_v1 = vld [vmem:[#allocation2] sm:$0xff]  ;;  %vm389_vm0 = vcmask 261120  }
  0x23   : > { %399 = vmatpush.bf16.msra.mxu0 %v638_v0  ;;  %v640_v4 = vld [vmem:[#allocation6 + $0x8] sm:$0xff]  ;;  %v639_v5 = vld [vmem:[#allocation6] sm:$0xff]  ;;  %v713_v6 = vld [vmem:[#allocation4] ss:$0 sm:$0xff]  ;;  %v933_v18 = vmov 32.0  }
  0x24   : > { %s1079_s28 = smov (!%p358_p6, %s983_s28), 1  ;;  %437 = vmatpush.bf16.msra.mxu1 %v640_v4  ;;  %v714_v12 = vld [vmem:[#allocation7] ss:$0 sm:$0xff]  ;;  %717 = vrcp.f32 %v933_v18  ;;  %v715_v39 = vld [vmem:[#allocation9] ss:$0 sm:$0xff] }
  0x25   : > { %s615_s29 = sshll.u32 %s1079_s28, 3  ;;  %v716_v41 = vld [vmem:[#allocation10] ss:$0 sm:$0xff] }
  0x26   : > { %s361_s19 = scalar_lea.vmem %s1068_s0, %s615_s29  ;;  %s365_s22 = scalar_lea.vmem %s1075_s7, %s615_s29 }
  0x27   : > { %v367_v2 = vld [vmem:[%s361_s19] sm:$0xff]  ;;  %400 = vmatpush.bf16.msra.mxu0 %v637_v1 }
  0x28   : > { %v368_v3 = vpack.c.bf16 %v367_v2, %v367_v2  ;;  %438 = vmatpush.bf16.msra.mxu1 %v639_v5 }
  0x2a   : > { %625 = vmatmul.msk.bf16.vlgmr.msra.gmra.mxu0 %vm389_vm0, %v368_v3  ;;  %v718_v19 = vpop.eup %717 }
  0x2b   : > { %v449_v20 = vmul.f32 32.0, %v718_v19  ;;  %vm453_vm1 = vweird.f32 %v718_v19 }
  0x2d   : > { %v450_v21 = vsub.f32 1.0, %v449_v20 }
  0x2f   : > { %v451_v22 = vmul.f32 %v718_v19, %v450_v21 }
  0x31   : > { %v452_v23 = vadd.f32 %v718_v19, %v451_v22 }
  0x33   : > { %v454_v24 = vsel %vm453_vm1, %v718_v19, %v452_v23 }
  0xa7   : > { %v402_v7 = vpop.f32.mrf.mxu0 }
  0xa8   : > { %v403_v8 = vadd.f32 %v713_v6, %v402_v7 }
  0xaa   : > { %v406_v9 = vmax.f32 %v403_v8, 0.0 }
  0xac   : > { %v407_v10 = vpack.c.bf16 %v406_v9, %v406_v9 }
  0xae   : > { %634 = vmatmul.msk.bf16.vlgmr.msra.gmra.mxu1 %vm389_vm0, %v407_v10 }
  0xaf   : > { %v404_v11 = vpop.f32.mrf.mxu0 }
 0x12b   : > { %v440_v13 = vpop.f32.mrf.mxu1 }
 0x12c   : > { %v441_v14 = vadd.f32 %v714_v12, %v440_v13 }
 0x12e   : > { %v444_v15 = vadd.f32 %v441_v14, %v367_v2 }
 0x130   : > { %v445_v16 = vsel %vm389_vm0, %v444_v15, 0.0 }
 0x131   : > { %446 = vadd.xlane.f32.xlu0 %v445_v16 }
 0x133   : > { %v442_v17 = vpop.f32.mrf.mxu1 }
 0x1a4   : > { %v447_v25 = vpop.xlane.xlu0 %446 }
 0x1a5   : > { %v455_v26 = vmul.f32 %v454_v24, %v447_v25 }
 0x1a7   : > { %v456_v27 = vsub.f32 %v444_v15, %v455_v26 }
 0x1a9   : > { %v457_v28 = vmul.f32 %v456_v27, %v456_v27 }
 0x1ab   : > { %v458_v29 = vsel %vm389_vm0, %v457_v28, 0.0 }
 0x1ac   : > { %459 = vadd.xlane.f32.xlu0 %v458_v29 }
 0x21f   : > { %v460_v30 = vpop.xlane.xlu0 %459 }
 0x220   : > { %v461_v31 = vmul.f32 %v460_v30, %v454_v24 }
 0x222   : > { %v462_v32 = vadd.f32 1e-05, %v461_v31 }
 0x224   : > { %719 = vrsqrt.f32 %v462_v32  ;;  %vm469_vm3 = vweird.f32 %v462_v32 }
 0x22a   : > { %v720_v33 = vpop.eup %719 }
 0x22b   : > { %v464_v34 = vmul.f32 %v720_v33, %v462_v32  ;;  %vm470_vm2 = vweird.f32 %v720_v33 }
 0x22c   : > { %vm471_vm4 = vmor %vm469_vm3, %vm470_vm2 }
 0x22d   : > { %v465_v35 = vmul.f32 %v720_v33, %v464_v34 }
 0x22f   : > { %v466_v36 = vmul.f32 0.5, %v465_v35 }
 0x231   : > { %v467_v37 = vsub.f32 1.5, %v466_v36 }
 0x233   : > { %v468_v38 = vmul.f32 %v720_v33, %v467_v37 }
 0x235   : > { %v472_v40 = vsel %vm471_vm4, %v720_v33, %v468_v38 }
 0x236   : > { %v473_v42 = vmul.f32 %v472_v40, %v456_v27 }
 0x238   : > { %v478_v43 = vmul.f32 %v715_v39, %v473_v42 }
 0x23a   : > { %v483_v44 = vadd.f32 %v716_v41, %v478_v43 }
 0x23c   : > { %484 = vst.msk [vmem:[%s365_s22] sm:$0xff] %vm389_vm0, %v483_v44 }
 0x23d PF: > { %s21_s24 = sadd.s32 1, %s923_s24  }
 0x23e   : > { %p18_p7 = scmp.ge.s32.totalorder %s21_s24, 4  }
 0x240   :  { %20 = sbr.rel (!%p18_p7) target bundleno = 4 (0x4), region = 103 }
 0x245   :  { %504 = vsyncpa [#allocation3], 1 }
 0x246   :  { %506 = vsyncpa [#allocation3 + $0x1], 1 }
 0x247   :  { %507 = vsyncpa [#allocation5], 1 }
 0x248   :  { %508 = vsyncpa [#allocation8], 1 }
 0x249   :  { %509 = vsyncpa [#allocation11], 1 }

</bundles_post_ra>
